<compile_context>
chip_gen: v6e
topology: v6e:2x2x1
jax: 0.10.0
libtpu: 0.0.40
codegen_flags: <defaults>
</compile_context>

<pallas_src>
import functools

import numpy as np
import jax
import jax.numpy as jnp
from jax import lax
from jax.experimental import pallas as pl
from jax.experimental.pallas import tpu as pltpu

ROW_TILE_CAP = 512           # rows per grid step for the mem-bound row kernels
ATTN_GROUP_ROWS_CAP = 2048   # (window*head groups) * N rows per attention step
# TODO(synk): on v7x (64 MiB VMEM) with production dims (C>=384, hidden=4C),
# cap the row tile lower / tile the MLP hidden dim with an accumulator.


# ----------------------------------------------------------------------------
# small math helpers (used inside kernels)
# ----------------------------------------------------------------------------
def _erf(x):
    # Abramowitz & Stegun 7.1.26 rational approximation (|err| < 1.5e-7).
    # TODO(synk): swap for lax.erf once Mosaic guarantees an erf lowering.
    a1, a2, a3, a4, a5 = 0.254829592, -0.284496736, 1.421413741, -1.453152027, 1.061405429
    p = 0.3275911
    s = jnp.where(x >= 0.0, 1.0, -1.0)
    z = jnp.abs(x)
    t = 1.0 / (1.0 + p * z)
    poly = ((((a5 * t + a4) * t + a3) * t + a2) * t + a1) * t
    return s * (1.0 - poly * jnp.exp(-z * z))


def _gelu_exact(x):
    # matches torch.nn.GELU() (erf form) to ~1e-7
    return 0.5 * x * (1.0 + _erf(x * (1.0 / np.sqrt(2.0))))


def _pick_row_tile(m):
    if m >= ROW_TILE_CAP:
        return ROW_TILE_CAP
    return ((m + 7) // 8) * 8          # round up to sublane multiple


def _pad_rows(x2d, tm):
    m = x2d.shape[0]
    mp = ((m + tm - 1) // tm) * tm
    if mp != m:
        x2d = jnp.pad(x2d, ((0, mp - m), (0, 0)))
    return x2d


# ----------------------------------------------------------------------------
# Kernel 1: fused LayerNorm (norm1) + QKV projection over all tokens
# ----------------------------------------------------------------------------
def _ln_qkv_kernel(x_ref, g_ref, b_ref, w_ref, bias_ref, o_ref):
    x = x_ref[...]
    mu = jnp.mean(x, axis=-1, keepdims=True)
    var = jnp.mean((x - mu) ** 2, axis=-1, keepdims=True)
    xn = (x - mu) * lax.rsqrt(var + 1e-5) * g_ref[...] + b_ref[...]
    o_ref[...] = (jnp.dot(xn.astype(jnp.bfloat16), w_ref[...],
                          preferred_element_type=jnp.float32)
                  + bias_ref[...]).astype(o_ref.dtype)


def ln_qkv_pallas(x2d, gamma, beta, w, bias):
    m, c = x2d.shape
    c3 = w.shape[1]
    tm = _pick_row_tile(m)
    xp = _pad_rows(x2d, tm)
    mp = xp.shape[0]
    out = pl.pallas_call(
        _ln_qkv_kernel,
        out_shape=jax.ShapeDtypeStruct((mp, c3), x2d.dtype),
        grid=(mp // tm,),
        in_specs=[
            pl.BlockSpec((tm, c), lambda i: (i, 0)),
            pl.BlockSpec((1, c), lambda i: (0, 0)),
            pl.BlockSpec((1, c), lambda i: (0, 0)),
            pl.BlockSpec((c, c3), lambda i: (0, 0)),
            pl.BlockSpec((1, c3), lambda i: (0, 0)),
        ],
        out_specs=pl.BlockSpec((tm, c3), lambda i: (i, 0)),
        compiler_params=pltpu.CompilerParams(dimension_semantics=("parallel",)),
    )(xp, gamma.reshape(1, c), beta.reshape(1, c),
      w.astype(jnp.bfloat16), bias.reshape(1, c3))
    return out[:m] if mp != m else out


# ----------------------------------------------------------------------------
# Kernel 2: window-attention core (scores + combined bias + softmax + attn@V)
# one grid step == one image's tile of (window, head) groups, single batched
# contraction
# ----------------------------------------------------------------------------
def _attn_core_kernel(q_ref, k_ref, v_ref, bias_ref, o_ref, *, scale):
    q = q_ref[...].astype(jnp.bfloat16)      # (g, N, hd)
    k = k_ref[...].astype(jnp.bfloat16)
    v = v_ref[...].astype(jnp.bfloat16)
    s = jnp.einsum('bnd,bmd->bnm', q, k,
                   preferred_element_type=jnp.float32)           # (g, N, N)
    s = s * scale + bias_ref[...]
    s = s - jnp.max(s, axis=-1, keepdims=True)
    e = jnp.exp(s)
    p = e * pl.reciprocal(jnp.sum(e, axis=-1, keepdims=True), approx=True)
    o_ref[...] = jnp.einsum('bnm,bmd->bnd', p.astype(jnp.bfloat16), v,
                            preferred_element_type=jnp.float32).astype(o_ref.dtype)
    # TODO(synk): output last dim is head_dim (< 128 lanes); a lane-dense
    # (N, C) output layout would need an in-kernel head transpose (XLU).


def window_attention_core_pallas(q, k, v, bias, scale, num_heads):
    """q,k,v: (B, nW*NH, N, hd); bias: (nW*NH, N, N) shifted block (rel+mask)
    or (NH, N, N) non-shifted block (rel only, shared across windows)."""
    b, gw, n, hd = q.shape
    nW = gw // num_heads
    # largest divisor of nW such that the group row count stays bounded
    wnd_blk = 1
    for d in range(nW, 0, -1):
        if nW % d == 0 and d * num_heads * n <= ATTN_GROUP_ROWS_CAP:
            wnd_blk = d
            break
    g = wnd_blk * num_heads

    if bias.shape[0] == gw:
        # per-window bias (shifted block): index bias by window tile, no copies
        bias_map = lambda bi, wi: (wi, 0, 0)
    else:
        # shared bias (non-shifted block): tile only to one kernel block
        bias = jnp.tile(bias, (wnd_blk, 1, 1)) if wnd_blk > 1 else bias
        bias_map = lambda bi, wi: (0, 0, 0)

    kernel = functools.partial(_attn_core_kernel, scale=scale)
    return pl.pallas_call(
        kernel,
        out_shape=jax.ShapeDtypeStruct((b, gw, n, hd), q.dtype),
        grid=(b, gw // g),
        in_specs=[
            pl.BlockSpec((None, g, n, hd), lambda bi, wi: (bi, wi, 0, 0)),
            pl.BlockSpec((None, g, n, hd), lambda bi, wi: (bi, wi, 0, 0)),
            pl.BlockSpec((None, g, n, hd), lambda bi, wi: (bi, wi, 0, 0)),
            pl.BlockSpec((g, n, n), bias_map),
        ],
        out_specs=pl.BlockSpec((None, g, n, hd), lambda bi, wi: (bi, wi, 0, 0)),
        compiler_params=pltpu.CompilerParams(
            dimension_semantics=("parallel", "parallel")),
    )(q, k, v, bias)


# ----------------------------------------------------------------------------
# Kernel 3: fused output-projection + residual + norm2 + MLP + residual
# ----------------------------------------------------------------------------
def _proj_mlp_kernel(y_ref, sc_ref, wp_ref, bp_ref, g_ref, b_ref,
                     w1_ref, b1_ref, w2_ref, b2_ref, o_ref):
    y = y_ref[...]
    z = (sc_ref[...]
         + jnp.dot(y.astype(jnp.bfloat16), wp_ref[...],
                   preferred_element_type=jnp.float32)
         + bp_ref[...])                                           # first residual
    mu = jnp.mean(z, axis=-1, keepdims=True)
    var = jnp.mean((z - mu) ** 2, axis=-1, keepdims=True)
    zn = (z - mu) * lax.rsqrt(var + 1e-5) * g_ref[...] + b_ref[...]
    h = jnp.dot(zn.astype(jnp.bfloat16), w1_ref[...],
                preferred_element_type=jnp.float32) + b1_ref[...]
    h = _gelu_exact(h)
    out = jnp.dot(h.astype(jnp.bfloat16), w2_ref[...],
                  preferred_element_type=jnp.float32) + b2_ref[...]
    o_ref[...] = (z + out).astype(o_ref.dtype)


def proj_mlp_pallas(y2d, shortcut2d, wproj, bproj, gamma, beta, w1, b1, w2, b2):
    m, c = y2d.shape
    hd = w1.shape[1]
    tm = _pick_row_tile(m)
    yp = _pad_rows(y2d, tm)
    sp = _pad_rows(shortcut2d, tm)
    mp = yp.shape[0]
    out = pl.pallas_call(
        _proj_mlp_kernel,
        out_shape=jax.ShapeDtypeStruct((mp, c), y2d.dtype),
        grid=(mp // tm,),
        in_specs=[
            pl.BlockSpec((tm, c), lambda i: (i, 0)),
            pl.BlockSpec((tm, c), lambda i: (i, 0)),
            pl.BlockSpec((c, c), lambda i: (0, 0)),
            pl.BlockSpec((1, c), lambda i: (0, 0)),
            pl.BlockSpec((1, c), lambda i: (0, 0)),
            pl.BlockSpec((1, c), lambda i: (0, 0)),
            pl.BlockSpec((c, hd), lambda i: (0, 0)),
            pl.BlockSpec((1, hd), lambda i: (0, 0)),
            pl.BlockSpec((hd, c), lambda i: (0, 0)),
            pl.BlockSpec((1, c), lambda i: (0, 0)),
        ],
        out_specs=pl.BlockSpec((tm, c), lambda i: (i, 0)),
        compiler_params=pltpu.CompilerParams(dimension_semantics=("parallel",)),
    )(yp, sp, wproj.astype(jnp.bfloat16), bproj.reshape(1, c),
      gamma.reshape(1, c), beta.reshape(1, c),
      w1.astype(jnp.bfloat16), b1.reshape(1, hd),
      w2.astype(jnp.bfloat16), b2.reshape(1, c))
    return out[:m] if mp != m else out


# ----------------------------------------------------------------------------
# plain-JAX / numpy glue (window partition / reverse / mask / indices)
# ----------------------------------------------------------------------------
def window_partition_jax(x, ws):
    b, h, w, c = x.shape
    x = x.reshape(b, h // ws, ws, w // ws, ws, c)
    return x.transpose(0, 1, 3, 2, 4, 5).reshape(-1, ws, ws, c)


def window_reverse_jax(windows, ws, h, w):
    b = windows.shape[0] // ((h * w) // ws // ws)
    x = windows.reshape(b, h // ws, w // ws, ws, ws, -1)
    return x.transpose(0, 1, 3, 2, 4, 5).reshape(b, h, w, -1)


def _window_partition_np(x, ws):
    b, h, w, c = x.shape
    x = x.reshape(b, h // ws, ws, w // ws, ws, c)
    return x.transpose(0, 1, 3, 2, 4, 5).reshape(-1, ws, ws, c)


def create_mask_np(h, w, window_size, shift_size):
    # faithful reproduction of BasicLayer.create_mask (including its slice set)
    hp = int(np.ceil(h / window_size)) * window_size
    wp = int(np.ceil(w / window_size)) * window_size
    img_mask = np.zeros((1, hp, wp, 1), dtype=np.float32)
    h_slices = (slice(0, -window_size), slice(-window_size, -shift_size),
                slice(-shift_size, None))
    w_slices = (slice(0, -window_size), slice(-window_size, -window_size),
                slice(-window_size, None))
    cnt = 0
    for hs in h_slices:
        for ws_ in w_slices:
            img_mask[:, hs, ws_, :] = cnt
            cnt += 1
    mask_windows = _window_partition_np(img_mask, window_size)
    mask_windows = mask_windows.reshape(-1, window_size * window_size)
    attn_mask = mask_windows[:, None, :] - mask_windows[:, :, None]
    attn_mask = np.where(attn_mask != 0, -100.0, 0.0).astype(np.float32)
    return attn_mask  # (nW, N, N)


def relative_position_index_np(window_size):
    ch = np.arange(window_size)
    cw = np.arange(window_size)
    coords = np.stack(np.meshgrid(ch, cw, indexing="ij"))          # (2, ws, ws)
    coords_flatten = coords.reshape(2, -1)
    rel = coords_flatten[:, :, None] - coords_flatten[:, None, :]  # (2, N, N)
    rel = rel.transpose(1, 2, 0).astype(np.int64)
    rel[:, :, 0] += window_size - 1
    rel[:, :, 1] += window_size - 1
    rel[:, :, 0] *= 2 * window_size - 1
    return rel.sum(-1).astype(np.int32)                            # (N, N)


# ----------------------------------------------------------------------------
# parameters
# ----------------------------------------------------------------------------
def init_block_params(key, dim, num_heads, window_size, mlp_ratio):
    hd = int(dim * mlp_ratio)
    ks = jax.random.split(key, 5)

    def lin(k, fan_in, fan_out):
        return (jax.random.normal(k, (fan_in, fan_out), jnp.float32)
                * (1.0 / np.sqrt(fan_in)))

    table = (2 * window_size - 1) * (2 * window_size - 1)
    return dict(
        norm1_g=jnp.ones((dim,), jnp.float32),
        norm1_b=jnp.zeros((dim,), jnp.float32),
        wqkv=lin(ks[0], dim, 3 * dim),
        bqkv=jnp.zeros((3 * dim,), jnp.float32),
        rel_bias_table=jax.random.normal(ks[1], (table, num_heads), jnp.float32) * 0.02,
        wproj=lin(ks[2], dim, dim),
        bproj=jnp.zeros((dim,), jnp.float32),
        norm2_g=jnp.ones((dim,), jnp.float32),
        norm2_b=jnp.zeros((dim,), jnp.float32),
        w1=lin(ks[3], dim, hd),
        b1=jnp.zeros((hd,), jnp.float32),
        w2=lin(ks[4], hd, dim),
        b2=jnp.zeros((dim,), jnp.float32),
        rel_pos_index=jnp.asarray(relative_position_index_np(window_size)),
    )


# ----------------------------------------------------------------------------
# forward passes
# ----------------------------------------------------------------------------
def swin_block_forward(x, H, W, p, window_size, shift_size, bias_combined, num_heads):
    B, L, C = x.shape
    ws = window_size
    n = ws * ws
    hd = C // num_heads
    shortcut2d = x.reshape(B * L, C)

    # norm1 + QKV (per-token linear commutes with pad / roll / partition)
    qkv = ln_qkv_pallas(shortcut2d, p["norm1_g"], p["norm1_b"], p["wqkv"], p["bqkv"])
    qkv = qkv.reshape(B, H, W, 3 * C)

    pad_r = (ws - W % ws) % ws
    pad_d = (ws - H % ws) % ws
    Hp, Wp = H + pad_d, W + pad_r
    if pad_r or pad_d:
        # reference pads LN output with zeros, so padded tokens' qkv == bqkv
        qkv = jnp.pad(qkv, ((0, 0), (0, pad_d), (0, pad_r), (0, 0)))
        row_ok = (jnp.arange(Hp) < H)[:, None]
        col_ok = (jnp.arange(Wp) < W)[None, :]
        valid = (row_ok & col_ok)[None, :, :, None]
        qkv = jnp.where(valid, qkv, p["bqkv"][None, None, None, :])

    if shift_size > 0:
        qkv = jnp.roll(qkv, shift=(-shift_size, -shift_size), axis=(1, 2))

    nW = (Hp // ws) * (Wp // ws)
    qkv_w = window_partition_jax(qkv, ws).reshape(B * nW, n, 3, num_heads, hd)
    qkv_w = qkv_w.transpose(2, 0, 3, 1, 4)            # (3, B*nW, NH, N, hd)
    q = qkv_w[0].reshape(B, nW * num_heads, n, hd)    # window-major, head-minor
    k = qkv_w[1].reshape(B, nW * num_heads, n, hd)
    v = qkv_w[2].reshape(B, nW * num_heads, n, hd)

    attn = window_attention_core_pallas(q, k, v, bias_combined,
                                        hd ** (-0.5), num_heads)

    attn = attn.reshape(B * nW, num_heads, n, hd).transpose(0, 2, 1, 3)
    attn = attn.reshape(B * nW, ws, ws, C)
    shifted = window_reverse_jax(attn, ws, Hp, Wp)
    if shift_size > 0:
        shifted = jnp.roll(shifted, shift=(shift_size, shift_size), axis=(1, 2))
    xo = shifted[:, :H, :W, :].reshape(B * L, C)      # pre-projection attn out

    # proj + residual + norm2 + MLP + residual (single fused kernel)
    out = proj_mlp_pallas(xo, shortcut2d, p["wproj"], p["bproj"],
                          p["norm2_g"], p["norm2_b"],
                          p["w1"], p["b1"], p["w2"], p["b2"])
    return out.reshape(B, L, C)


def basic_layer_forward(x, H, W, block_params, window_size, num_heads):
    shift = window_size // 2
    ws = window_size
    n = ws * ws
    Hp = int(np.ceil(H / ws)) * ws
    Wp = int(np.ceil(W / ws)) * ws
    nW = (Hp // ws) * (Wp // ws)
    attn_mask = jnp.asarray(create_mask_np(H, W, ws, shift))       # (nW, N, N)

    for i, p in enumerate(block_params):
        ss = 0 if i % 2 == 0 else shift
        # pre-combine relative-position bias (+ shift mask) once per block;
        # non-shifted blocks carry only the (NH, N, N) rel-bias (no per-window
        # replication, no zero-mask traffic).
        rel = jnp.take(p["rel_bias_table"], p["rel_pos_index"].reshape(-1), axis=0)
        rel = rel.reshape(n, n, num_heads).transpose(2, 0, 1)      # (NH, N, N)
        if ss > 0:
            bias = (attn_mask[:, None, :, :] + rel[None, :, :, :]
                    ).reshape(nW * num_heads, n, n)
        else:
            bias = rel                                             # (NH, N, N)
        x = swin_block_forward(x, H, W, p, ws, ss, bias, num_heads)
    # downsample is None in this configuration (default)
    return x, H, W


# ----------------------------------------------------------------------------
if __name__ == "__main__":
    B, H, W = 2, 8, 8
    dim, depth, num_heads, window_size = 32, 2, 4, 4
    mlp_ratio = 4.0

    key = jax.random.PRNGKey(0)
    kx, kp = jax.random.split(key)
    x = jax.random.normal(kx, (B, H * W, dim), jnp.float32)

    pkeys = jax.random.split(kp, depth)
    block_params = [init_block_params(pkeys[i], dim, num_heads, window_size, mlp_ratio)
                    for i in range(depth)]

    layer = jax.jit(lambda xx, pp: basic_layer_forward(
        xx, H, W, pp, window_size, num_heads)[0])
    out = jax.block_until_ready(layer(x, block_params))
    assert out.shape == (B, H * W, dim)
    assert bool(jnp.all(jnp.isfinite(out)))
    print("KERNEL_OK")
</pallas_src>

<mosaic_0001>
module attributes {stable_mosaic.version = 11 : i64} {
  func.func @_ln_qkv_kernel(%arg0: i32, %arg1: memref<128x32xf32, #tpu.memory_space<vmem>>, %arg2: memref<1x32xf32, #tpu.memory_space<vmem>>, %arg3: memref<1x32xf32, #tpu.memory_space<vmem>>, %arg4: memref<32x96xbf16, #tpu.memory_space<vmem>>, %arg5: memref<1x96xf32, #tpu.memory_space<vmem>>, %arg6: memref<128x96xf32, #tpu.memory_space<vmem>>) attributes {dimension_semantics = [#tpu.dimension_semantics<parallel>], iteration_bounds = array<i64: 1>, scalar_prefetch = 0 : i64, scratch_operands = 0 : i64, tpu.core_type = #tpu.core_type<tc>, window_params = [{transform_indices = @transform_0, window_bounds = array<i64: 128, 32>}, {pipeline_mode = #tpu.pipeline_mode<synchronous>, transform_indices = @transform_1, window_bounds = array<i64: 1, 32>}, {pipeline_mode = #tpu.pipeline_mode<synchronous>, transform_indices = @transform_2, window_bounds = array<i64: 1, 32>}, {pipeline_mode = #tpu.pipeline_mode<synchronous>, transform_indices = @transform_3, window_bounds = array<i64: 32, 96>}, {pipeline_mode = #tpu.pipeline_mode<synchronous>, transform_indices = @transform_4, window_bounds = array<i64: 1, 96>}, {transform_indices = @transform_5, window_bounds = array<i64: 128, 96>}]} {
    %c0 = arith.constant 0 : index
    %c0_0 = arith.constant 0 : index
    %0 = vector.load %arg1[%c0, %c0_0] : memref<128x32xf32, #tpu.memory_space<vmem>>, vector<128x32xf32>
    %cst = arith.constant dense<0.000000e+00> : vector<128xf32>
    %1 = vector.multi_reduction <add>, %0, %cst [1] : vector<128x32xf32> to vector<128xf32>
    %2 = vector.shape_cast %1 : vector<128xf32> to vector<128x1xf32>
    %cst_1 = arith.constant 3.200000e+01 : f32
    %3 = vector.broadcast %cst_1 : f32 to vector<128x1xf32>
    %4 = arith.divf %2, %3 : vector<128x1xf32>
    %5 = vector.broadcast %4 : vector<128x1xf32> to vector<128x32xf32>
    %6 = arith.subf %0, %5 : vector<128x32xf32>
    %7 = arith.mulf %6, %6 : vector<128x32xf32>
    %cst_2 = arith.constant dense<0.000000e+00> : vector<128xf32>
    %8 = vector.multi_reduction <add>, %7, %cst_2 [1] : vector<128x32xf32> to vector<128xf32>
    %9 = vector.shape_cast %8 : vector<128xf32> to vector<128x1xf32>
    %cst_3 = arith.constant 3.200000e+01 : f32
    %10 = vector.broadcast %cst_3 : f32 to vector<128x1xf32>
    %11 = arith.divf %9, %10 : vector<128x1xf32>
    %12 = vector.broadcast %4 : vector<128x1xf32> to vector<128x32xf32>
    %13 = arith.subf %0, %12 : vector<128x32xf32>
    %cst_4 = arith.constant 9.99999974E-6 : f32
    %14 = vector.broadcast %cst_4 : f32 to vector<128x1xf32>
    %15 = arith.addf %11, %14 : vector<128x1xf32>
    %16 = math.rsqrt %15 : vector<128x1xf32>
    %17 = vector.broadcast %16 : vector<128x1xf32> to vector<128x32xf32>
    %18 = arith.mulf %13, %17 : vector<128x32xf32>
    %c0_5 = arith.constant 0 : index
    %c0_6 = arith.constant 0 : index
    %19 = vector.load %arg2[%c0_5, %c0_6] : memref<1x32xf32, #tpu.memory_space<vmem>>, vector<1x32xf32>
    %20 = vector.broadcast %19 : vector<1x32xf32> to vector<128x32xf32>
    %21 = arith.mulf %18, %20 : vector<128x32xf32>
    %c0_7 = arith.constant 0 : index
    %c0_8 = arith.constant 0 : index
    %22 = vector.load %arg3[%c0_7, %c0_8] : memref<1x32xf32, #tpu.memory_space<vmem>>, vector<1x32xf32>
    %23 = vector.broadcast %22 : vector<1x32xf32> to vector<128x32xf32>
    %24 = arith.addf %21, %23 : vector<128x32xf32>
    %25 = arith.truncf %24 : vector<128x32xf32> to vector<128x32xbf16>
    %c0_9 = arith.constant 0 : index
    %c0_10 = arith.constant 0 : index
    %26 = vector.load %arg4[%c0_9, %c0_10] : memref<32x96xbf16, #tpu.memory_space<vmem>>, vector<32x96xbf16>
    %cst_11 = arith.constant dense<0.000000e+00> : vector<128x96xf32>
    %27 = tpu.matmul %25, %26, %cst_11 {dimension_numbers = #tpu.dot_dimension_numbers<[1], [0], [0], [1], [0, 0, 1, 1], [], []>} : vector<128x32xbf16>, vector<32x96xbf16>, vector<128x96xf32> -> vector<128x96xf32>
    %c0_12 = arith.constant 0 : index
    %c0_13 = arith.constant 0 : index
    %28 = vector.load %arg5[%c0_12, %c0_13] : memref<1x96xf32, #tpu.memory_space<vmem>>, vector<1x96xf32>
    %29 = vector.broadcast %28 : vector<1x96xf32> to vector<128x96xf32>
    %30 = arith.addf %27, %29 : vector<128x96xf32>
    %c0_14 = arith.constant 0 : index
    %c0_15 = arith.constant 0 : index
    %31 = vector.load %arg6[%c0_14, %c0_15] : memref<128x96xf32, #tpu.memory_space<vmem>>, vector<128x96xf32>
    tpu.vector_store %arg6[%c0_14, %c0_15], %30 {strides = array<i32>} : memref<128x96xf32, #tpu.memory_space<vmem>>, vector<128x96xf32>,
    return
  }
  func.func @transform_0(%arg0: i32) -> (i32, i32) {
    %c0_i32 = arith.constant 0 : i32
    %c0_i32_0 = arith.constant 0 : i32
    return %arg0, %c0_i32 : i32, i32
  }
  func.func @transform_1(%arg0: i32) -> (i32, i32) {
    %c0_i32 = arith.constant 0 : i32
    %c0_i32_0 = arith.constant 0 : i32
    %c0_i32_1 = arith.constant 0 : i32
    return %c0_i32, %c0_i32_0 : i32, i32
  }
  func.func @transform_2(%arg0: i32) -> (i32, i32) {
    %c0_i32 = arith.constant 0 : i32
    %c0_i32_0 = arith.constant 0 : i32
    %c0_i32_1 = arith.constant 0 : i32
    return %c0_i32, %c0_i32_0 : i32, i32
  }
  func.func @transform_3(%arg0: i32) -> (i32, i32) {
    %c0_i32 = arith.constant 0 : i32
    %c0_i32_0 = arith.constant 0 : i32
    %c0_i32_1 = arith.constant 0 : i32
    return %c0_i32, %c0_i32_0 : i32, i32
  }
  func.func @transform_4(%arg0: i32) -> (i32, i32) {
    %c0_i32 = arith.constant 0 : i32
    %c0_i32_0 = arith.constant 0 : i32
    %c0_i32_1 = arith.constant 0 : i32
    return %c0_i32, %c0_i32_0 : i32, i32
  }
  func.func @transform_5(%arg0: i32) -> (i32, i32) {
    %c0_i32 = arith.constant 0 : i32
    %c0_i32_0 = arith.constant 0 : i32
    return %arg0, %c0_i32 : i32, i32
  }
}

module attributes {stable_mosaic.version = 11 : i64} {
  func.func @_attn_core_kernel(%arg0: i32, %arg1: i32, %arg2: memref<1x16x16x8xf32, #tpu.memory_space<vmem>>, %arg3: memref<1x16x16x8xf32, #tpu.memory_space<vmem>>, %arg4: memref<1x16x16x8xf32, #tpu.memory_space<vmem>>, %arg5: memref<16x16x16xf32, #tpu.memory_space<vmem>>, %arg6: memref<1x16x16x8xf32, #tpu.memory_space<vmem>>) attributes {dimension_semantics = [#tpu.dimension_semantics<parallel>, #tpu.dimension_semantics<parallel>], iteration_bounds = array<i64: 2, 1>, scalar_prefetch = 0 : i64, scratch_operands = 0 : i64, tpu.core_type = #tpu.core_type<tc>, window_params = [{transform_indices = @transform_0, window_bounds = array<i64: 1, 16, 16, 8>}, {transform_indices = @transform_1, window_bounds = array<i64: 1, 16, 16, 8>}, {transform_indices = @transform_2, window_bounds = array<i64: 1, 16, 16, 8>}, {pipeline_mode = #tpu.pipeline_mode<synchronous>, transform_indices = @transform_3, window_bounds = array<i64: 16, 16, 16>}, {transform_indices = @transform_4, window_bounds = array<i64: 1, 16, 16, 8>}]} {
    %c0 = arith.constant 0 : index
    %c0_0 = arith.constant 0 : index
    %c0_1 = arith.constant 0 : index
    %c0_2 = arith.constant 0 : index
    %0 = vector.load %arg2[%c0, %c0_0, %c0_1, %c0_2] : memref<1x16x16x8xf32, #tpu.memory_space<vmem>>, vector<1x16x16x8xf32>
    %1 = vector.shape_cast %0 : vector<1x16x16x8xf32> to vector<16x16x8xf32>
    %2 = arith.truncf %1 : vector<16x16x8xf32> to vector<16x16x8xbf16>
    %c0_3 = arith.constant 0 : index
    %c0_4 = arith.constant 0 : index
    %c0_5 = arith.constant 0 : index
    %c0_6 = arith.constant 0 : index
    %3 = vector.load %arg3[%c0_3, %c0_4, %c0_5, %c0_6] : memref<1x16x16x8xf32, #tpu.memory_space<vmem>>, vector<1x16x16x8xf32>
    %4 = vector.shape_cast %3 : vector<1x16x16x8xf32> to vector<16x16x8xf32>
    %5 = arith.truncf %4 : vector<16x16x8xf32> to vector<16x16x8xbf16>
    %c0_7 = arith.constant 0 : index
    %c0_8 = arith.constant 0 : index
    %c0_9 = arith.constant 0 : index
    %c0_10 = arith.constant 0 : index
    %6 = vector.load %arg4[%c0_7, %c0_8, %c0_9, %c0_10] : memref<1x16x16x8xf32, #tpu.memory_space<vmem>>, vector<1x16x16x8xf32>
    %7 = vector.shape_cast %6 : vector<1x16x16x8xf32> to vector<16x16x8xf32>
    %8 = arith.truncf %7 : vector<16x16x8xf32> to vector<16x16x8xbf16>
    "tpu.trace_start"() <{level = 10 : i32, message = "bnd,bmd->bnm"}> : () -> ()
    %cst = arith.constant dense<0.000000e+00> : vector<16x16x16xf32>
    %9 = tpu.matmul %2, %5, %cst {dimension_numbers = #tpu.dot_dimension_numbers<[2], [2], [1], [1], [0, 0, 0, 1, 1, 1], [0], [0]>} : vector<16x16x8xbf16>, vector<16x16x8xbf16>, vector<16x16x16xf32> -> vector<16x16x16xf32>
    "tpu.trace_stop"() : () -> ()
    %cst_11 = arith.constant 0.353553385 : f32
    %10 = vector.broadcast %cst_11 : f32 to vector<16x16x16xf32>
    %11 = arith.mulf %9, %10 : vector<16x16x16xf32>
    %c0_12 = arith.constant 0 : index
    %c0_13 = arith.constant 0 : index
    %c0_14 = arith.constant 0 : index
    %12 = vector.load %arg5[%c0_12, %c0_13, %c0_14] : memref<16x16x16xf32, #tpu.memory_space<vmem>>, vector<16x16x16xf32>
    %13 = arith.addf %11, %12 : vector<16x16x16xf32>
    %cst_15 = arith.constant dense<0xFF800000> : vector<16x16xf32>
    %14 = vector.multi_reduction <maximumf>, %13, %cst_15 [2] : vector<16x16x16xf32> to vector<16x16xf32>
    %15 = vector.shape_cast %14 : vector<16x16xf32> to vector<16x16x1xf32>
    %16 = vector.broadcast %15 : vector<16x16x1xf32> to vector<16x16x16xf32>
    %17 = arith.subf %13, %16 : vector<16x16x16xf32>
    %18 = math.exp %17 : vector<16x16x16xf32>
    %cst_16 = arith.constant dense<0.000000e+00> : vector<16x16xf32>
    %19 = vector.multi_reduction <add>, %18, %cst_16 [2] : vector<16x16x16xf32> to vector<16x16xf32>
    %20 = vector.shape_cast %19 : vector<16x16xf32> to vector<16x16x1xf32>
    %21 = tpu.reciprocal %20 {approx = true} : vector<16x16x1xf32> -> vector<16x16x1xf32>
    %22 = vector.broadcast %21 : vector<16x16x1xf32> to vector<16x16x16xf32>
    %23 = arith.mulf %18, %22 : vector<16x16x16xf32>
    %24 = arith.truncf %23 : vector<16x16x16xf32> to vector<16x16x16xbf16>
    "tpu.trace_start"() <{level = 10 : i32, message = "bnm,bmd->bnd"}> : () -> ()
    %cst_17 = arith.constant dense<0.000000e+00> : vector<16x16x8xf32>
    %25 = tpu.matmul %24, %8, %cst_17 {dimension_numbers = #tpu.dot_dimension_numbers<[2], [1], [1], [2], [0, 0, 0, 1, 1, 2], [0], [0]>} : vector<16x16x16xbf16>, vector<16x16x8xbf16>, vector<16x16x8xf32> -> vector<16x16x8xf32>
    "tpu.trace_stop"() : () -> ()
    %c0_18 = arith.constant 0 : index
    %c0_19 = arith.constant 0 : index
    %c0_20 = arith.constant 0 : index
    %c0_21 = arith.constant 0 : index
    %26 = vector.load %arg6[%c0_18, %c0_19, %c0_20, %c0_21] : memref<1x16x16x8xf32, #tpu.memory_space<vmem>>, vector<1x16x16x8xf32>
    %27 = vector.shape_cast %26 : vector<1x16x16x8xf32> to vector<16x16x8xf32>
    %28 = vector.shape_cast %25 : vector<16x16x8xf32> to vector<1x16x16x8xf32>
    tpu.vector_store %arg6[%c0_18, %c0_19, %c0_20, %c0_21], %28 {strides = array<i32>} : memref<1x16x16x8xf32, #tpu.memory_space<vmem>>, vector<1x16x16x8xf32>,
    return
  }
  func.func @transform_0(%arg0: i32, %arg1: i32) -> (i32, i32, i32, i32) {
    %c0_i32 = arith.constant 0 : i32
    %c0_i32_0 = arith.constant 0 : i32
    %c0_i32_1 = arith.constant 0 : i32
    return %arg0, %arg1, %c0_i32, %c0_i32_0 : i32, i32, i32, i32
  }
  func.func @transform_1(%arg0: i32, %arg1: i32) -> (i32, i32, i32, i32) {
    %c0_i32 = arith.constant 0 : i32
    %c0_i32_0 = arith.constant 0 : i32
    %c0_i32_1 = arith.constant 0 : i32
    return %arg0, %arg1, %c0_i32, %c0_i32_0 : i32, i32, i32, i32
  }
  func.func @transform_2(%arg0: i32, %arg1: i32) -> (i32, i32, i32, i32) {
    %c0_i32 = arith.constant 0 : i32
    %c0_i32_0 = arith.constant 0 : i32
    %c0_i32_1 = arith.constant 0 : i32
    return %arg0, %arg1, %c0_i32, %c0_i32_0 : i32, i32, i32, i32
  }
  func.func @transform_3(%arg0: i32, %arg1: i32) -> (i32, i32, i32) {
    %c0_i32 = arith.constant 0 : i32
    %c0_i32_0 = arith.constant 0 : i32
    %c0_i32_1 = arith.constant 0 : i32
    %c0_i32_2 = arith.constant 0 : i32
    return %c0_i32, %c0_i32_0, %c0_i32_1 : i32, i32, i32
  }
  func.func @transform_4(%arg0: i32, %arg1: i32) -> (i32, i32, i32, i32) {
    %c0_i32 = arith.constant 0 : i32
    %c0_i32_0 = arith.constant 0 : i32
    %c0_i32_1 = arith.constant 0 : i32
    return %arg0, %arg1, %c0_i32, %c0_i32_0 : i32, i32, i32, i32
  }
}

module attributes {stable_mosaic.version = 11 : i64} {
  func.func @_proj_mlp_kernel(%arg0: i32, %arg1: memref<128x32xf32, #tpu.memory_space<vmem>>, %arg2: memref<128x32xf32, #tpu.memory_space<vmem>>, %arg3: memref<32x32xbf16, #tpu.memory_space<vmem>>, %arg4: memref<1x32xf32, #tpu.memory_space<vmem>>, %arg5: memref<1x32xf32, #tpu.memory_space<vmem>>, %arg6: memref<1x32xf32, #tpu.memory_space<vmem>>, %arg7: memref<32x128xbf16, #tpu.memory_space<vmem>>, %arg8: memref<1x128xf32, #tpu.memory_space<vmem>>, %arg9: memref<128x32xbf16, #tpu.memory_space<vmem>>, %arg10: memref<1x32xf32, #tpu.memory_space<vmem>>, %arg11: memref<128x32xf32, #tpu.memory_space<vmem>>) attributes {dimension_semantics = [#tpu.dimension_semantics<parallel>], iteration_bounds = array<i64: 1>, scalar_prefetch = 0 : i64, scratch_operands = 0 : i64, tpu.core_type = #tpu.core_type<tc>, window_params = [{transform_indices = @transform_0, window_bounds = array<i64: 128, 32>}, {transform_indices = @transform_1, window_bounds = array<i64: 128, 32>}, {pipeline_mode = #tpu.pipeline_mode<synchronous>, transform_indices = @transform_2, window_bounds = array<i64: 32, 32>}, {pipeline_mode = #tpu.pipeline_mode<synchronous>, transform_indices = @transform_3, window_bounds = array<i64: 1, 32>}, {pipeline_mode = #tpu.pipeline_mode<synchronous>, transform_indices = @transform_4, window_bounds = array<i64: 1, 32>}, {pipeline_mode = #tpu.pipeline_mode<synchronous>, transform_indices = @transform_5, window_bounds = array<i64: 1, 32>}, {pipeline_mode = #tpu.pipeline_mode<synchronous>, transform_indices = @transform_6, window_bounds = array<i64: 32, 128>}, {pipeline_mode = #tpu.pipeline_mode<synchronous>, transform_indices = @transform_7, window_bounds = array<i64: 1, 128>}, {pipeline_mode = #tpu.pipeline_mode<synchronous>, transform_indices = @transform_8, window_bounds = array<i64: 128, 32>}, {pipeline_mode = #tpu.pipeline_mode<synchronous>, transform_indices = @transform_9, window_bounds = array<i64: 1, 32>}, {transform_indices = @transform_10, window_bounds = array<i64: 128, 32>}]} {
    %c0 = arith.constant 0 : index
    %c0_0 = arith.constant 0 : index
    %0 = vector.load %arg1[%c0, %c0_0] : memref<128x32xf32, #tpu.memory_space<vmem>>, vector<128x32xf32>
    %c0_1 = arith.constant 0 : index
    %c0_2 = arith.constant 0 : index
    %1 = vector.load %arg2[%c0_1, %c0_2] : memref<128x32xf32, #tpu.memory_space<vmem>>, vector<128x32xf32>
    %2 = arith.truncf %0 : vector<128x32xf32> to vector<128x32xbf16>
    %c0_3 = arith.constant 0 : index
    %c0_4 = arith.constant 0 : index
    %3 = vector.load %arg3[%c0_3, %c0_4] : memref<32x32xbf16, #tpu.memory_space<vmem>>, vector<32x32xbf16>
    %cst = arith.constant dense<0.000000e+00> : vector<128x32xf32>
    %4 = tpu.matmul %2, %3, %cst {dimension_numbers = #tpu.dot_dimension_numbers<[1], [0], [0], [1], [0, 0, 1, 1], [], []>} : vector<128x32xbf16>, vector<32x32xbf16>, vector<128x32xf32> -> vector<128x32xf32>
    %5 = arith.addf %1, %4 : vector<128x32xf32>
    %c0_5 = arith.constant 0 : index
    %c0_6 = arith.constant 0 : index
    %6 = vector.load %arg4[%c0_5, %c0_6] : memref<1x32xf32, #tpu.memory_space<vmem>>, vector<1x32xf32>
    %7 = vector.broadcast %6 : vector<1x32xf32> to vector<128x32xf32>
    %8 = arith.addf %5, %7 : vector<128x32xf32>
    %cst_7 = arith.constant dense<0.000000e+00> : vector<128xf32>
    %9 = vector.multi_reduction <add>, %8, %cst_7 [1] : vector<128x32xf32> to vector<128xf32>
    %10 = vector.shape_cast %9 : vector<128xf32> to vector<128x1xf32>
    %cst_8 = arith.constant 3.200000e+01 : f32
    %11 = vector.broadcast %cst_8 : f32 to vector<128x1xf32>
    %12 = arith.divf %10, %11 : vector<128x1xf32>
    %13 = vector.broadcast %12 : vector<128x1xf32> to vector<128x32xf32>
    %14 = arith.subf %8, %13 : vector<128x32xf32>
    %15 = arith.mulf %14, %14 : vector<128x32xf32>
    %cst_9 = arith.constant dense<0.000000e+00> : vector<128xf32>
    %16 = vector.multi_reduction <add>, %15, %cst_9 [1] : vector<128x32xf32> to vector<128xf32>
    %17 = vector.shape_cast %16 : vector<128xf32> to vector<128x1xf32>
    %cst_10 = arith.constant 3.200000e+01 : f32
    %18 = vector.broadcast %cst_10 : f32 to vector<128x1xf32>
    %19 = arith.divf %17, %18 : vector<128x1xf32>
    %20 = vector.broadcast %12 : vector<128x1xf32> to vector<128x32xf32>
    %21 = arith.subf %8, %20 : vector<128x32xf32>
    %cst_11 = arith.constant 9.99999974E-6 : f32
    %22 = vector.broadcast %cst_11 : f32 to vector<128x1xf32>
    %23 = arith.addf %19, %22 : vector<128x1xf32>
    %24 = math.rsqrt %23 : vector<128x1xf32>
    %25 = vector.broadcast %24 : vector<128x1xf32> to vector<128x32xf32>
    %26 = arith.mulf %21, %25 : vector<128x32xf32>
    %c0_12 = arith.constant 0 : index
    %c0_13 = arith.constant 0 : index
    %27 = vector.load %arg5[%c0_12, %c0_13] : memref<1x32xf32, #tpu.memory_space<vmem>>, vector<1x32xf32>
    %28 = vector.broadcast %27 : vector<1x32xf32> to vector<128x32xf32>
    %29 = arith.mulf %26, %28 : vector<128x32xf32>
    %c0_14 = arith.constant 0 : index
    %c0_15 = arith.constant 0 : index
    %30 = vector.load %arg6[%c0_14, %c0_15] : memref<1x32xf32, #tpu.memory_space<vmem>>, vector<1x32xf32>
    %31 = vector.broadcast %30 : vector<1x32xf32> to vector<128x32xf32>
    %32 = arith.addf %29, %31 : vector<128x32xf32>
    %33 = arith.truncf %32 : vector<128x32xf32> to vector<128x32xbf16>
    %c0_16 = arith.constant 0 : index
    %c0_17 = arith.constant 0 : index
    %34 = vector.load %arg7[%c0_16, %c0_17] : memref<32x128xbf16, #tpu.memory_space<vmem>>, vector<32x128xbf16>
    %cst_18 = arith.constant dense<0.000000e+00> : vector<128x128xf32>
    %35 = tpu.matmul %33, %34, %cst_18 {dimension_numbers = #tpu.dot_dimension_numbers<[1], [0], [0], [1], [0, 0, 1, 1], [], []>} : vector<128x32xbf16>, vector<32x128xbf16>, vector<128x128xf32> -> vector<128x128xf32>
    %c0_19 = arith.constant 0 : index
    %c0_20 = arith.constant 0 : index
    %36 = vector.load %arg8[%c0_19, %c0_20] : memref<1x128xf32, #tpu.memory_space<vmem>>, vector<1x128xf32>
    %37 = vector.broadcast %36 : vector<1x128xf32> to vector<128x128xf32>
    %38 = arith.addf %35, %37 : vector<128x128xf32>
    %cst_21 = arith.constant 5.000000e-01 : f32
    %39 = vector.broadcast %cst_21 : f32 to vector<128x128xf32>
    %40 = arith.mulf %39, %38 : vector<128x128xf32>
    %cst_22 = arith.constant 0.707106769 : f32
    %41 = vector.broadcast %cst_22 : f32 to vector<128x128xf32>
    %42 = arith.mulf %38, %41 : vector<128x128xf32>
    %cst_23 = arith.constant 0.000000e+00 : f32
    %43 = vector.broadcast %cst_23 : f32 to vector<128x128xf32>
    %44 = arith.cmpf oge, %42, %43 : vector<128x128xf32>
    %cst_24 = arith.constant 1.000000e+00 : f32
    %cst_25 = arith.constant -1.000000e+00 : f32
    %45 = vector.broadcast %cst_24 : f32 to vector<128x128xf32>
    %46 = vector.broadcast %cst_25 : f32 to vector<128x128xf32>
    %47 = arith.select %44, %45, %46 : vector<128x128xi1>, vector<128x128xf32>
    %48 = math.absf %42 : vector<128x128xf32>
    %cst_26 = arith.constant 0.327591091 : f32
    %49 = vector.broadcast %cst_26 : f32 to vector<128x128xf32>
    %50 = arith.mulf %49, %48 : vector<128x128xf32>
    %cst_27 = arith.constant 1.000000e+00 : f32
    %51 = vector.broadcast %cst_27 : f32 to vector<128x128xf32>
    %52 = arith.addf %51, %50 : vector<128x128xf32>
    %cst_28 = arith.constant 1.000000e+00 : f32
    %53 = vector.broadcast %cst_28 : f32 to vector<128x128xf32>
    %54 = arith.divf %53, %52 : vector<128x128xf32>
    %cst_29 = arith.constant 1.06140542 : f32
    %55 = vector.broadcast %cst_29 : f32 to vector<128x128xf32>
    %56 = arith.mulf %55, %54 : vector<128x128xf32>
    %cst_30 = arith.constant -1.45315206 : f32
    %57 = vector.broadcast %cst_30 : f32 to vector<128x128xf32>
    %58 = arith.addf %56, %57 : vector<128x128xf32>
    %59 = arith.mulf %58, %54 : vector<128x128xf32>
    %cst_31 = arith.constant 1.42141378 : f32
    %60 = vector.broadcast %cst_31 : f32 to vector<128x128xf32>
    %61 = arith.addf %59, %60 : vector<128x128xf32>
    %62 = arith.mulf %61, %54 : vector<128x128xf32>
    %cst_32 = arith.constant -0.284496725 : f32
    %63 = vector.broadcast %cst_32 : f32 to vector<128x128xf32>
    %64 = arith.addf %62, %63 : vector<128x128xf32>
    %65 = arith.mulf %64, %54 : vector<128x128xf32>
    %cst_33 = arith.constant 0.254829586 : f32
    %66 = vector.broadcast %cst_33 : f32 to vector<128x128xf32>
    %67 = arith.addf %65, %66 : vector<128x128xf32>
    %68 = arith.mulf %67, %54 : vector<128x128xf32>
    %cst_34 = arith.constant 0.000000e+00 : f32
    %69 = vector.broadcast %cst_34 : f32 to vector<128x128xf32>
    %70 = arith.subf %69, %48 : vector<128x128xf32>
    %71 = arith.mulf %70, %48 : vector<128x128xf32>
    %72 = math.exp %71 : vector<128x128xf32>
    %73 = arith.mulf %68, %72 : vector<128x128xf32>
    %cst_35 = arith.constant 1.000000e+00 : f32
    %74 = vector.broadcast %cst_35 : f32 to vector<128x128xf32>
    %75 = arith.subf %74, %73 : vector<128x128xf32>
    %76 = arith.mulf %47, %75 : vector<128x128xf32>
    %cst_36 = arith.constant 1.000000e+00 : f32
    %77 = vector.broadcast %cst_36 : f32 to vector<128x128xf32>
    %78 = arith.addf %77, %76 : vector<128x128xf32>
    %79 = arith.mulf %40, %78 : vector<128x128xf32>
    %80 = arith.truncf %79 : vector<128x128xf32> to vector<128x128xbf16>
    %c0_37 = arith.constant 0 : index
    %c0_38 = arith.constant 0 : index
    %81 = vector.load %arg9[%c0_37, %c0_38] : memref<128x32xbf16, #tpu.memory_space<vmem>>, vector<128x32xbf16>
    %cst_39 = arith.constant dense<0.000000e+00> : vector<128x32xf32>
    %82 = tpu.matmul %80, %81, %cst_39 {dimension_numbers = #tpu.dot_dimension_numbers<[1], [0], [0], [1], [0, 0, 1, 1], [], []>} : vector<128x128xbf16>, vector<128x32xbf16>, vector<128x32xf32> -> vector<128x32xf32>
    %c0_40 = arith.constant 0 : index
    %c0_41 = arith.constant 0 : index
    %83 = vector.load %arg10[%c0_40, %c0_41] : memref<1x32xf32, #tpu.memory_space<vmem>>, vector<1x32xf32>
    %84 = vector.broadcast %83 : vector<1x32xf32> to vector<128x32xf32>
    %85 = arith.addf %82, %84 : vector<128x32xf32>
    %86 = arith.addf %8, %85 : vector<128x32xf32>
    %c0_42 = arith.constant 0 : index
    %c0_43 = arith.constant 0 : index
    %87 = vector.load %arg11[%c0_42, %c0_43] : memref<128x32xf32, #tpu.memory_space<vmem>>, vector<128x32xf32>
    tpu.vector_store %arg11[%c0_42, %c0_43], %86 {strides = array<i32>} : memref<128x32xf32, #tpu.memory_space<vmem>>, vector<128x32xf32>,
    return
  }
  func.func @transform_0(%arg0: i32) -> (i32, i32) {
    %c0_i32 = arith.constant 0 : i32
    %c0_i32_0 = arith.constant 0 : i32
    return %arg0, %c0_i32 : i32, i32
  }
  func.func @transform_1(%arg0: i32) -> (i32, i32) {
    %c0_i32 = arith.constant 0 : i32
    %c0_i32_0 = arith.constant 0 : i32
    return %arg0, %c0_i32 : i32, i32
  }
  func.func @transform_2(%arg0: i32) -> (i32, i32) {
    %c0_i32 = arith.constant 0 : i32
    %c0_i32_0 = arith.constant 0 : i32
    %c0_i32_1 = arith.constant 0 : i32
    return %c0_i32, %c0_i32_0 : i32, i32
  }
  func.func @transform_3(%arg0: i32) -> (i32, i32) {
    %c0_i32 = arith.constant 0 : i32
    %c0_i32_0 = arith.constant 0 : i32
    %c0_i32_1 = arith.constant 0 : i32
    return %c0_i32, %c0_i32_0 : i32, i32
  }
  func.func @transform_4(%arg0: i32) -> (i32, i32) {
    %c0_i32 = arith.constant 0 : i32
    %c0_i32_0 = arith.constant 0 : i32
    %c0_i32_1 = arith.constant 0 : i32
    return %c0_i32, %c0_i32_0 : i32, i32
  }
  func.func @transform_5(%arg0: i32) -> (i32, i32) {
    %c0_i32 = arith.constant 0 : i32
    %c0_i32_0 = arith.constant 0 : i32
    %c0_i32_1 = arith.constant 0 : i32
    return %c0_i32, %c0_i32_0 : i32, i32
  }
  func.func @transform_6(%arg0: i32) -> (i32, i32) {
    %c0_i32 = arith.constant 0 : i32
    %c0_i32_0 = arith.constant 0 : i32
    %c0_i32_1 = arith.constant 0 : i32
    return %c0_i32, %c0_i32_0 : i32, i32
  }
  func.func @transform_7(%arg0: i32) -> (i32, i32) {
    %c0_i32 = arith.constant 0 : i32
    %c0_i32_0 = arith.constant 0 : i32
    %c0_i32_1 = arith.constant 0 : i32
    return %c0_i32, %c0_i32_0 : i32, i32
  }
  func.func @transform_8(%arg0: i32) -> (i32, i32) {
    %c0_i32 = arith.constant 0 : i32
    %c0_i32_0 = arith.constant 0 : i32
    %c0_i32_1 = arith.constant 0 : i32
    return %c0_i32, %c0_i32_0 : i32, i32
  }
  func.func @transform_9(%arg0: i32) -> (i32, i32) {
    %c0_i32 = arith.constant 0 : i32
    %c0_i32_0 = arith.constant 0 : i32
    %c0_i32_1 = arith.constant 0 : i32
    return %c0_i32, %c0_i32_0 : i32, i32
  }
  func.func @transform_10(%arg0: i32) -> (i32, i32) {
    %c0_i32 = arith.constant 0 : i32
    %c0_i32_0 = arith.constant 0 : i32
    return %arg0, %c0_i32 : i32, i32
  }
}

module attributes {stable_mosaic.version = 11 : i64} {
  func.func @_attn_core_kernel(%arg0: i32, %arg1: i32, %arg2: memref<1x16x16x8xf32, #tpu.memory_space<vmem>>, %arg3: memref<1x16x16x8xf32, #tpu.memory_space<vmem>>, %arg4: memref<1x16x16x8xf32, #tpu.memory_space<vmem>>, %arg5: memref<16x16x16xf32, #tpu.memory_space<vmem>>, %arg6: memref<1x16x16x8xf32, #tpu.memory_space<vmem>>) attributes {dimension_semantics = [#tpu.dimension_semantics<parallel>, #tpu.dimension_semantics<parallel>], iteration_bounds = array<i64: 2, 1>, scalar_prefetch = 0 : i64, scratch_operands = 0 : i64, tpu.core_type = #tpu.core_type<tc>, window_params = [{transform_indices = @transform_0, window_bounds = array<i64: 1, 16, 16, 8>}, {transform_indices = @transform_1, window_bounds = array<i64: 1, 16, 16, 8>}, {transform_indices = @transform_2, window_bounds = array<i64: 1, 16, 16, 8>}, {transform_indices = @transform_3, window_bounds = array<i64: 16, 16, 16>}, {transform_indices = @transform_4, window_bounds = array<i64: 1, 16, 16, 8>}]} {
    %c0 = arith.constant 0 : index
    %c0_0 = arith.constant 0 : index
    %c0_1 = arith.constant 0 : index
    %c0_2 = arith.constant 0 : index
    %0 = vector.load %arg2[%c0, %c0_0, %c0_1, %c0_2] : memref<1x16x16x8xf32, #tpu.memory_space<vmem>>, vector<1x16x16x8xf32>
    %1 = vector.shape_cast %0 : vector<1x16x16x8xf32> to vector<16x16x8xf32>
    %2 = arith.truncf %1 : vector<16x16x8xf32> to vector<16x16x8xbf16>
    %c0_3 = arith.constant 0 : index
    %c0_4 = arith.constant 0 : index
    %c0_5 = arith.constant 0 : index
    %c0_6 = arith.constant 0 : index
    %3 = vector.load %arg3[%c0_3, %c0_4, %c0_5, %c0_6] : memref<1x16x16x8xf32, #tpu.memory_space<vmem>>, vector<1x16x16x8xf32>
    %4 = vector.shape_cast %3 : vector<1x16x16x8xf32> to vector<16x16x8xf32>
    %5 = arith.truncf %4 : vector<16x16x8xf32> to vector<16x16x8xbf16>
    %c0_7 = arith.constant 0 : index
    %c0_8 = arith.constant 0 : index
    %c0_9 = arith.constant 0 : index
    %c0_10 = arith.constant 0 : index
    %6 = vector.load %arg4[%c0_7, %c0_8, %c0_9, %c0_10] : memref<1x16x16x8xf32, #tpu.memory_space<vmem>>, vector<1x16x16x8xf32>
    %7 = vector.shape_cast %6 : vector<1x16x16x8xf32> to vector<16x16x8xf32>
    %8 = arith.truncf %7 : vector<16x16x8xf32> to vector<16x16x8xbf16>
    "tpu.trace_start"() <{level = 10 : i32, message = "bnd,bmd->bnm"}> : () -> ()
    %cst = arith.constant dense<0.000000e+00> : vector<16x16x16xf32>
    %9 = tpu.matmul %2, %5, %cst {dimension_numbers = #tpu.dot_dimension_numbers<[2], [2], [1], [1], [0, 0, 0, 1, 1, 1], [0], [0]>} : vector<16x16x8xbf16>, vector<16x16x8xbf16>, vector<16x16x16xf32> -> vector<16x16x16xf32>
    "tpu.trace_stop"() : () -> ()
    %cst_11 = arith.constant 0.353553385 : f32
    %10 = vector.broadcast %cst_11 : f32 to vector<16x16x16xf32>
    %11 = arith.mulf %9, %10 : vector<16x16x16xf32>
    %c0_12 = arith.constant 0 : index
    %c0_13 = arith.constant 0 : index
    %c0_14 = arith.constant 0 : index
    %12 = vector.load %arg5[%c0_12, %c0_13, %c0_14] : memref<16x16x16xf32, #tpu.memory_space<vmem>>, vector<16x16x16xf32>
    %13 = arith.addf %11, %12 : vector<16x16x16xf32>
    %cst_15 = arith.constant dense<0xFF800000> : vector<16x16xf32>
    %14 = vector.multi_reduction <maximumf>, %13, %cst_15 [2] : vector<16x16x16xf32> to vector<16x16xf32>
    %15 = vector.shape_cast %14 : vector<16x16xf32> to vector<16x16x1xf32>
    %16 = vector.broadcast %15 : vector<16x16x1xf32> to vector<16x16x16xf32>
    %17 = arith.subf %13, %16 : vector<16x16x16xf32>
    %18 = math.exp %17 : vector<16x16x16xf32>
    %cst_16 = arith.constant dense<0.000000e+00> : vector<16x16xf32>
    %19 = vector.multi_reduction <add>, %18, %cst_16 [2] : vector<16x16x16xf32> to vector<16x16xf32>
    %20 = vector.shape_cast %19 : vector<16x16xf32> to vector<16x16x1xf32>
    %21 = tpu.reciprocal %20 {approx = true} : vector<16x16x1xf32> -> vector<16x16x1xf32>
    %22 = vector.broadcast %21 : vector<16x16x1xf32> to vector<16x16x16xf32>
    %23 = arith.mulf %18, %22 : vector<16x16x16xf32>
    %24 = arith.truncf %23 : vector<16x16x16xf32> to vector<16x16x16xbf16>
    "tpu.trace_start"() <{level = 10 : i32, message = "bnm,bmd->bnd"}> : () -> ()
    %cst_17 = arith.constant dense<0.000000e+00> : vector<16x16x8xf32>
    %25 = tpu.matmul %24, %8, %cst_17 {dimension_numbers = #tpu.dot_dimension_numbers<[2], [1], [1], [2], [0, 0, 0, 1, 1, 2], [0], [0]>} : vector<16x16x16xbf16>, vector<16x16x8xbf16>, vector<16x16x8xf32> -> vector<16x16x8xf32>
    "tpu.trace_stop"() : () -> ()
    %c0_18 = arith.constant 0 : index
    %c0_19 = arith.constant 0 : index
    %c0_20 = arith.constant 0 : index
    %c0_21 = arith.constant 0 : index
    %26 = vector.load %arg6[%c0_18, %c0_19, %c0_20, %c0_21] : memref<1x16x16x8xf32, #tpu.memory_space<vmem>>, vector<1x16x16x8xf32>
    %27 = vector.shape_cast %26 : vector<1x16x16x8xf32> to vector<16x16x8xf32>
    %28 = vector.shape_cast %25 : vector<16x16x8xf32> to vector<1x16x16x8xf32>
    tpu.vector_store %arg6[%c0_18, %c0_19, %c0_20, %c0_21], %28 {strides = array<i32>} : memref<1x16x16x8xf32, #tpu.memory_space<vmem>>, vector<1x16x16x8xf32>,
    return
  }
  func.func @transform_0(%arg0: i32, %arg1: i32) -> (i32, i32, i32, i32) {
    %c0_i32 = arith.constant 0 : i32
    %c0_i32_0 = arith.constant 0 : i32
    %c0_i32_1 = arith.constant 0 : i32
    return %arg0, %arg1, %c0_i32, %c0_i32_0 : i32, i32, i32, i32
  }
  func.func @transform_1(%arg0: i32, %arg1: i32) -> (i32, i32, i32, i32) {
    %c0_i32 = arith.constant 0 : i32
    %c0_i32_0 = arith.constant 0 : i32
    %c0_i32_1 = arith.constant 0 : i32
    return %arg0, %arg1, %c0_i32, %c0_i32_0 : i32, i32, i32, i32
  }
  func.func @transform_2(%arg0: i32, %arg1: i32) -> (i32, i32, i32, i32) {
    %c0_i32 = arith.constant 0 : i32
    %c0_i32_0 = arith.constant 0 : i32
    %c0_i32_1 = arith.constant 0 : i32
    return %arg0, %arg1, %c0_i32, %c0_i32_0 : i32, i32, i32, i32
  }
  func.func @transform_3(%arg0: i32, %arg1: i32) -> (i32, i32, i32) {
    %c0_i32 = arith.constant 0 : i32
    %c0_i32_0 = arith.constant 0 : i32
    %c0_i32_1 = arith.constant 0 : i32
    return %arg1, %c0_i32, %c0_i32_0 : i32, i32, i32
  }
  func.func @transform_4(%arg0: i32, %arg1: i32) -> (i32, i32, i32, i32) {
    %c0_i32 = arith.constant 0 : i32
    %c0_i32_0 = arith.constant 0 : i32
    %c0_i32_1 = arith.constant 0 : i32
    return %arg0, %arg1, %c0_i32, %c0_i32_0 : i32, i32, i32, i32
  }
}

</mosaic_0001>

<bundles_post_ra>
// kernel: _lambda_.6
= control target key start
LH: loop header
LB: loop body
LE: loop exit
PB: predicated region body
PF: predicated region fallthrough
CT: control target
= control target key end

     0   :  { %vm37_vm0 = vcmask 261120   ;;  %vm445_vm1 = vcmask 785408   ;;  %s900_s0 = inlined_call_operand.vmem [shape: f32[128,32], index: 0, kind: input, shape index: {}]   ;;  %s901_s3 = inlined_call_operand.vmem [shape: bf16[32,96], index: 3, kind: input, shape index: {}]   ;;  %s902_s1 = inlined_call_operand.vmem [shape: f32[1,32], index: 1, kind: input, shape index: {}]   ;;  %s903_s2 = inlined_call_operand.vmem [shape: f32[1,32], index: 2, kind: input, shape index: {}]   ;;  %s904_s4 = inlined_call_operand.vmem [shape: f32[1,96], index: 4, kind: input, shape index: {}]   ;;  %s905_s5 = inlined_call_operand.vmem [shape: f32[128,96], index: 5, kind: output, shape index: {}]  }
   0x1   :  { %v21_v0 = vld [vmem:[%s900_s0] sm:$0xff]  ;;  %v22_v2 = vld [vmem:[%s900_s0 + $0x8] sm:$0xff]  ;;  %v23_v8 = vld [vmem:[%s900_s0 + $0x10] sm:$0xff] }
   0x2   :  { %v29_v1 = vld [vmem:[%s900_s0 + $0x40] sm:$0xff]  ;;  %v38_v3 = vsel %vm37_vm0, %v21_v0, 0.0  ;;  %v30_v5 = vld [vmem:[%s900_s0 + $0x48] sm:$0xff]  ;;  %v41_v6 = vsel %vm37_vm0, %v22_v2, 0.0  ;;  %v24_v9 = vld [vmem:[%s900_s0 + $0x18] sm:$0xff]  ;;  %v44_v10 = vsel %vm37_vm0, %v23_v8, 0.0 }
   0x3   :  { %v62_v4 = vsel %vm37_vm0, %v29_v1, 0.0  ;;  %39 = vadd.xlane.f32.xlu0 %v38_v3  ;;  %v65_v7 = vsel %vm37_vm0, %v30_v5, 0.0  ;;  %v47_v11 = vsel %vm37_vm0, %v24_v9, 0.0  ;;  %v604_v12 = vld [vmem:[%s900_s0 + $0x50] sm:$0xff]  ;;  %v609_v13 = vld [vmem:[%s900_s0 + $0x58] sm:$0xff]  ;;  %v618_v16 = vld [vmem:[%s900_s0 + $0x20] sm:$0xff] }
   0x4   :  { %63 = vadd.xlane.f32.xlu1 %v62_v4  ;;  %v68_v14 = vsel %vm37_vm0, %v604_v12, 0.0  ;;  %v71_v15 = vsel %vm37_vm0, %v609_v13, 0.0  ;;  %v623_v17 = vld [vmem:[%s900_s0 + $0x28] sm:$0xff]  ;;  %v50_v18 = vsel %vm37_vm0, %v618_v16, 0.0  ;;  %v632_v20 = vld [vmem:[%s900_s0 + $0x60] sm:$0xff]  ;;  %v646_v24 = vld [vmem:[%s900_s0 + $0x30] sm:$0xff] }
   0x5   :  { %v53_v19 = vsel %vm37_vm0, %v623_v17, 0.0  ;;  %v637_v21 = vld [vmem:[%s900_s0 + $0x68] sm:$0xff]  ;;  %v74_v22 = vsel %vm37_vm0, %v632_v20, 0.0  ;;  %v651_v25 = vld [vmem:[%s900_s0 + $0x38] sm:$0xff]  ;;  %v56_v26 = vsel %vm37_vm0, %v646_v24, 0.0  ;;  %v660_v28 = vld [vmem:[%s900_s0 + $0x70] sm:$0xff] }
   0x6   :  { %v77_v23 = vsel %vm37_vm0, %v637_v21, 0.0  ;;  %v59_v27 = vsel %vm37_vm0, %v651_v25, 0.0  ;;  %v665_v29 = vld [vmem:[%s900_s0 + $0x78] sm:$0xff]  ;;  %v80_v30 = vsel %vm37_vm0, %v660_v28, 0.0 }
   0x7   :  { %42 = vadd.xlane.f32.xlu0 %v41_v6  ;;  %v83_v31 = vsel %vm37_vm0, %v665_v29, 0.0 }
   0x8   :  { %66 = vadd.xlane.f32.xlu1 %v65_v7 }
   0xb   :  { %45 = vadd.xlane.f32.xlu0 %v44_v10 }
   0xc   :  { %48 = vadd.xlane.f32.xlu1 %v47_v11 }
   0xf   :  { %69 = vadd.xlane.f32.xlu0 %v68_v14 }
  0x10   :  { %72 = vadd.xlane.f32.xlu1 %v71_v15 }
  0x13   :  { %51 = vadd.xlane.f32.xlu0 %v50_v18 }
  0x14   :  { %54 = vadd.xlane.f32.xlu1 %v53_v19 }
  0x17   :  { %75 = vadd.xlane.f32.xlu0 %v74_v22 }
  0x18   :  { %78 = vadd.xlane.f32.xlu1 %v77_v23 }
  0x1b   :  { %57 = vadd.xlane.f32.xlu0 %v56_v26 }
  0x1c   :  { %60 = vadd.xlane.f32.xlu1 %v59_v27 }
  0x1f   :  { %81 = vadd.xlane.f32.xlu0 %v80_v30 }
  0x20   :  { %84 = vadd.xlane.f32.xlu1 %v83_v31 }
  0x8c   :  { %v40_v32 = vpop.xlane.xlu0 %39 }
  0x8d   :  { %v64_v33 = vpop.xlane.xlu1 %63  ;;  %v87_v34 = vmul.f32 0.03125, %v40_v32 }
  0x8e   :  { %v95_v35 = vmul.f32 0.03125, %v64_v33 }
  0x8f   :  { %v671_v36 = vsub.f32 %v21_v0, %v87_v34 }
  0x90   :  { %v673_v37 = vsub.f32 %v29_v1, %v95_v35  ;;  %v43_v38 = vpop.xlane.xlu0 %42 }
  0x91   :  { %v67_v39 = vpop.xlane.xlu1 %66  ;;  %v88_v40 = vmul.f32 0.03125, %v43_v38  ;;  %v119_v42 = vmul.f32 %v671_v36, %v671_v36 }
  0x92   :  { %v96_v41 = vmul.f32 0.03125, %v67_v39  ;;  %v127_v43 = vmul.f32 %v673_v37, %v673_v37 }
  0x93   :  { %v679_v44 = vsub.f32 %v22_v2, %v88_v40  ;;  %v135_v46 = vsel %vm37_vm0, %v119_v42, 0.0 }
  0x94   :  { %v681_v45 = vsub.f32 %v30_v5, %v96_v41  ;;  %136 = vadd.xlane.f32.xlu0 %v135_v46  ;;  %v46_v47 = vpop.xlane.xlu0 %45  ;;  %v159_v49 = vsel %vm37_vm0, %v127_v43, 0.0 }
  0x95   :  { %v49_v48 = vpop.xlane.xlu1 %48  ;;  %v89_v50 = vmul.f32 0.03125, %v46_v47  ;;  %v120_v52 = vmul.f32 %v679_v44, %v679_v44 }
  0x96   :  { %v90_v51 = vmul.f32 0.03125, %v49_v48  ;;  %v128_v53 = vmul.f32 %v681_v45, %v681_v45 }
  0x97   :  { %v689_v54 = vsub.f32 %v23_v8, %v89_v50  ;;  %v138_v56 = vsel %vm37_vm0, %v120_v52, 0.0 }
  0x98   :  { %v691_v55 = vsub.f32 %v24_v9, %v90_v51  ;;  %160 = vadd.xlane.f32.xlu0 %v159_v49  ;;  %139 = vadd.xlane.f32.xlu1 %v138_v56  ;;  %v70_v57 = vpop.xlane.xlu0 %69  ;;  %v162_v59 = vsel %vm37_vm0, %v128_v53, 0.0  ;;  %v514_v53 = vld [vmem:[%s901_s3] sm:$0xff]  }
  0x99   :  { %v73_v58 = vpop.xlane.xlu1 %72  ;;  %v97_v60 = vmul.f32 0.03125, %v70_v57  ;;  %v121_v62 = vmul.f32 %v689_v54, %v689_v54 }
  0x9a   :  { %v98_v61 = vmul.f32 0.03125, %v73_v58  ;;  %v122_v63 = vmul.f32 %v691_v55, %v691_v55 }
  0x9b   :  { %v700_v0 = vsub.f32 %v604_v12, %v97_v60  ;;  %v141_v2 = vsel %vm37_vm0, %v121_v62, 0.0 }
  0x9c   :  { %v703_v1 = vsub.f32 %v609_v13, %v98_v61  ;;  %163 = vadd.xlane.f32.xlu1 %v162_v59  ;;  %142 = vadd.xlane.f32.xlu0 %v141_v2  ;;  %v52_v3 = vpop.xlane.xlu0 %51  ;;  %v144_v5 = vsel %vm37_vm0, %v122_v63, 0.0 }
  0x9d   :  { %v55_v4 = vpop.xlane.xlu1 %54  ;;  %v91_v6 = vmul.f32 0.03125, %v52_v3  ;;  %v129_v8 = vmul.f32 %v700_v0, %v700_v0 }
  0x9e   :  { %v92_v7 = vmul.f32 0.03125, %v55_v4  ;;  %v130_v9 = vmul.f32 %v703_v1, %v703_v1 }
  0x9f   :  { %v712_v10 = vsub.f32 %v618_v16, %v91_v6  ;;  %v165_v12 = vsel %vm37_vm0, %v129_v8, 0.0 }
  0xa0   :  { %v715_v11 = vsub.f32 %v623_v17, %v92_v7  ;;  %145 = vadd.xlane.f32.xlu1 %v144_v5  ;;  %166 = vadd.xlane.f32.xlu0 %v165_v12  ;;  %v76_v13 = vpop.xlane.xlu0 %75  ;;  %v168_v15 = vsel %vm37_vm0, %v130_v9, 0.0 }
  0xa1   :  { %v79_v14 = vpop.xlane.xlu1 %78  ;;  %v99_v18 = vmul.f32 0.03125, %v76_v13  ;;  %v123_v22 = vmul.f32 %v712_v10, %v712_v10 }
  0xa2   :  { %v100_v19 = vmul.f32 0.03125, %v79_v14  ;;  %v124_v16 = vmul.f32 %v715_v11, %v715_v11 }
  0xa3   :  { %v724_v23 = vsub.f32 %v632_v20, %v99_v18  ;;  %v147_v26 = vsel %vm37_vm0, %v123_v22, 0.0 }
  0xa4   :  { %v727_v17 = vsub.f32 %v637_v21, %v100_v19  ;;  %169 = vadd.xlane.f32.xlu1 %v168_v15  ;;  %148 = vadd.xlane.f32.xlu0 %v147_v26  ;;  %v58_v27 = vpop.xlane.xlu0 %57  ;;  %v150_v31 = vsel %vm37_vm0, %v124_v16, 0.0 }
  0xa5   :  { %v61_v30 = vpop.xlane.xlu1 %60  ;;  %v93_v32 = vmul.f32 0.03125, %v58_v27  ;;  %v131_v34 = vmul.f32 %v724_v23, %v724_v23 }
  0xa6   :  { %v94_v33 = vmul.f32 0.03125, %v61_v30  ;;  %v132_v20 = vmul.f32 %v727_v17, %v727_v17 }
  0xa7   :  { %v736_v35 = vsub.f32 %v646_v24, %v93_v32  ;;  %v171_v38 = vsel %vm37_vm0, %v131_v34, 0.0 }
  0xa8   :  { %v739_v21 = vsub.f32 %v651_v25, %v94_v33  ;;  %151 = vadd.xlane.f32.xlu1 %v150_v31  ;;  %172 = vadd.xlane.f32.xlu0 %v171_v38  ;;  %v82_v39 = vpop.xlane.xlu0 %81  ;;  %v174_v41 = vsel %vm37_vm0, %v132_v20, 0.0  ;;  %v771_v33 = vld [vmem:[%s902_s1] ss:$0 sm:$0xff] }
  0xa9   :  { %v85_v40 = vpop.xlane.xlu1 %84  ;;  %v101_v42 = vmul.f32 0.03125, %v82_v39  ;;  %v125_v46 = vmul.f32 %v736_v35, %v736_v35 }
  0xaa   :  { %v102_v43 = vmul.f32 0.03125, %v85_v40  ;;  %v126_v24 = vmul.f32 %v739_v21, %v739_v21 }
  0xab   :  { %v748_v47 = vsub.f32 %v660_v28, %v101_v42  ;;  %v153_v48 = vsel %vm37_vm0, %v125_v46, 0.0 }
  0xac   :  { %v751_v25 = vsub.f32 %v665_v29, %v102_v43  ;;  %175 = vadd.xlane.f32.xlu1 %v174_v41  ;;  %154 = vadd.xlane.f32.xlu0 %v153_v48  ;;  %v156_v49 = vsel %vm37_vm0, %v126_v24, 0.0  ;;  %v513_v29 = vld [vmem:[%s901_s3 + $0x8] sm:$0xff]  }
  0xad   :  { %v133_v50 = vmul.f32 %v748_v47, %v748_v47  ;;  %489 = vmatprep.subr.bf16.mxu0 %v513_v29  ;;  %509 = vmatprep.subr.bf16.mxu1 %v513_v29 }
  0xae   :  { %v134_v51 = vmul.f32 %v751_v25, %v751_v25  ;;  %490 = vmatpush3.bf16.msra.mxu0 %v513_v29  ;;  %511 = vmatpush3.bf16.msra.mxu1 %v513_v29 }
  0xaf   :  { %v177_v52 = vsel %vm37_vm0, %v133_v50, 0.0  ;;  %491 = vmatprep.subr.bf16.mxu0 %v514_v53  ;;  %510 = vmatprep.subr.bf16.mxu1 %v514_v53 }
  0xb0   :  { %157 = vadd.xlane.f32.xlu1 %v156_v49  ;;  %178 = vadd.xlane.f32.xlu0 %v177_v52  ;;  %v180_v28 = vsel %vm37_vm0, %v134_v51, 0.0 }
  0xb2   :  { %492 = vmatpush3.bf16.msra.mxu0 %v514_v53  ;;  %512 = vmatpush3.bf16.msra.mxu1 %v514_v53 }
  0xb4   :  { %181 = vadd.xlane.f32.xlu1 %v180_v28 }
 0x11d   :  { %v137_v56 = vpop.xlane.xlu0 %136 }
 0x11e   :  { %v183_v57 = vmul.f32 0.03125, %v137_v56 }
 0x120   :  { %v199_v58 = vadd.f32 1e-05, %v183_v57 }
 0x121   :  { %v140_v59 = vpop.xlane.xlu1 %139  ;;  %v161_v60 = vpop.xlane.xlu0 %160 }
 0x122   :  { %515 = vrsqrt.f32 %v199_v58  ;;  %v184_v61 = vmul.f32 0.03125, %v140_v59  ;;  %v191_v62 = vmul.f32 0.03125, %v161_v60 }
 0x124   :  { %v200_v63 = vadd.f32 1e-05, %v184_v61  ;;  %v207_v2 = vadd.f32 1e-05, %v191_v62 }
 0x125   :  { %v164_v3 = vpop.xlane.xlu1 %163  ;;  %v143_v4 = vpop.xlane.xlu0 %142 }
 0x126   :  { %517 = vrsqrt.f32 %v200_v63  ;;  %v192_v5 = vmul.f32 0.03125, %v164_v3  ;;  %v185_v6 = vmul.f32 0.03125, %v143_v4 }
 0x127   :  { %519 = vrsqrt.f32 %v207_v2 }
 0x128   :  { %v208_v7 = vadd.f32 1e-05, %v192_v5  ;;  %v201_v8 = vadd.f32 1e-05, %v185_v6 }
 0x129   :  { %v146_v9 = vpop.xlane.xlu1 %145  ;;  %v167_v12 = vpop.xlane.xlu0 %166 }
 0x12a   :  { %521 = vrsqrt.f32 %v208_v7  ;;  %v186_v13 = vmul.f32 0.03125, %v146_v9  ;;  %v193_v14 = vmul.f32 0.03125, %v167_v12 }
 0x12b   :  { %523 = vrsqrt.f32 %v201_v8 }
 0x12c   :  { %v202_v15 = vadd.f32 1e-05, %v186_v13  ;;  %v209_v18 = vadd.f32 1e-05, %v193_v14 }
 0x12d   :  { %v170_v19 = vpop.xlane.xlu1 %169  ;;  %v149_v22 = vpop.xlane.xlu0 %148 }
 0x12e   :  { %525 = vrsqrt.f32 %v202_v15  ;;  %v194_v16 = vmul.f32 0.03125, %v170_v19  ;;  %v187_v26 = vmul.f32 0.03125, %v149_v22 }
 0x12f   :  { %v516_v27 = vpop.eup %515  ;;  %527 = vrsqrt.f32 %v209_v18 }
 0x130   :  { %v210_v30 = vadd.f32 1e-05, %v194_v16  ;;  %v203_v31 = vadd.f32 1e-05, %v187_v26  ;;  %v231_v32 = vmul.f32 %v516_v27, %v671_v36  ;;  %v778_v36 = vld [vmem:[%s903_s2] ss:$0 sm:$0xff] }
 0x131   :  { %v152_v34 = vpop.xlane.xlu1 %151  ;;  %v173_v20 = vpop.xlane.xlu0 %172 }
 0x132   :  { %529 = vrsqrt.f32 %v210_v30  ;;  %v188_v38 = vmul.f32 0.03125, %v152_v34  ;;  %v195_v39 = vmul.f32 0.03125, %v173_v20  ;;  %v254_v41 = vmul.f32 %v771_v33, %v231_v32 }
 0x133   :  { %v518_v40 = vpop.eup %517  ;;  %531 = vrsqrt.f32 %v203_v31 }
 0x134   :  { %v520_v42 = vpop.eup %519  ;;  %v204_v43 = vadd.f32 1e-05, %v188_v38  ;;  %v211_v46 = vadd.f32 1e-05, %v195_v39  ;;  %v232_v24 = vmul.f32 %v518_v40, %v679_v44  ;;  %v277_v53 = vadd.f32 %v778_v36, %v254_v41 }
 0x135   :  { %v176_v48 = vpop.xlane.xlu1 %175  ;;  %v155_v49 = vpop.xlane.xlu0 %154  ;;  %v239_v50 = vmul.f32 %v520_v42, %v673_v37 }
 0x136   :  { %533 = vrsqrt.f32 %v204_v43  ;;  %v196_v51 = vmul.f32 0.03125, %v176_v48  ;;  %v189_v52 = vmul.f32 0.03125, %v155_v49  ;;  %v255_v28 = vmul.f32 %v771_v33, %v232_v24 }
 0x137   :  { %v522_v29 = vpop.eup %521  ;;  %535 = vrsqrt.f32 %v211_v46  ;;  %v262_v37 = vmul.f32 %v771_v33, %v239_v50 }
 0x138   :  { %v524_v56 = vpop.eup %523  ;;  %v212_v44 = vadd.f32 1e-05, %v196_v51  ;;  %v205_v57 = vadd.f32 1e-05, %v189_v52  ;;  %v278_v58 = vadd.f32 %v778_v36, %v255_v28  ;;  %v240_v59 = vmul.f32 %v522_v29, %v681_v45 }
 0x139   :  { %v158_v60 = vpop.xlane.xlu1 %157  ;;  %v179_v61 = vpop.xlane.xlu0 %178  ;;  %v233_v62 = vmul.f32 %v524_v56, %v689_v54  ;;  %v285_v54 = vadd.f32 %v778_v36, %v262_v37 }
 0x13a   :  { %537 = vrsqrt.f32 %v212_v44  ;;  %v190_v63 = vmul.f32 0.03125, %v158_v60  ;;  %v197_v2 = vmul.f32 0.03125, %v179_v61  ;;  %v293_v3 = vpack.c.bf16 %v278_v58, %v277_v53 }
 0x13b   :  { %v526_v4 = vpop.eup %525  ;;  %539 = vrsqrt.f32 %v205_v57  ;;  %v263_v5 = vmul.f32 %v771_v33, %v240_v59  ;;  %v256_v6 = vmul.f32 %v771_v33, %v233_v62 }
 0x13c   :  { %v528_v7 = vpop.eup %527  ;;  %v206_v8 = vadd.f32 1e-05, %v190_v63  ;;  %v213_v9 = vadd.f32 1e-05, %v197_v2  ;;  %493 = vmatprep.mubr.msk.bf16.mxu0 %vm37_vm0, %v293_v3  ;;  %v234_v45 = vmul.f32 %v526_v4, %v691_v55  ;;  %v468_v4 = vld [vmem:[%s904_s4] ss:$0 sm:$0xff] }
 0x13d   :  { %v182_v12 = vpop.xlane.xlu1 %181  ;;  %v286_v13 = vadd.f32 %v778_v36, %v263_v5  ;;  %v241_v14 = vmul.f32 %v528_v7, %v700_v0  ;;  %v279_v16 = vadd.f32 %v778_v36, %v256_v6 }
 0x13e   :  { %541 = vrsqrt.f32 %v206_v8  ;;  %v198_v15 = vmul.f32 0.03125, %v182_v12  ;;  %v257_v18 = vmul.f32 %v771_v33, %v234_v45 }
 0x13f   :  { %v530_v19 = vpop.eup %529  ;;  %543 = vrsqrt.f32 %v213_v9  ;;  %v297_v22 = vpack.c.bf16 %v286_v13, %v285_v54  ;;  %v264_v31 = vmul.f32 %v771_v33, %v241_v14 }
 0x140   :  { %v532_v26 = vpop.eup %531  ;;  %v214_v27 = vadd.f32 1e-05, %v198_v15  ;;  %v280_v55 = vadd.f32 %v778_v36, %v257_v18  ;;  %v242_v30 = vmul.f32 %v530_v19, %v703_v1 }
 0x141   :  { %501 = vmatprep.mubr.msk.bf16.mxu1 %vm37_vm0, %v297_v22  ;;  %v235_v0 = vmul.f32 %v532_v26, %v712_v10  ;;  %v287_v39 = vadd.f32 %v778_v36, %v264_v31 }
 0x142   :  { %545 = vrsqrt.f32 %v214_v27  ;;  %v294_v32 = vpack.c.bf16 %v280_v55, %v279_v16  ;;  %v265_v34 = vmul.f32 %v771_v33, %v242_v30 }
 0x143   :  { %v534_v20 = vpop.eup %533  ;;  %v258_v41 = vmul.f32 %v771_v33, %v235_v0 }
 0x144   :  { %v536_v38 = vpop.eup %535  ;;  %494 = vmatmul.mubr.msk.bf16.vlgmr.msra.gmra.mxu0 %vm37_vm0, %v294_v32  ;;  %v288_v40 = vadd.f32 %v778_v36, %v265_v34  ;;  %v236_v1 = vmul.f32 %v534_v20, %v715_v11 }
 0x145   :  { %v243_v42 = vmul.f32 %v536_v38, %v724_v23  ;;  %v281_v48 = vadd.f32 %v778_v36, %v258_v41 }
 0x146   :  { %v298_v43 = vpack.c.bf16 %v288_v40, %v287_v39  ;;  %v259_v10 = vmul.f32 %v771_v33, %v236_v1 }
 0x147   :  { %v538_v46 = vpop.eup %537  ;;  %v266_v51 = vmul.f32 %v771_v33, %v243_v42 }
 0x148   :  { %v540_v24 = vpop.eup %539  ;;  %502 = vmatmul.mubr.msk.bf16.vlgmr.msra.gmra.mxu1 %vm37_vm0, %v298_v43  ;;  %v282_v49 = vadd.f32 %v778_v36, %v259_v10  ;;  %v244_v50 = vmul.f32 %v538_v46, %v727_v17 }
 0x149   :  { %v237_v11 = vmul.f32 %v540_v24, %v736_v35  ;;  %v289_v53 = vadd.f32 %v778_v36, %v266_v51 }
 0x14a   :  { %v295_v52 = vpack.c.bf16 %v282_v49, %v281_v48  ;;  %v267_v23 = vmul.f32 %v771_v33, %v244_v50 }
 0x14b   :  { %v542_v28 = vpop.eup %541  ;;  %v260_v57 = vmul.f32 %v771_v33, %v237_v11 }
 0x14c   :  { %v544_v29 = vpop.eup %543  ;;  %497 = vmatprep.mubr.msk.bf16.mxu0 %vm37_vm0, %v295_v52  ;;  %v290_v56 = vadd.f32 %v778_v36, %v267_v23  ;;  %v238_v44 = vmul.f32 %v542_v28, %v739_v21 }
 0x14d   :  { %v245_v17 = vmul.f32 %v544_v29, %v748_v47  ;;  %v283_v60 = vadd.f32 %v778_v36, %v260_v57 }
 0x14e   :  { %v299_v58 = vpack.c.bf16 %v290_v56, %v289_v53  ;;  %v261_v35 = vmul.f32 %v771_v33, %v238_v44 }
 0x14f   :  { %v546_v59 = vpop.eup %545  ;;  %v268_v62 = vmul.f32 %v771_v33, %v245_v17 }
 0x150   :  { %505 = vmatprep.mubr.msk.bf16.mxu1 %vm37_vm0, %v299_v58  ;;  %v284_v61 = vadd.f32 %v778_v36, %v261_v35  ;;  %v246_v37 = vmul.f32 %v546_v59, %v751_v25 }
 0x151   :  { %v291_v47 = vadd.f32 %v778_v36, %v268_v62 }
 0x152   :  { %v296_v63 = vpack.c.bf16 %v284_v61, %v283_v60  ;;  %v269_v21 = vmul.f32 %v771_v33, %v246_v37 }
 0x154   :  { %498 = vmatmul.mubr.msk.bf16.gmra.mxu0 %vm37_vm0, %v296_v63  ;;  %v292_v2 = vadd.f32 %v778_v36, %v269_v21 }
 0x156   :  { %v300_v3 = vpack.c.bf16 %v292_v2, %v291_v47 }
 0x158   :  { %506 = vmatmul.mubr.msk.bf16.gmra.mxu1 %vm37_vm0, %v300_v3 }
 0x204   :  { %v495_v5 = vpop.f32.mrf.mxu0 }
 0x205   :  { %v391_v25 = vadd.f32 %v495_v5, %v468_v4 }
 0x206   :  { %v382_v6 = vpop.f32.mrf.mxu0 }
 0x207   :  { %448 = vst.msk [vmem:[%s905_s5 + $0x10] sm:$0xff] %vm445_vm1, %v391_v25  ;;  %v383_v33 = vadd.f32 %v468_v4, %v382_v6 }
 0x208   :  { %v496_v7 = vpop.f32.mrf.mxu0  ;;  %v503_v8 = vpop.f32.mrf.mxu1 }
 0x209   :  { %446 = vst.msk [vmem:[%s905_s5] sm:$0xff] %vm445_vm1, %v383_v33  ;;  %v394_v36 = vadd.f32 %v496_v7, %v468_v4  ;;  %v423_v9 = vadd.f32 %v503_v8, %v468_v4 }
 0x20a   :  { %v385_v45 = vpop.f32.mrf.mxu0  ;;  %v414_v12 = vpop.f32.mrf.mxu1 }
 0x20b   :  { %449 = vst.msk [vmem:[%s905_s5 + $0x18] sm:$0xff] %vm445_vm1, %v394_v36  ;;  %456 = vst.msk [vmem:[%s905_s5 + $0x50] sm:$0xff] %vm445_vm1, %v423_v9  ;;  %v386_v54 = vadd.f32 %v468_v4, %v385_v45  ;;  %v415_v13 = vadd.f32 %v468_v4, %v414_v12 }
 0x20c   :  { %v504_v14 = vpop.f32.mrf.mxu1 }
 0x20d   :  { %447 = vst.msk [vmem:[%s905_s5 + $0x8] sm:$0xff] %vm445_vm1, %v386_v54  ;;  %454 = vst.msk [vmem:[%s905_s5 + $0x40] sm:$0xff] %vm445_vm1, %v415_v13  ;;  %v426_v15 = vadd.f32 %v504_v14, %v468_v4 }
 0x20e   :  { %v417_v18 = vpop.f32.mrf.mxu1 }
 0x20f   :  { %457 = vst.msk [vmem:[%s905_s5 + $0x58] sm:$0xff] %vm445_vm1, %v426_v15  ;;  %v418_v19 = vadd.f32 %v468_v4, %v417_v18 }
 0x211   :  { %455 = vst.msk [vmem:[%s905_s5 + $0x48] sm:$0xff] %vm445_vm1, %v418_v19 }
 0x214   :  { %v499_v22 = vpop.f32.mrf.mxu0 }
 0x215   :  { %v407_v16 = vadd.f32 %v499_v22, %v468_v4 }
 0x216   :  { %v398_v26 = vpop.f32.mrf.mxu0 }
 0x217   :  { %452 = vst.msk [vmem:[%s905_s5 + $0x30] sm:$0xff] %vm445_vm1, %v407_v16  ;;  %v399_v27 = vadd.f32 %v468_v4, %v398_v26 }
 0x218   :  { %v500_v55 = vpop.f32.mrf.mxu0  ;;  %v507_v30 = vpop.f32.mrf.mxu1 }
 0x219   :  { %450 = vst.msk [vmem:[%s905_s5 + $0x20] sm:$0xff] %vm445_vm1, %v399_v27  ;;  %v410_v31 = vadd.f32 %v500_v55, %v468_v4  ;;  %v439_v0 = vadd.f32 %v507_v30, %v468_v4 }
 0x21a   :  { %v401_v32 = vpop.f32.mrf.mxu0  ;;  %v430_v34 = vpop.f32.mrf.mxu1 }
 0x21b   :  { %453 = vst.msk [vmem:[%s905_s5 + $0x38] sm:$0xff] %vm445_vm1, %v410_v31  ;;  %460 = vst.msk [vmem:[%s905_s5 + $0x70] sm:$0xff] %vm445_vm1, %v439_v0  ;;  %v402_v20 = vadd.f32 %v468_v4, %v401_v32  ;;  %v431_v38 = vadd.f32 %v468_v4, %v430_v34 }
 0x21c   :  { %v508_v39 = vpop.f32.mrf.mxu1 }
 0x21d   :  { %451 = vst.msk [vmem:[%s905_s5 + $0x28] sm:$0xff] %vm445_vm1, %v402_v20  ;;  %458 = vst.msk [vmem:[%s905_s5 + $0x60] sm:$0xff] %vm445_vm1, %v431_v38  ;;  %v442_v40 = vadd.f32 %v508_v39, %v468_v4 }
 0x21e   :  { %v433_v1 = vpop.f32.mrf.mxu1 }
 0x21f   :  { %461 = vst.msk [vmem:[%s905_s5 + $0x78] sm:$0xff] %vm445_vm1, %v442_v40  ;;  %v434_v41 = vadd.f32 %v468_v4, %v433_v1 }
 0x221   :  { %459 = vst.msk [vmem:[%s905_s5 + $0x68] sm:$0xff] %vm445_vm1, %v434_v41 }

// kernel: _lambda_.7
= control target key start
LH: loop header
LB: loop body
LE: loop exit
PB: predicated region body
PF: predicated region fallthrough
CT: control target
= control target key end

     0   :  { %s3069_s15 = smov 0   ;;  %s3071_s16 = smov 0   ;;  %s3842_s0 = inlined_call_operand.vmem [shape: f32[2,16,16,8], index: 0, kind: input, shape index: {}]   ;;  %s3843_s1 = inlined_call_operand.vmem [shape: f32[2,16,16,8], index: 1, kind: input, shape index: {}]   ;;  %s3844_s2 = inlined_call_operand.vmem [shape: f32[2,16,16,8], index: 2, kind: input, shape index: {}]   ;;  %s3845_s3 = inlined_call_operand.vmem [shape: f32[16,16,16], index: 3, kind: input, shape index: {}]   ;;  %s3846_s4 = inlined_call_operand.vmem [shape: f32[2,16,16,8], index: 4, kind: output, shape index: {}]  }
   0x1   :  { %s3073_s17 = smov 0  }
   0x2 LB: > { %s26_s18 = sadd.s32 1, %s3036_s16  ;;  %p2561_p0 = scmp.ge.s32.totalorder %s3040_s17, 1  ;;  %s3040_s17 = sphi %s3073_s17, %s14_s17   ;;  %s3036_s16 = sphi %s3071_s16, %s3848_s16   ;;  %s3032_s15 = sphi %s3069_s15, %s3847_s15  }
   0x3   : > { %p28_p1 = scmp.ge.s32.totalorder %s26_s18, 2  ;;  %p220_p2 = scmp.lt.s32.totalorder %s3040_s17, 3 }
   0x5   : > { %s3850_s18 = smov (%p28_p1, %s26_s18), 0  ;;  %p221_p3 = pnand %p2561_p0, %p220_p2 }
   0x6   : > { %p277_p4 = scmp.lt.s32.totalorder (!%p221_p3), %s3032_s15, 1 }
   0x7   : > { %224 = sbr.rel (%p221_p3) target bundleno = 801 (0x321), region = 36 }
   0xc   : > { %v3042_v0 = vmov 0.0   ;;  %s3852_s15 = smov (!%p277_p4, %s3032_s15), 1  ;;  %vm3043_vm0 = vmmov 0   ;;  %vm465_vm1 = vcmask 64512   ;;  %vm1314_vm2 = vcmask 130048  }
   0xd   : > { %2672 = vmatprep.subr.bf16.mxu0 %v3042_v0  ;;  %2678 = vmatprep.subr.bf16.mxu1 %v3042_v0  ;;  %s3093_s19 = sshll.u32 %s3852_s15, 8 }
   0xe   : > { %2674 = vmatprep.mubr.msk.bf16.mxu0 %vm3043_vm0, %v3042_v0  ;;  %2680 = vmatprep.mubr.msk.bf16.mxu1 %vm3043_vm0, %v3042_v0  ;;  %s3099_s22 = scalar_lea.vmem %s3843_s1, %s3093_s19  ;;  %s3109_s25 = scalar_lea.vmem %s3842_s0, %s3093_s19 }
   0xf   : > { %v369_v1 = vld [vmem:[%s3099_s22] sm:$0xff]  ;;  %v370_v2 = vld [vmem:[%s3099_s22 + $0x8] sm:$0xff]  ;;  %v371_v3 = vld [vmem:[%s3099_s22 + $0x10] sm:$0xff]  ;;  %s3560_s26 = scalar_lea.vmem %s3844_s2, %s3093_s19  ;;  %s3767_s29 = scalar_lea.vmem %s3846_s4, %s3093_s19 }
  0x10   : > { %v401_v4 = vpack.c.bf16 %v370_v2, %v369_v1  ;;  %v372_v5 = vld [vmem:[%s3099_s22 + $0x18] sm:$0xff]  ;;  %v373_v7 = vld [vmem:[%s3099_s22 + $0x20] sm:$0xff]  ;;  %v374_v9 = vld [vmem:[%s3099_s22 + $0x28] sm:$0xff] }
  0x11   : > { %v402_v6 = vpack.c.bf16 %v372_v5, %v371_v3  ;;  %v375_v10 = vld [vmem:[%s3099_s22 + $0x30] sm:$0xff]  ;;  %v376_v11 = vld [vmem:[%s3099_s22 + $0x38] sm:$0xff]  ;;  %v321_v13 = vld [vmem:[%s3109_s25] sm:$0xff]  ;;  %v403_v17 = vpack.c.bf16 %v374_v9, %v373_v7 }
  0x12   : > { %v470_v8 = vsel %vm465_vm1, %v401_v4, 0  ;;  %v322_v14 = vld [vmem:[%s3109_s25 + $0x8] sm:$0xff]  ;;  %v323_v15 = vld [vmem:[%s3109_s25 + $0x10] sm:$0xff]  ;;  %v324_v16 = vld [vmem:[%s3109_s25 + $0x18] sm:$0xff]  ;;  %v404_v18 = vpack.c.bf16 %v376_v11, %v375_v10 }
  0x13   : > { %2673 = vmatpush3.bf16.xpose.msra.mxu0 %v470_v8  ;;  %v517_v12 = vsel %vm465_vm1, %v402_v6, 0  ;;  %v353_v19 = vpack.c.bf16 %v322_v14, %v321_v13  ;;  %v354_v20 = vpack.c.bf16 %v324_v16, %v323_v15  ;;  %v564_v21 = vsel %vm465_vm1, %v403_v17, 0  ;;  %v377_v23 = vld [vmem:[%s3099_s22 + $0x40] sm:$0xff]  ;;  %v378_v24 = vld [vmem:[%s3099_s22 + $0x48] sm:$0xff]  ;;  %v379_v25 = vld [vmem:[%s3099_s22 + $0x50] sm:$0xff] }
  0x14   : > { %2679 = vmatpush3.bf16.xpose.msra.mxu1 %v517_v12  ;;  %2684 = vmatprep.subr.bf16.mxu0 %v3042_v0  ;;  %v611_v22 = vsel %vm465_vm1, %v404_v18, 0  ;;  %v380_v26 = vld [vmem:[%s3099_s22 + $0x58] sm:$0xff]  ;;  %v325_v27 = vld [vmem:[%s3109_s25 + $0x20] sm:$0xff]  ;;  %v326_v28 = vld [vmem:[%s3109_s25 + $0x28] sm:$0xff]  ;;  %v405_v31 = vpack.c.bf16 %v378_v24, %v377_v23 }
  0x15   : > { %2690 = vmatprep.subr.bf16.mxu1 %v3042_v0  ;;  %v327_v29 = vld [vmem:[%s3109_s25 + $0x30] sm:$0xff]  ;;  %v328_v30 = vld [vmem:[%s3109_s25 + $0x38] sm:$0xff]  ;;  %v406_v32 = vpack.c.bf16 %v380_v26, %v379_v25  ;;  %v355_v33 = vpack.c.bf16 %v326_v28, %v325_v27  ;;  %v381_v37 = vld [vmem:[%s3099_s22 + $0x60] sm:$0xff] }
  0x16   : > { %v356_v34 = vpack.c.bf16 %v328_v30, %v327_v29  ;;  %v658_v35 = vsel %vm465_vm1, %v405_v31, 0  ;;  %v382_v38 = vld [vmem:[%s3099_s22 + $0x68] sm:$0xff]  ;;  %v383_v39 = vld [vmem:[%s3099_s22 + $0x70] sm:$0xff]  ;;  %v384_v40 = vld [vmem:[%s3099_s22 + $0x78] sm:$0xff] }
  0x17   : > { %v705_v36 = vsel %vm465_vm1, %v406_v32, 0  ;;  %v329_v41 = vld [vmem:[%s3109_s25 + $0x40] sm:$0xff]  ;;  %v330_v42 = vld [vmem:[%s3109_s25 + $0x48] sm:$0xff]  ;;  %v331_v43 = vld [vmem:[%s3109_s25 + $0x50] sm:$0xff]  ;;  %v407_v45 = vpack.c.bf16 %v382_v38, %v381_v37  ;;  %v408_v46 = vpack.c.bf16 %v384_v40, %v383_v39 }
  0x18   : > { %v332_v44 = vld [vmem:[%s3109_s25 + $0x58] sm:$0xff]  ;;  %v357_v47 = vpack.c.bf16 %v330_v42, %v329_v41  ;;  %v385_v51 = vld [vmem:[%s3099_s22 + $0x80] sm:$0xff]  ;;  %v386_v52 = vld [vmem:[%s3099_s22 + $0x88] sm:$0xff] }
  0x19   : > { %v358_v48 = vpack.c.bf16 %v332_v44, %v331_v43  ;;  %v752_v49 = vsel %vm465_vm1, %v407_v45, 0  ;;  %v799_v50 = vsel %vm465_vm1, %v408_v46, 0  ;;  %v387_v53 = vld [vmem:[%s3099_s22 + $0x90] sm:$0xff]  ;;  %v388_v54 = vld [vmem:[%s3099_s22 + $0x98] sm:$0xff]  ;;  %v333_v55 = vld [vmem:[%s3109_s25 + $0x60] sm:$0xff]  ;;  %v409_v59 = vpack.c.bf16 %v386_v52, %v385_v51 }
  0x1a   : > { %2675 = vmatmul.mubr.msk.bf16.vlgmr.msra.gmra.mxu0 %vm465_vm1, %v353_v19  ;;  %v334_v56 = vld [vmem:[%s3109_s25 + $0x68] sm:$0xff]  ;;  %v335_v57 = vld [vmem:[%s3109_s25 + $0x70] sm:$0xff]  ;;  %v336_v58 = vld [vmem:[%s3109_s25 + $0x78] sm:$0xff]  ;;  %v410_v60 = vpack.c.bf16 %v388_v54, %v387_v53 }
  0x1b   : > { %2681 = vmatmul.mubr.msk.bf16.vlgmr.msra.gmra.mxu1 %vm465_vm1, %v354_v20  ;;  %2685 = vmatpush3.bf16.xpose.msra.mxu0 %v564_v21  ;;  %v359_v61 = vpack.c.bf16 %v334_v56, %v333_v55  ;;  %v360_v62 = vpack.c.bf16 %v336_v58, %v335_v57  ;;  %v846_v63 = vsel %vm465_vm1, %v409_v59, 0  ;;  %v389_v2 = vld [vmem:[%s3099_s22 + $0xa0] sm:$0xff]  ;;  %v390_v3 = vld [vmem:[%s3099_s22 + $0xa8] sm:$0xff]  ;;  %v391_v4 = vld [vmem:[%s3099_s22 + $0xb0] sm:$0xff] }
  0x1c   : > { %2691 = vmatpush3.bf16.xpose.msra.mxu1 %v611_v22  ;;  %2686 = vmatprep.mubr.msk.bf16.mxu0 %vm3043_vm0, %v3042_v0  ;;  %v893_v1 = vsel %vm465_vm1, %v410_v60, 0  ;;  %v392_v5 = vld [vmem:[%s3099_s22 + $0xb8] sm:$0xff]  ;;  %v337_v6 = vld [vmem:[%s3109_s25 + $0x80] sm:$0xff]  ;;  %v338_v7 = vld [vmem:[%s3109_s25 + $0x88] sm:$0xff]  ;;  %v411_v10 = vpack.c.bf16 %v390_v3, %v389_v2 }
  0x1d   : > { %2692 = vmatprep.mubr.msk.bf16.mxu1 %vm3043_vm0, %v3042_v0  ;;  %2696 = vmatprep.subr.bf16.mxu0 %v3042_v0  ;;  %v339_v8 = vld [vmem:[%s3109_s25 + $0x90] sm:$0xff]  ;;  %v340_v9 = vld [vmem:[%s3109_s25 + $0x98] sm:$0xff]  ;;  %v412_v11 = vpack.c.bf16 %v392_v5, %v391_v4  ;;  %v361_v12 = vpack.c.bf16 %v338_v7, %v337_v6  ;;  %v393_v16 = vld [vmem:[%s3099_s22 + $0xc0] sm:$0xff] }
  0x1e   : > { %2702 = vmatprep.subr.bf16.mxu1 %v3042_v0  ;;  %v362_v13 = vpack.c.bf16 %v340_v9, %v339_v8  ;;  %v940_v14 = vsel %vm465_vm1, %v411_v10, 0  ;;  %v394_v17 = vld [vmem:[%s3099_s22 + $0xc8] sm:$0xff]  ;;  %v395_v18 = vld [vmem:[%s3099_s22 + $0xd0] sm:$0xff]  ;;  %v396_v19 = vld [vmem:[%s3099_s22 + $0xd8] sm:$0xff] }
  0x1f   : > { %v987_v15 = vsel %vm465_vm1, %v412_v11, 0  ;;  %v341_v20 = vld [vmem:[%s3109_s25 + $0xa0] sm:$0xff]  ;;  %v342_v21 = vld [vmem:[%s3109_s25 + $0xa8] sm:$0xff]  ;;  %v343_v22 = vld [vmem:[%s3109_s25 + $0xb0] sm:$0xff]  ;;  %v413_v24 = vpack.c.bf16 %v394_v17, %v393_v16  ;;  %v414_v25 = vpack.c.bf16 %v396_v19, %v395_v18 }
  0x20   : > { %v344_v23 = vld [vmem:[%s3109_s25 + $0xb8] sm:$0xff]  ;;  %v363_v26 = vpack.c.bf16 %v342_v21, %v341_v20  ;;  %v397_v30 = vld [vmem:[%s3099_s22 + $0xe0] sm:$0xff]  ;;  %v398_v31 = vld [vmem:[%s3099_s22 + $0xe8] sm:$0xff] }
  0x21   : > { %v364_v27 = vpack.c.bf16 %v344_v23, %v343_v22  ;;  %v1034_v28 = vsel %vm465_vm1, %v413_v24, 0  ;;  %v1081_v29 = vsel %vm465_vm1, %v414_v25, 0  ;;  %v399_v32 = vld [vmem:[%s3099_s22 + $0xf0] sm:$0xff]  ;;  %v348_v37 = vld [vmem:[%s3109_s25 + $0xd8] sm:$0xff]  ;;  %v415_v38 = vpack.c.bf16 %v398_v31, %v397_v30  ;;  %v349_v44 = vld [vmem:[%s3109_s25 + $0xe0] sm:$0xff] }
  0x22   : > { %2687 = vmatmul.mubr.msk.bf16.vlgmr.msra.gmra.mxu0 %vm465_vm1, %v355_v33  ;;  %v400_v33 = vld [vmem:[%s3099_s22 + $0xf8] sm:$0xff]  ;;  %v350_v45 = vld [vmem:[%s3109_s25 + $0xe8] sm:$0xff]  ;;  %v351_v46 = vld [vmem:[%s3109_s25 + $0xf0] sm:$0xff] }
  0x23   : > { %2693 = vmatmul.mubr.msk.bf16.vlgmr.msra.gmra.mxu1 %vm465_vm1, %v356_v34  ;;  %2697 = vmatpush3.bf16.xpose.msra.mxu0 %v658_v35  ;;  %v345_v34 = vld [vmem:[%s3109_s25 + $0xc0] sm:$0xff]  ;;  %v346_v35 = vld [vmem:[%s3109_s25 + $0xc8] sm:$0xff]  ;;  %v416_v39 = vpack.c.bf16 %v400_v33, %v399_v32  ;;  %v1128_v42 = vsel %vm465_vm1, %v415_v38, 0  ;;  %v1252_v54 = vld [vmem:[%s3845_s3 + $0x10] sm:$0xff] }
  0x24   : > { %2703 = vmatpush3.bf16.xpose.msra.mxu1 %v705_v36  ;;  %2698 = vmatprep.mubr.msk.bf16.mxu0 %vm3043_vm0, %v3042_v0  ;;  %v347_v36 = vld [vmem:[%s3109_s25 + $0xd0] sm:$0xff]  ;;  %v365_v40 = vpack.c.bf16 %v346_v35, %v345_v34  ;;  %v1250_v51 = vld [vmem:[%s3845_s3] sm:$0xff]  ;;  %v1253_v2 = vld [vmem:[%s3845_s3 + $0x18] sm:$0xff] }
  0x25   : > { %2704 = vmatprep.mubr.msk.bf16.mxu1 %vm3043_vm0, %v3042_v0  ;;  %2708 = vmatprep.subr.bf16.mxu0 %v3042_v0  ;;  %v366_v41 = vpack.c.bf16 %v348_v37, %v347_v36  ;;  %v1175_v43 = vsel %vm465_vm1, %v416_v39, 0  ;;  %v1254_v10 = vld [vmem:[%s3845_s3 + $0x20] sm:$0xff]  ;;  %v1255_v22 = vld [vmem:[%s3845_s3 + $0x28] sm:$0xff]  ;;  %v1260_v38 = vld [vmem:[%s3845_s3 + $0x50] sm:$0xff] }
  0x26   : > { %2714 = vmatprep.subr.bf16.mxu1 %v3042_v0  ;;  %v1258_v33 = vld [vmem:[%s3845_s3 + $0x40] sm:$0xff] }
  0x2a   : > { %2699 = vmatmul.mubr.msk.bf16.vlgmr.msra.gmra.mxu0 %vm465_vm1, %v357_v47  ;;  %v352_v47 = vld [vmem:[%s3109_s25 + $0xf8] sm:$0xff] }
  0x2b   : > { %2705 = vmatmul.mubr.msk.bf16.vlgmr.msra.gmra.mxu1 %vm465_vm1, %v358_v48  ;;  %2709 = vmatpush3.bf16.xpose.msra.mxu0 %v752_v49  ;;  %v367_v48 = vpack.c.bf16 %v350_v45, %v349_v44  ;;  %v368_v49 = vpack.c.bf16 %v352_v47, %v351_v46  ;;  %v1259_v45 = vld [vmem:[%s3845_s3 + $0x48] sm:$0xff] }
  0x2c   : > { %2715 = vmatpush3.bf16.xpose.msra.mxu1 %v799_v50  ;;  %2710 = vmatprep.mubr.msk.bf16.mxu0 %vm3043_vm0, %v3042_v0 }
  0x2d   : > { %2716 = vmatprep.mubr.msk.bf16.mxu1 %vm3043_vm0, %v3042_v0  ;;  %2720 = vmatprep.subr.bf16.mxu0 %v3042_v0 }
  0x2e   : > { %2726 = vmatprep.subr.bf16.mxu1 %v3042_v0 }
  0x32   : > { %2711 = vmatmul.mubr.msk.bf16.vlgmr.msra.gmra.mxu0 %vm465_vm1, %v359_v61  ;;  %v1251_v61 = vld [vmem:[%s3845_s3 + $0x8] sm:$0xff] }
  0x33   : > { %2717 = vmatmul.mubr.msk.bf16.vlgmr.msra.gmra.mxu1 %vm465_vm1, %v360_v62  ;;  %2721 = vmatpush3.bf16.xpose.msra.mxu0 %v846_v63 }
  0x34   : > { %2727 = vmatpush3.bf16.xpose.msra.mxu1 %v893_v1  ;;  %2722 = vmatprep.mubr.msk.bf16.mxu0 %vm3043_vm0, %v3042_v0 }
  0x35   : > { %2728 = vmatprep.mubr.msk.bf16.mxu1 %vm3043_vm0, %v3042_v0  ;;  %2732 = vmatprep.subr.bf16.mxu0 %v3042_v0 }
  0x36   : > { %2738 = vmatprep.subr.bf16.mxu1 %v3042_v0 }
  0x3a   : > { %2723 = vmatmul.mubr.msk.bf16.vlgmr.msra.gmra.mxu0 %vm465_vm1, %v361_v12 }
  0x3b   : > { %2729 = vmatmul.mubr.msk.bf16.vlgmr.msra.gmra.mxu1 %vm465_vm1, %v362_v13  ;;  %2733 = vmatpush3.bf16.xpose.msra.mxu0 %v940_v14  ;;  %v1256_v14 = vld [vmem:[%s3845_s3 + $0x30] sm:$0xff] }
  0x3c   : > { %2739 = vmatpush3.bf16.xpose.msra.mxu1 %v987_v15  ;;  %2734 = vmatprep.mubr.msk.bf16.mxu0 %vm3043_vm0, %v3042_v0 }
  0x3d   : > { %2740 = vmatprep.mubr.msk.bf16.mxu1 %vm3043_vm0, %v3042_v0  ;;  %2744 = vmatprep.subr.bf16.mxu0 %v3042_v0 }
  0x3e   : > { %2750 = vmatprep.subr.bf16.mxu1 %v3042_v0 }
  0x42   : > { %2735 = vmatmul.mubr.msk.bf16.vlgmr.msra.gmra.mxu0 %vm465_vm1, %v363_v26 }
  0x43   : > { %2741 = vmatmul.mubr.msk.bf16.vlgmr.msra.gmra.mxu1 %vm465_vm1, %v364_v27  ;;  %2745 = vmatpush3.bf16.xpose.msra.mxu0 %v1034_v28  ;;  %v1257_v28 = vld [vmem:[%s3845_s3 + $0x38] sm:$0xff] }
  0x44   : > { %2751 = vmatpush3.bf16.xpose.msra.mxu1 %v1081_v29  ;;  %2746 = vmatprep.mubr.msk.bf16.mxu0 %vm3043_vm0, %v3042_v0 }
  0x45   : > { %2752 = vmatprep.mubr.msk.bf16.mxu1 %vm3043_vm0, %v3042_v0  ;;  %2756 = vmatprep.subr.bf16.mxu0 %v3042_v0 }
  0x46   : > { %2762 = vmatprep.subr.bf16.mxu1 %v3042_v0 }
  0x4a   : > { %2747 = vmatmul.mubr.msk.bf16.vlgmr.msra.gmra.mxu0 %vm465_vm1, %v365_v40 }
  0x4b   : > { %2753 = vmatmul.mubr.msk.bf16.vlgmr.msra.gmra.mxu1 %vm465_vm1, %v366_v41  ;;  %2757 = vmatpush3.bf16.xpose.msra.mxu0 %v1128_v42 }
  0x4c   : > { %2763 = vmatpush3.bf16.xpose.msra.mxu1 %v1175_v43  ;;  %2758 = vmatprep.mubr.msk.bf16.mxu0 %vm3043_vm0, %v3042_v0 }
  0x4d   : > { %2764 = vmatprep.mubr.msk.bf16.mxu1 %vm3043_vm0, %v3042_v0  ;;  %2768 = vmatprep.subr.bf16.mxu0 %v3042_v0 }
  0x4e   : > { %2774 = vmatprep.subr.bf16.mxu1 %v3042_v0 }
  0x52   : > { %2759 = vmatmul.mubr.msk.bf16.vlgmr.msra.gmra.mxu0 %vm465_vm1, %v367_v48 }
  0x53   : > { %2765 = vmatmul.mubr.msk.bf16.vlgmr.msra.gmra.mxu1 %vm465_vm1, %v368_v49  ;;  %2770 = vmatprep.mubr.msk.bf16.mxu0 %vm3043_vm0, %v3042_v0 }
  0x54   : > { %2776 = vmatprep.mubr.msk.bf16.mxu1 %vm3043_vm0, %v3042_v0 }
  0xda   : > { %v506_v50 = vpop.f32.mrf.mxu0 }
  0xdb   : > { %v1218_v52 = vmul.f32 0.35355338, %v506_v50  ;;  %v553_v53 = vpop.f32.mrf.mxu1 }
  0xdc   : > { %v1220_v55 = vmul.f32 0.35355338, %v553_v53  ;;  %v2676_v56 = vpop.f32.mrf.mxu0 }
  0xdd   : > { %v2682_v57 = vpop.f32.mrf.mxu1  ;;  %v3257_v58 = vadd.f32 %v1250_v51, %v1218_v52  ;;  %v1261_v52 = vld [vmem:[%s3845_s3 + $0x58] sm:$0xff] }
  0xde   : > { %v509_v59 = vpop.f32.mrf.mxu0  ;;  %v3259_v60 = vadd.f32 %v1252_v54, %v1220_v55  ;;  %v1262_v57 = vld [vmem:[%s3845_s3 + $0x60] sm:$0xff] }
  0xdf   : > { %v1219_v62 = vmul.f32 0.35355338, %v509_v59  ;;  %v556_v63 = vpop.f32.mrf.mxu1  ;;  %v1315_v1 = vsel %vm1314_vm2, %v3257_v58, -inf }
  0xe0   : > { %v1221_v3 = vmul.f32 0.35355338, %v556_v63  ;;  %v1321_v4 = vsel %vm1314_vm2, %v3259_v60, -inf  ;;  %1316 = vmax.xlane.f32.xlu0 %v1315_v1  ;;  %v2677_v5 = vpop.f32.mrf.mxu0  ;;  %v1264_v1 = vld [vmem:[%s3845_s3 + $0x70] sm:$0xff] }
  0xe1   : > { %1322 = vmax.xlane.f32.xlu1 %v1321_v4  ;;  %v2683_v6 = vpop.f32.mrf.mxu1  ;;  %v3271_v7 = vadd.f32 %v1251_v61, %v1219_v62 }
  0xe2   : > { %v600_v8 = vpop.f32.mrf.mxu0  ;;  %v3273_v9 = vadd.f32 %v1253_v2, %v1221_v3 }
  0xe3   : > { %v1222_v11 = vmul.f32 0.35355338, %v600_v8  ;;  %v647_v12 = vpop.f32.mrf.mxu1  ;;  %v1318_v13 = vsel %vm1314_vm2, %v3271_v7, -inf }
  0xe4   : > { %v1224_v15 = vmul.f32 0.35355338, %v647_v12  ;;  %v1324_v16 = vsel %vm1314_vm2, %v3273_v9, -inf  ;;  %1319 = vmax.xlane.f32.xlu0 %v1318_v13  ;;  %v2688_v17 = vpop.f32.mrf.mxu0 }
  0xe5   : > { %1325 = vmax.xlane.f32.xlu1 %v1324_v16  ;;  %v2694_v18 = vpop.f32.mrf.mxu1  ;;  %v3285_v19 = vadd.f32 %v1254_v10, %v1222_v11  ;;  %v1263_v10 = vld [vmem:[%s3845_s3 + $0x68] sm:$0xff]  ;;  %v1265_v17 = vld [vmem:[%s3845_s3 + $0x78] sm:$0xff] }
  0xe6   : > { %v603_v20 = vpop.f32.mrf.mxu0  ;;  %v3287_v21 = vadd.f32 %v1256_v14, %v1224_v15 }
  0xe7   : > { %v1223_v23 = vmul.f32 0.35355338, %v603_v20  ;;  %v650_v24 = vpop.f32.mrf.mxu1  ;;  %v1327_v25 = vsel %vm1314_vm2, %v3285_v19, -inf }
  0xe8   : > { %v1225_v26 = vmul.f32 0.35355338, %v650_v24  ;;  %1328 = vmax.xlane.f32.xlu0 %v1327_v25  ;;  %v2689_v27 = vpop.f32.mrf.mxu0  ;;  %v1333_v30 = vsel %vm1314_vm2, %v3287_v21, -inf  ;;  %v1266_v24 = vld [vmem:[%s3845_s3 + $0x80] sm:$0xff] }
  0xe9   : > { %v2695_v29 = vpop.f32.mrf.mxu1  ;;  %v3299_v31 = vadd.f32 %v1255_v22, %v1223_v23 }
  0xea   : > { %v694_v32 = vpop.f32.mrf.mxu0  ;;  %v3306_v37 = vadd.f32 %v1257_v28, %v1225_v26  ;;  %v1268_v29 = vld [vmem:[%s3845_s3 + $0x90] sm:$0xff] }
  0xeb   : > { %v1226_v34 = vmul.f32 0.35355338, %v694_v32  ;;  %v741_v35 = vpop.f32.mrf.mxu1  ;;  %v1330_v36 = vsel %vm1314_vm2, %v3299_v31, -inf }
  0xec   : > { %v1228_v39 = vmul.f32 0.35355338, %v741_v35  ;;  %1334 = vmax.xlane.f32.xlu0 %v1333_v30  ;;  %1331 = vmax.xlane.f32.xlu1 %v1330_v36  ;;  %v2700_v40 = vpop.f32.mrf.mxu0  ;;  %v1336_v48 = vsel %vm1314_vm2, %v3306_v37, -inf }
  0xed   : > { %v2706_v41 = vpop.f32.mrf.mxu1  ;;  %v3311_v42 = vadd.f32 %v1258_v33, %v1226_v34 }
  0xee   : > { %v697_v43 = vpop.f32.mrf.mxu0  ;;  %v3313_v44 = vadd.f32 %v1260_v38, %v1228_v39  ;;  %v1267_v38 = vld [vmem:[%s3845_s3 + $0x88] sm:$0xff] }
  0xef   : > { %v1227_v46 = vmul.f32 0.35355338, %v697_v43  ;;  %v744_v47 = vpop.f32.mrf.mxu1  ;;  %v1339_v49 = vsel %vm1314_vm2, %v3311_v42, -inf }
  0xf0   : > { %v1229_v50 = vmul.f32 0.35355338, %v744_v47  ;;  %1337 = vmax.xlane.f32.xlu1 %v1336_v48  ;;  %1340 = vmax.xlane.f32.xlu0 %v1339_v49  ;;  %v2701_v51 = vpop.f32.mrf.mxu0  ;;  %v1345_v54 = vsel %vm1314_vm2, %v3313_v44, -inf  ;;  %v1269_v47 = vld [vmem:[%s3845_s3 + $0x98] sm:$0xff] }
  0xf1   : > { %v2707_v53 = vpop.f32.mrf.mxu1  ;;  %v3327_v55 = vadd.f32 %v1259_v45, %v1227_v46 }
  0xf2   : > { %v788_v56 = vpop.f32.mrf.mxu0  ;;  %v3334_v63 = vadd.f32 %v1261_v52, %v1229_v50  ;;  %v1270_v52 = vld [vmem:[%s3845_s3 + $0xa0] sm:$0xff] }
  0xf3   : > { %v1230_v59 = vmul.f32 0.35355338, %v788_v56  ;;  %v835_v61 = vpop.f32.mrf.mxu1  ;;  %v1342_v62 = vsel %vm1314_vm2, %v3327_v55, -inf }
  0xf4   : > { %v1232_v2 = vmul.f32 0.35355338, %v835_v61  ;;  %1346 = vmax.xlane.f32.xlu0 %v1345_v54  ;;  %1343 = vmax.xlane.f32.xlu1 %v1342_v62  ;;  %v2712_v3 = vpop.f32.mrf.mxu0  ;;  %v1348_v13 = vsel %vm1314_vm2, %v3334_v63, -inf }
  0xf5   : > { %v2718_v4 = vpop.f32.mrf.mxu1  ;;  %v3339_v5 = vadd.f32 %v1262_v57, %v1230_v59  ;;  %v1272_v59 = vld [vmem:[%s3845_s3 + $0xb0] sm:$0xff] }
  0xf6   : > { %v791_v6 = vpop.f32.mrf.mxu0  ;;  %v3341_v8 = vadd.f32 %v1264_v1, %v1232_v2 }
  0xf7   : > { %v1231_v11 = vmul.f32 0.35355338, %v791_v6  ;;  %v838_v12 = vpop.f32.mrf.mxu1  ;;  %v1351_v14 = vsel %vm1314_vm2, %v3339_v5, -inf  ;;  %v1271_v6 = vld [vmem:[%s3845_s3 + $0xa8] sm:$0xff] }
  0xf8   : > { %v1233_v15 = vmul.f32 0.35355338, %v838_v12  ;;  %1349 = vmax.xlane.f32.xlu1 %v1348_v13  ;;  %1352 = vmax.xlane.f32.xlu0 %v1351_v14  ;;  %v2713_v16 = vpop.f32.mrf.mxu0  ;;  %v1357_v20 = vsel %vm1314_vm2, %v3341_v8, -inf }
  0xf9   : > { %v2719_v18 = vpop.f32.mrf.mxu1  ;;  %v3355_v22 = vadd.f32 %v1263_v10, %v1231_v11  ;;  %v1273_v16 = vld [vmem:[%s3845_s3 + $0xb8] sm:$0xff] }
  0xfa   : > { %v882_v23 = vpop.f32.mrf.mxu0  ;;  %v3362_v28 = vadd.f32 %v1265_v17, %v1233_v15 }
  0xfb   : > { %v1234_v25 = vmul.f32 0.35355338, %v882_v23  ;;  %v929_v26 = vpop.f32.mrf.mxu1  ;;  %v1354_v27 = vsel %vm1314_vm2, %v3355_v22, -inf }
  0xfc   : > { %v1236_v30 = vmul.f32 0.35355338, %v929_v26  ;;  %1358 = vmax.xlane.f32.xlu0 %v1357_v20  ;;  %1355 = vmax.xlane.f32.xlu1 %v1354_v27  ;;  %v2724_v32 = vpop.f32.mrf.mxu0  ;;  %v1360_v41 = vsel %vm1314_vm2, %v3362_v28, -inf }
  0xfd   : > { %v2730_v33 = vpop.f32.mrf.mxu1  ;;  %v3367_v34 = vadd.f32 %v1266_v24, %v1234_v25  ;;  %v1274_v24 = vld [vmem:[%s3845_s3 + $0xc0] sm:$0xff] }
  0xfe   : > { %v885_v35 = vpop.f32.mrf.mxu0  ;;  %v3369_v36 = vadd.f32 %v1268_v29, %v1236_v30  ;;  %v1276_v30 = vld [vmem:[%s3845_s3 + $0xd0] sm:$0xff] }
  0xff   : > { %v1235_v39 = vmul.f32 0.35355338, %v885_v35  ;;  %v932_v40 = vpop.f32.mrf.mxu1  ;;  %v1363_v43 = vsel %vm1314_vm2, %v3367_v34, -inf }
 0x100   : > { %v1237_v45 = vmul.f32 0.35355338, %v932_v40  ;;  %1361 = vmax.xlane.f32.xlu1 %v1360_v41  ;;  %1364 = vmax.xlane.f32.xlu0 %v1363_v43  ;;  %v2725_v46 = vpop.f32.mrf.mxu0  ;;  %v1369_v49 = vsel %vm1314_vm2, %v3369_v36, -inf  ;;  %v1275_v41 = vld [vmem:[%s3845_s3 + $0xc8] sm:$0xff] }
 0x101   : > { %v2731_v48 = vpop.f32.mrf.mxu1  ;;  %v3383_v50 = vadd.f32 %v1267_v38, %v1235_v39 }
 0x102   : > { %v976_v51 = vpop.f32.mrf.mxu0  ;;  %v3390_v57 = vadd.f32 %v1269_v47, %v1237_v45 }
 0x103   : > { %v1238_v53 = vmul.f32 0.35355338, %v976_v51  ;;  %v1023_v54 = vpop.f32.mrf.mxu1  ;;  %v1366_v56 = vsel %vm1314_vm2, %v3383_v50, -inf  ;;  %v1277_v51 = vld [vmem:[%s3845_s3 + $0xd8] sm:$0xff] }
 0x104   : > { %v1240_v61 = vmul.f32 0.35355338, %v1023_v54  ;;  %1370 = vmax.xlane.f32.xlu0 %v1369_v49  ;;  %1367 = vmax.xlane.f32.xlu1 %v1366_v56  ;;  %v2736_v62 = vpop.f32.mrf.mxu0  ;;  %v1372_v12 = vsel %vm1314_vm2, %v3390_v57, -inf }
 0x105   : > { %v2742_v1 = vpop.f32.mrf.mxu1  ;;  %v3395_v2 = vadd.f32 %v1270_v52, %v1238_v53 }
 0x106   : > { %v979_v3 = vpop.f32.mrf.mxu0  ;;  %v3397_v4 = vadd.f32 %v1272_v59, %v1240_v61  ;;  %v1278_v59 = vld [vmem:[%s3845_s3 + $0xe0] sm:$0xff] }
 0x107   : > { %v1239_v10 = vmul.f32 0.35355338, %v979_v3  ;;  %v1026_v11 = vpop.f32.mrf.mxu1  ;;  %v1375_v13 = vsel %vm1314_vm2, %v3395_v2, -inf }
 0x108   : > { %v1241_v14 = vmul.f32 0.35355338, %v1026_v11  ;;  %1373 = vmax.xlane.f32.xlu1 %v1372_v12  ;;  %1376 = vmax.xlane.f32.xlu0 %v1375_v13  ;;  %v2737_v15 = vpop.f32.mrf.mxu0  ;;  %v1381_v18 = vsel %vm1314_vm2, %v3397_v4, -inf }
 0x109   : > { %v2743_v17 = vpop.f32.mrf.mxu1  ;;  %v3411_v20 = vadd.f32 %v1271_v6, %v1239_v10  ;;  %v1280_v6 = vld [vmem:[%s3845_s3 + $0xf0] sm:$0xff] }
 0x10a   : > { %v1070_v23 = vpop.f32.mrf.mxu0  ;;  %v3418_v29 = vadd.f32 %v1273_v16, %v1241_v14  ;;  %v1279_v16 = vld [vmem:[%s3845_s3 + $0xe8] sm:$0xff] }
 0x10b   : > { %v1242_v25 = vmul.f32 0.35355338, %v1070_v23  ;;  %v1117_v26 = vpop.f32.mrf.mxu1  ;;  %v1378_v27 = vsel %vm1314_vm2, %v3411_v20, -inf }
 0x10c   : > { %v1244_v32 = vmul.f32 0.35355338, %v1117_v26  ;;  %1382 = vmax.xlane.f32.xlu0 %v1381_v18  ;;  %1379 = vmax.xlane.f32.xlu1 %v1378_v27  ;;  %v2748_v33 = vpop.f32.mrf.mxu0  ;;  %v1384_v46 = vsel %vm1314_vm2, %v3418_v29, -inf  ;;  %v1281_v27 = vld [vmem:[%s3845_s3 + $0xf8] sm:$0xff] }
 0x10d   : > { %v2754_v35 = vpop.f32.mrf.mxu1  ;;  %v3423_v38 = vadd.f32 %v1274_v24, %v1242_v25 }
 0x10e   : > { %v1073_v39 = vpop.f32.mrf.mxu0  ;;  %v3425_v40 = vadd.f32 %v1276_v30, %v1244_v32 }
 0x10f   : > { %v1243_v43 = vmul.f32 0.35355338, %v1073_v39  ;;  %v1120_v45 = vpop.f32.mrf.mxu1  ;;  %v1387_v47 = vsel %vm1314_vm2, %v3423_v38, -inf }
 0x110   : > { %v1245_v48 = vmul.f32 0.35355338, %v1120_v45  ;;  %1385 = vmax.xlane.f32.xlu1 %v1384_v46  ;;  %1388 = vmax.xlane.f32.xlu0 %v1387_v47  ;;  %v2749_v49 = vpop.f32.mrf.mxu0  ;;  %v1393_v53 = vsel %vm1314_vm2, %v3425_v40, -inf }
 0x111   : > { %v2755_v52 = vpop.f32.mrf.mxu1  ;;  %v3439_v54 = vadd.f32 %v1275_v41, %v1243_v43 }
 0x112   : > { %v1164_v56 = vpop.f32.mrf.mxu0  ;;  %v3446_v3 = vadd.f32 %v1277_v51, %v1245_v48 }
 0x113   : > { %v1246_v61 = vmul.f32 0.35355338, %v1164_v56  ;;  %v1211_v62 = vpop.f32.mrf.mxu1  ;;  %v1390_v1 = vsel %vm1314_vm2, %v3439_v54, -inf }
 0x114   : > { %v1248_v10 = vmul.f32 0.35355338, %v1211_v62  ;;  %1394 = vmax.xlane.f32.xlu0 %v1393_v53  ;;  %1391 = vmax.xlane.f32.xlu1 %v1390_v1  ;;  %v2760_v11 = vpop.f32.mrf.mxu0  ;;  %v1396_v23 = vsel %vm1314_vm2, %v3446_v3, -inf }
 0x115   : > { %v2766_v12 = vpop.f32.mrf.mxu1  ;;  %v3451_v13 = vadd.f32 %v1278_v59, %v1246_v61 }
 0x116   : > { %v1167_v14 = vpop.f32.mrf.mxu0  ;;  %v3453_v15 = vadd.f32 %v1280_v6, %v1248_v10 }
 0x117   : > { %v1247_v17 = vmul.f32 0.35355338, %v1167_v14  ;;  %v1214_v18 = vpop.f32.mrf.mxu1  ;;  %v1399_v24 = vsel %vm1314_vm2, %v3451_v13, -inf }
 0x118   : > { %v1249_v25 = vmul.f32 0.35355338, %v1214_v18  ;;  %1397 = vmax.xlane.f32.xlu1 %v1396_v23  ;;  %1400 = vmax.xlane.f32.xlu0 %v1399_v24  ;;  %v2761_v26 = vpop.f32.mrf.mxu0  ;;  %v1405_v32 = vsel %vm1314_vm2, %v3453_v15, -inf }
 0x119   : > { %v2767_v30 = vpop.f32.mrf.mxu1  ;;  %v3467_v33 = vadd.f32 %v1279_v16, %v1247_v17 }
 0x11a   : > { %v3471_v39 = vadd.f32 %v1281_v27, %v1249_v25 }
 0x11b   : > { %v1402_v35 = vsel %vm1314_vm2, %v3467_v33, -inf }
 0x11c   : > { %1406 = vmax.xlane.f32.xlu0 %v1405_v32  ;;  %1403 = vmax.xlane.f32.xlu1 %v1402_v35  ;;  %v1408_v41 = vsel %vm1314_vm2, %v3471_v39, -inf }
 0x120   : > { %1409 = vmax.xlane.f32.xlu1 %v1408_v41 }
 0x169   : > { %v1317_v43 = vpop.xlane.xlu0 %1316 }
 0x16a   : > { %v1323_v45 = vpop.xlane.xlu1 %1322  ;;  %v1411_v46 = vsub.f32 %v3257_v58, %v1317_v43 }
 0x16b   : > { %v1413_v47 = vsub.f32 %v3259_v60, %v1323_v45 }
 0x16c   : > { %v1443_v48 = vmul.f32 1.442695, %v1411_v46 }
 0x16d   : > { %v1447_v49 = vmul.f32 1.442695, %v1413_v47  ;;  %v1320_v51 = vpop.xlane.xlu0 %1319 }
 0x16e   : > { %2890 = vpow2.f32 %v1443_v48  ;;  %v1326_v52 = vpop.xlane.xlu1 %1325  ;;  %v1412_v53 = vsub.f32 %v3271_v7, %v1320_v51 }
 0x16f   : > { %v1414_v56 = vsub.f32 %v3273_v9, %v1326_v52  ;;  %2892 = vpow2.f32 %v1447_v49 }
 0x170   : > { %v1445_v59 = vmul.f32 1.442695, %v1412_v53 }
 0x171   : > { %v1449_v61 = vmul.f32 1.442695, %v1414_v56  ;;  %v1329_v62 = vpop.xlane.xlu0 %1328 }
 0x172   : > { %2894 = vpow2.f32 %v1445_v59  ;;  %v1415_v1 = vsub.f32 %v3285_v19, %v1329_v62 }
 0x173   : > { %2896 = vpow2.f32 %v1449_v61 }
 0x174   : > { %v1451_v58 = vmul.f32 1.442695, %v1415_v1 }
 0x175   : > { %v1335_v6 = vpop.xlane.xlu0 %1334  ;;  %v1332_v60 = vpop.xlane.xlu1 %1331 }
 0x176   : > { %2898 = vpow2.f32 %v1451_v58  ;;  %v1417_v10 = vsub.f32 %v3287_v21, %v1335_v6  ;;  %v1416_v11 = vsub.f32 %v3299_v31, %v1332_v60 }
 0x178   : > { %v1455_v12 = vmul.f32 1.442695, %v1417_v10  ;;  %v1453_v7 = vmul.f32 1.442695, %v1416_v11 }
 0x179   : > { %v1338_v14 = vpop.xlane.xlu1 %1337  ;;  %v1341_v9 = vpop.xlane.xlu0 %1340 }
 0x17a   : > { %2900 = vpow2.f32 %v1455_v12  ;;  %v1418_v16 = vsub.f32 %v3306_v37, %v1338_v14  ;;  %v1419_v17 = vsub.f32 %v3311_v42, %v1341_v9 }
 0x17b   : > { %v3484_v18 = vpop.eup %2890  ;;  %2902 = vpow2.f32 %v1453_v7 }
 0x17c   : > { %v1457_v19 = vmul.f32 1.442695, %v1418_v16  ;;  %v1459_v23 = vmul.f32 1.442695, %v1419_v17  ;;  %v1507_v24 = vsel %vm1314_vm2, %v3484_v18, 0.0  ;;  %v3488_v21 = vpop.eup %2892 }
 0x17d   : > { %v1347_v31 = vpop.xlane.xlu0 %1346  ;;  %v1344_v25 = vpop.xlane.xlu1 %1343  ;;  %1508 = vadd.xlane.f32.xlu0 %v1507_v24  ;;  %v1513_v32 = vsel %vm1314_vm2, %v3488_v21, 0.0 }
 0x17e   : > { %2904 = vpow2.f32 %v1457_v19  ;;  %v1421_v26 = vsub.f32 %v3313_v44, %v1347_v31  ;;  %v1420_v37 = vsub.f32 %v3327_v55, %v1344_v25 }
 0x17f   : > { %v3492_v27 = vpop.eup %2894  ;;  %2906 = vpow2.f32 %v1459_v23 }
 0x180   : > { %v1463_v42 = vmul.f32 1.442695, %v1421_v26  ;;  %v1461_v30 = vmul.f32 1.442695, %v1420_v37  ;;  %v1510_v35 = vsel %vm1314_vm2, %v3492_v27, 0.0  ;;  %v3498_v41 = vpop.eup %2896 }
 0x181   : > { %v1350_v43 = vpop.xlane.xlu1 %1349  ;;  %v1353_v45 = vpop.xlane.xlu0 %1352  ;;  %1514 = vadd.xlane.f32.xlu0 %v1513_v32  ;;  %1511 = vadd.xlane.f32.xlu1 %v1510_v35  ;;  %v1516_v51 = vsel %vm1314_vm2, %v3498_v41, 0.0 }
 0x182   : > { %2908 = vpow2.f32 %v1463_v42  ;;  %v1422_v44 = vsub.f32 %v3334_v63, %v1350_v43  ;;  %v1423_v55 = vsub.f32 %v3339_v5, %v1353_v45 }
 0x183   : > { %v3502_v46 = vpop.eup %2898  ;;  %2910 = vpow2.f32 %v1461_v30 }
 0x184   : > { %v1465_v47 = vmul.f32 1.442695, %v1422_v44  ;;  %v1467_v48 = vmul.f32 1.442695, %v1423_v55  ;;  %v1519_v49 = vsel %vm1314_vm2, %v3502_v46, 0.0 }
 0x185   : > { %v1359_v52 = vpop.xlane.xlu0 %1358  ;;  %v1356_v53 = vpop.xlane.xlu1 %1355  ;;  %1520 = vadd.xlane.f32.xlu0 %v1519_v49  ;;  %1517 = vadd.xlane.f32.xlu1 %v1516_v51 }
 0x186   : > { %2912 = vpow2.f32 %v1465_v47  ;;  %v1425_v63 = vsub.f32 %v3341_v8, %v1359_v52  ;;  %v1424_v5 = vsub.f32 %v3355_v22, %v1356_v53 }
 0x187   : > { %v3510_v56 = vpop.eup %2900  ;;  %2914 = vpow2.f32 %v1467_v48 }
 0x188   : > { %v3512_v59 = vpop.eup %2902  ;;  %v1471_v61 = vmul.f32 1.442695, %v1425_v63  ;;  %v1469_v62 = vmul.f32 1.442695, %v1424_v5  ;;  %v1525_v1 = vsel %vm1314_vm2, %v3510_v56, 0.0  ;;  %v417_v5 = vld [vmem:[%s3560_s26] sm:$0xff] }
 0x189   : > { %v1362_v58 = vpop.xlane.xlu1 %1361  ;;  %v1365_v6 = vpop.xlane.xlu0 %1364  ;;  %1526 = vadd.xlane.f32.xlu0 %v1525_v1  ;;  %v1522_v60 = vsel %vm1314_vm2, %v3512_v59, 0.0 }
 0x18a   : > { %2916 = vpow2.f32 %v1471_v61  ;;  %v1426_v8 = vsub.f32 %v3362_v28, %v1362_v58  ;;  %v1427_v22 = vsub.f32 %v3367_v34, %v1365_v6  ;;  %1523 = vadd.xlane.f32.xlu1 %v1522_v60  ;;  %v418_v61 = vld [vmem:[%s3560_s26 + $0x8] sm:$0xff]  ;;  %v420_v60 = vld [vmem:[%s3560_s26 + $0x18] sm:$0xff] }
 0x18b   : > { %v3520_v10 = vpop.eup %2904  ;;  %2918 = vpow2.f32 %v1469_v62  ;;  %v419_v62 = vld [vmem:[%s3560_s26 + $0x10] sm:$0xff]  ;;  %v449_v6 = vpack.c.bf16 %v418_v61, %v417_v5 }
 0x18c   : > { %v3522_v11 = vpop.eup %2906  ;;  %v1473_v12 = vmul.f32 1.442695, %v1426_v8  ;;  %v1475_v7 = vmul.f32 1.442695, %v1427_v22  ;;  %v1528_v14 = vsel %vm1314_vm2, %v3520_v10, 0.0  ;;  %v450_v22 = vpack.c.bf16 %v420_v60, %v419_v62 }
 0x18d   : > { %v1371_v9 = vpop.xlane.xlu0 %1370  ;;  %v1368_v16 = vpop.xlane.xlu1 %1367  ;;  %v1531_v17 = vsel %vm1314_vm2, %v3522_v11, 0.0  ;;  %2769 = vmatpush3.bf16.msra.mxu0 %v449_v6 }
 0x18e   : > { %2920 = vpow2.f32 %v1473_v12  ;;  %v1429_v28 = vsub.f32 %v3369_v36, %v1371_v9  ;;  %v1428_v34 = vsub.f32 %v3383_v50, %v1368_v16  ;;  %1532 = vadd.xlane.f32.xlu0 %v1531_v17  ;;  %1529 = vadd.xlane.f32.xlu1 %v1528_v14 }
 0x18f   : > { %v3530_v19 = vpop.eup %2908  ;;  %2922 = vpow2.f32 %v1475_v7  ;;  %2775 = vmatpush3.bf16.msra.mxu1 %v450_v22  ;;  %2780 = vmatprep.subr.bf16.mxu0 %v3042_v0 }
 0x190   : > { %v3532_v23 = vpop.eup %2910  ;;  %v1479_v24 = vmul.f32 1.442695, %v1429_v28  ;;  %v1477_v31 = vmul.f32 1.442695, %v1428_v34  ;;  %v1537_v25 = vsel %vm1314_vm2, %v3530_v19, 0.0  ;;  %2786 = vmatprep.subr.bf16.mxu1 %v3042_v0 }
 0x191   : > { %v1374_v26 = vpop.xlane.xlu1 %1373  ;;  %v1377_v37 = vpop.xlane.xlu0 %1376  ;;  %v1534_v42 = vsel %vm1314_vm2, %v3532_v23, 0.0 }
 0x192   : > { %2924 = vpow2.f32 %v1479_v24  ;;  %v1430_v36 = vsub.f32 %v3390_v57, %v1374_v26  ;;  %v1431_v50 = vsub.f32 %v3395_v2, %v1377_v37  ;;  %1538 = vadd.xlane.f32.xlu0 %v1537_v25  ;;  %1535 = vadd.xlane.f32.xlu1 %v1534_v42 }
 0x193   : > { %v3540_v30 = vpop.eup %2912  ;;  %2926 = vpow2.f32 %v1477_v31 }
 0x194   : > { %v3542_v32 = vpop.eup %2914  ;;  %v1481_v35 = vmul.f32 1.442695, %v1430_v36  ;;  %v1483_v43 = vmul.f32 1.442695, %v1431_v50  ;;  %v1540_v45 = vsel %vm1314_vm2, %v3540_v30, 0.0 }
 0x195   : > { %v1383_v44 = vpop.xlane.xlu0 %1382  ;;  %v1380_v55 = vpop.xlane.xlu1 %1379  ;;  %v1543_v57 = vsel %vm1314_vm2, %v3542_v32, 0.0 }
 0x196   : > { %2928 = vpow2.f32 %v1481_v35  ;;  %v1433_v2 = vsub.f32 %v3397_v4, %v1383_v44  ;;  %v1432_v47 = vsub.f32 %v3411_v20, %v1380_v55  ;;  %1544 = vadd.xlane.f32.xlu0 %v1543_v57  ;;  %1541 = vadd.xlane.f32.xlu1 %v1540_v45 }
 0x197   : > { %v3550_v48 = vpop.eup %2916  ;;  %2930 = vpow2.f32 %v1483_v43 }
 0x198   : > { %v3552_v49 = vpop.eup %2918  ;;  %v1487_v51 = vmul.f32 1.442695, %v1433_v2  ;;  %v1485_v52 = vmul.f32 1.442695, %v1432_v47  ;;  %v1549_v53 = vsel %vm1314_vm2, %v3550_v48, 0.0 }
 0x199   : > { %v1386_v4 = vpop.xlane.xlu1 %1385  ;;  %v1389_v20 = vpop.xlane.xlu0 %1388  ;;  %v1546_v63 = vsel %vm1314_vm2, %v3552_v49, 0.0 }
 0x19a   : > { %2932 = vpow2.f32 %v1487_v51  ;;  %v1434_v1 = vsub.f32 %v3418_v29, %v1386_v4  ;;  %v1435_v58 = vsub.f32 %v3423_v38, %v1389_v20  ;;  %1550 = vadd.xlane.f32.xlu0 %v1549_v53  ;;  %1547 = vadd.xlane.f32.xlu1 %v1546_v63 }
 0x19b   : > { %v3570_v8 = vpop.eup %2920  ;;  %2934 = vpow2.f32 %v1485_v52 }
 0x19c   : > { %v3572_v12 = vpop.eup %2922  ;;  %v1489_v7 = vmul.f32 1.442695, %v1434_v1  ;;  %v1491_v14 = vmul.f32 1.442695, %v1435_v58  ;;  %v1552_v9 = vsel %vm1314_vm2, %v3570_v8, 0.0 }
 0x19d   : > { %v1395_v16 = vpop.xlane.xlu0 %1394  ;;  %v1392_v29 = vpop.xlane.xlu1 %1391  ;;  %v1555_v38 = vsel %vm1314_vm2, %v3572_v12, 0.0 }
 0x19e   : > { %2936 = vpow2.f32 %v1489_v7  ;;  %v1437_v17 = vsub.f32 %v3425_v40, %v1395_v16  ;;  %v1436_v28 = vsub.f32 %v3439_v54, %v1392_v29  ;;  %1556 = vadd.xlane.f32.xlu0 %v1555_v38  ;;  %1553 = vadd.xlane.f32.xlu1 %v1552_v9 }
 0x19f   : > { %v3581_v34 = vpop.eup %2924  ;;  %2938 = vpow2.f32 %v1491_v14 }
 0x1a0   : > { %v3584_v24 = vpop.eup %2926  ;;  %v1495_v31 = vmul.f32 1.442695, %v1437_v17  ;;  %v1493_v25 = vmul.f32 1.442695, %v1436_v28  ;;  %v1561_v26 = vsel %vm1314_vm2, %v3581_v34, 0.0 }
 0x1a1   : > { %v1398_v37 = vpop.xlane.xlu1 %1397  ;;  %v1401_v42 = vpop.xlane.xlu0 %1400  ;;  %v1558_v40 = vsel %vm1314_vm2, %v3584_v24, 0.0 }
 0x1a2   : > { %2940 = vpow2.f32 %v1495_v31  ;;  %v1438_v54 = vsub.f32 %v3446_v3, %v1398_v37  ;;  %1562 = vadd.xlane.f32.xlu0 %v1561_v26  ;;  %v1439_v36 = vsub.f32 %v3451_v13, %v1401_v42  ;;  %1559 = vadd.xlane.f32.xlu1 %v1558_v40 }
 0x1a3   : > { %v3592_v50 = vpop.eup %2928  ;;  %2942 = vpow2.f32 %v1493_v25 }
 0x1a4   : > { %v3594_v35 = vpop.eup %2930  ;;  %v1497_v43 = vmul.f32 1.442695, %v1438_v54  ;;  %v1499_v45 = vmul.f32 1.442695, %v1439_v36  ;;  %v1564_v44 = vsel %vm1314_vm2, %v3592_v50, 0.0 }
 0x1a5   : > { %v1567_v55 = vsel %vm1314_vm2, %v3594_v35, 0.0  ;;  %v1407_v57 = vpop.xlane.xlu0 %1406  ;;  %v1404_v2 = vpop.xlane.xlu1 %1403 }
 0x1a6   : > { %2944 = vpow2.f32 %v1497_v43  ;;  %1568 = vadd.xlane.f32.xlu0 %v1567_v55  ;;  %v1441_v3 = vsub.f32 %v3453_v15, %v1407_v57  ;;  %1565 = vadd.xlane.f32.xlu1 %v1564_v44  ;;  %v1440_v13 = vsub.f32 %v3467_v33, %v1404_v2  ;;  %v421_v55 = vld [vmem:[%s3560_s26 + $0x20] sm:$0xff]  ;;  %v422_v57 = vld [vmem:[%s3560_s26 + $0x28] sm:$0xff] }
 0x1a7   : > { %v3602_v47 = vpop.eup %2932  ;;  %2946 = vpow2.f32 %v1499_v45 }
 0x1a8   : > { %v3604_v51 = vpop.eup %2934  ;;  %v1503_v52 = vmul.f32 1.442695, %v1441_v3  ;;  %v1501_v53 = vmul.f32 1.442695, %v1440_v13  ;;  %v1573_v4 = vsel %vm1314_vm2, %v3602_v47, 0.0 }
 0x1a9   : > { %v1570_v20 = vsel %vm1314_vm2, %v3604_v51, 0.0  ;;  %v1410_v63 = vpop.xlane.xlu1 %1409 }
 0x1aa   : > { %2948 = vpow2.f32 %v1503_v52  ;;  %1574 = vadd.xlane.f32.xlu0 %v1573_v4  ;;  %1571 = vadd.xlane.f32.xlu1 %v1570_v20  ;;  %v1442_v15 = vsub.f32 %v3471_v39, %v1410_v63  ;;  %v451_v20 = vpack.c.bf16 %v422_v57, %v421_v55 }
 0x1ab   : > { %v3611_v33 = vpop.eup %2936  ;;  %2950 = vpow2.f32 %v1501_v53 }
 0x1ac   : > { %v3613_v5 = vpop.eup %2938  ;;  %v1505_v61 = vmul.f32 1.442695, %v1442_v15  ;;  %v1576_v62 = vsel %vm1314_vm2, %v3611_v33, 0.0  ;;  %v423_v15 = vld [vmem:[%s3560_s26 + $0x30] sm:$0xff] }
 0x1ad   : > { %v1579_v1 = vsel %vm1314_vm2, %v3613_v5, 0.0 }
 0x1ae   : > { %2952 = vpow2.f32 %v1505_v61  ;;  %1580 = vadd.xlane.f32.xlu0 %v1579_v1  ;;  %1577 = vadd.xlane.f32.xlu1 %v1576_v62  ;;  %v424_v61 = vld [vmem:[%s3560_s26 + $0x38] sm:$0xff] }
 0x1af   : > { %v3619_v58 = vpop.eup %2940 }
 0x1b0   : > { %v3621_v6 = vpop.eup %2942  ;;  %v1585_v39 = vsel %vm1314_vm2, %v3619_v58, 0.0 }
 0x1b1   : > { %v1582_v60 = vsel %vm1314_vm2, %v3621_v6, 0.0 }
 0x1b2   : > { %1586 = vadd.xlane.f32.xlu0 %v1585_v39  ;;  %1583 = vadd.xlane.f32.xlu1 %v1582_v60 }
 0x1b3   : > { %v3627_v22 = vpop.eup %2944 }
 0x1b4   : > { %v3629_v7 = vpop.eup %2946  ;;  %v1588_v14 = vsel %vm1314_vm2, %v3627_v22, 0.0 }
 0x1b5   : > { %v1591_v9 = vsel %vm1314_vm2, %v3629_v7, 0.0 }
 0x1b6   : > { %1592 = vadd.xlane.f32.xlu0 %v1591_v9  ;;  %1589 = vadd.xlane.f32.xlu1 %v1588_v14  ;;  %v452_v14 = vpack.c.bf16 %v424_v61, %v423_v15  ;;  %v431_v61 = vld [vmem:[%s3560_s26 + $0x70] sm:$0xff] }
 0x1b7   : > { %v3635_v16 = vpop.eup %2948 }
 0x1b8   : > { %v3637_v29 = vpop.eup %2950  ;;  %v1597_v38 = vsel %vm1314_vm2, %v3635_v16, 0.0 }
 0x1b9   : > { %v1594_v17 = vsel %vm1314_vm2, %v3637_v29, 0.0 }
 0x1ba   : > { %1598 = vadd.xlane.f32.xlu0 %v1597_v38  ;;  %1595 = vadd.xlane.f32.xlu1 %v1594_v17  ;;  %v425_v38 = vld [vmem:[%s3560_s26 + $0x40] sm:$0xff]  ;;  %v426_v17 = vld [vmem:[%s3560_s26 + $0x48] sm:$0xff] }
 0x1bb   : > { %v3643_v28 = vpop.eup %2952 }
 0x1bc   : > { %v1600_v31 = vsel %vm1314_vm2, %v3643_v28, 0.0 }
 0x1be   : > { %1601 = vadd.xlane.f32.xlu1 %v1600_v31 }
 0x206   : > { %v1509_v25 = vpop.xlane.xlu0 %1508 }
 0x207   : > { %2954 = vrcp.f32 %v1509_v25 }
 0x20a   : > { %v1515_v26 = vpop.xlane.xlu0 %1514  ;;  %v1512_v37 = vpop.xlane.xlu1 %1511 }
 0x20b   : > { %2956 = vrcp.f32 %v1512_v37  ;;  %v453_v37 = vpack.c.bf16 %v426_v17, %v425_v38  ;;  %v434_v38 = vld [vmem:[%s3560_s26 + $0x88] sm:$0xff] }
 0x20c   : > { %2958 = vrcp.f32 %v1515_v26 }
 0x20e   : > { %v1521_v42 = vpop.xlane.xlu0 %1520  ;;  %v1518_v40 = vpop.xlane.xlu1 %1517 }
 0x20f   : > { %2960 = vrcp.f32 %v1518_v40 }
 0x210   : > { %2962 = vrcp.f32 %v1521_v42 }
 0x212   : > { %v1527_v54 = vpop.xlane.xlu0 %1526 }
 0x213   : > { %v1524_v36 = vpop.xlane.xlu1 %1523 }
 0x214   : > { %2964 = vrcp.f32 %v1524_v36  ;;  %v2955_v43 = vpop.eup %2954  ;;  %v428_v36 = vld [vmem:[%s3560_s26 + $0x58] sm:$0xff] }
 0x215   : > { %2966 = vrcp.f32 %v1527_v54  ;;  %v1635_v3 = vmul.f32 %v2955_v43, %v3484_v18  ;;  %v427_v54 = vld [vmem:[%s3560_s26 + $0x50] sm:$0xff] }
 0x216   : > { %v454_v57 = vpack.c.bf16 %v428_v36, %v427_v54 }
 0x217   : > { %v1533_v45 = vpop.xlane.xlu0 %1532  ;;  %v1530_v44 = vpop.xlane.xlu1 %1529 }
 0x218   : > { %v2957_v2 = vpop.eup %2956  ;;  %2968 = vrcp.f32 %v1530_v44 }
 0x219   : > { %v1636_v13 = vmul.f32 %v2957_v2, %v3492_v27  ;;  %v2959_v52 = vpop.eup %2958  ;;  %2970 = vrcp.f32 %v1533_v45 }
 0x21a   : > { %v1637_v1 = vmul.f32 %v2959_v52, %v3488_v21 }
 0x21b   : > { %v1539_v53 = vpop.xlane.xlu0 %1538  ;;  %v1536_v4 = vpop.xlane.xlu1 %1535  ;;  %v1667_v63 = vpack.c.bf16 %v1636_v13, %v1635_v3  ;;  %v429_v3 = vld [vmem:[%s3560_s26 + $0x60] sm:$0xff]  ;;  %v430_v13 = vld [vmem:[%s3560_s26 + $0x68] sm:$0xff] }
 0x21c   : > { %v2961_v62 = vpop.eup %2960  ;;  %2972 = vrcp.f32 %v1536_v4 }
 0x21d   : > { %2771 = vmatmul.mubr.msk.bf16.vlgmr.msra.gmra.mxu0 %vm1314_vm2, %v1667_v63  ;;  %v1638_v18 = vmul.f32 %v2961_v62, %v3498_v41  ;;  %v2963_v39 = vpop.eup %2962  ;;  %2974 = vrcp.f32 %v1539_v53  ;;  %v455_v63 = vpack.c.bf16 %v430_v13, %v429_v3  ;;  %v432_v62 = vld [vmem:[%s3560_s26 + $0x78] sm:$0xff] }
 0x21e   : > { %2781 = vmatpush3.bf16.msra.mxu0 %v451_v20  ;;  %2782 = vmatprep.mubr.msk.bf16.mxu0 %vm3043_vm0, %v3042_v0  ;;  %v1639_v21 = vmul.f32 %v2963_v39, %v3502_v46 }
 0x21f   : > { %v1545_v27 = vpop.xlane.xlu0 %1544  ;;  %v1542_v60 = vpop.xlane.xlu1 %1541  ;;  %v1668_v9 = vpack.c.bf16 %v1638_v18, %v1637_v1  ;;  %2792 = vmatprep.subr.bf16.mxu0 %v3042_v0 }
 0x220   : > { %2976 = vrcp.f32 %v1542_v60  ;;  %v456_v60 = vpack.c.bf16 %v432_v62, %v431_v61  ;;  %v441_v62 = vld [vmem:[%s3560_s26 + $0xc0] sm:$0xff] }
 0x221   : > { %v2965_v31 = vpop.eup %2964  ;;  %2777 = vmatmul.mubr.msk.bf16.vlgmr.msra.gmra.mxu1 %vm1314_vm2, %v1668_v9  ;;  %2978 = vrcp.f32 %v1545_v27  ;;  %v433_v9 = vld [vmem:[%s3560_s26 + $0x80] sm:$0xff] }
 0x222   : > { %v1640_v41 = vmul.f32 %v2965_v31, %v3512_v59  ;;  %2787 = vmatpush3.bf16.msra.mxu1 %v452_v14  ;;  %2788 = vmatprep.mubr.msk.bf16.mxu1 %vm3043_vm0, %v3042_v0  ;;  %v2967_v42 = vpop.eup %2966 }
 0x223   : > { %v1551_v25 = vpop.xlane.xlu0 %1550  ;;  %v1548_v26 = vpop.xlane.xlu1 %1547  ;;  %2798 = vmatprep.subr.bf16.mxu1 %v3042_v0  ;;  %v1641_v45 = vmul.f32 %v2967_v42, %v3510_v56  ;;  %v436_v42 = vld [vmem:[%s3560_s26 + $0x98] sm:$0xff] }
 0x224   : > { %v1669_v40 = vpack.c.bf16 %v1640_v41, %v1639_v21  ;;  %2980 = vrcp.f32 %v1548_v26 }
 0x225   : > { %v2969_v46 = vpop.eup %2968  ;;  %2982 = vrcp.f32 %v1551_v25  ;;  %v457_v25 = vpack.c.bf16 %v434_v38, %v433_v9  ;;  %v444_v9 = vld [vmem:[%s3560_s26 + $0xd8] sm:$0xff] }
 0x226   : > { %2783 = vmatmul.mubr.msk.bf16.vlgmr.msra.gmra.mxu0 %vm1314_vm2, %v1669_v40  ;;  %v1642_v44 = vmul.f32 %v2969_v46, %v3520_v10  ;;  %v2971_v55 = vpop.eup %2970 }
 0x227   : > { %v1557_v59 = vpop.xlane.xlu0 %1556  ;;  %v1554_v43 = vpop.xlane.xlu1 %1553  ;;  %2793 = vmatpush3.bf16.msra.mxu0 %v453_v37  ;;  %2794 = vmatprep.mubr.msk.bf16.mxu0 %vm3043_vm0, %v3042_v0  ;;  %v1643_v53 = vmul.f32 %v2971_v55, %v3522_v11  ;;  %v435_v37 = vld [vmem:[%s3560_s26 + $0x90] sm:$0xff] }
 0x228   : > { %2804 = vmatprep.subr.bf16.mxu0 %v3042_v0  ;;  %2984 = vrcp.f32 %v1554_v43  ;;  %v1670_v2 = vpack.c.bf16 %v1642_v44, %v1641_v45  ;;  %v437_v45 = vld [vmem:[%s3560_s26 + $0xa0] sm:$0xff]  ;;  %v438_v44 = vld [vmem:[%s3560_s26 + $0xa8] sm:$0xff] }
 0x229   : > { %v2973_v52 = vpop.eup %2972  ;;  %2986 = vrcp.f32 %v1557_v59  ;;  %v458_v59 = vpack.c.bf16 %v436_v42, %v435_v37  ;;  %v459_v13 = vpack.c.bf16 %v438_v44, %v437_v45 }
 0x22a   : > { %2789 = vmatmul.mubr.msk.bf16.vlgmr.msra.gmra.mxu1 %vm1314_vm2, %v1670_v2  ;;  %v1644_v4 = vmul.f32 %v2973_v52, %v3532_v23  ;;  %v2975_v20 = vpop.eup %2974 }
 0x22b   : > { %v1563_v56 = vpop.xlane.xlu0 %1562  ;;  %v1560_v10 = vpop.xlane.xlu1 %1559  ;;  %2799 = vmatpush3.bf16.msra.mxu1 %v454_v57  ;;  %2800 = vmatprep.mubr.msk.bf16.mxu1 %vm3043_vm0, %v3042_v0  ;;  %v1645_v18 = vmul.f32 %v2975_v20, %v3530_v19 }
 0x22c   : > { %2988 = vrcp.f32 %v1560_v10  ;;  %v1671_v15 = vpack.c.bf16 %v1644_v4, %v1643_v53  ;;  %2810 = vmatprep.subr.bf16.mxu1 %v3042_v0  ;;  %v440_v10 = vld [vmem:[%s3560_s26 + $0xb8] sm:$0xff] }
 0x22d   : > { %v2977_v1 = vpop.eup %2976  ;;  %2990 = vrcp.f32 %v1563_v56  ;;  %v439_v56 = vld [vmem:[%s3560_s26 + $0xb0] sm:$0xff] }
 0x22e   : > { %2795 = vmatmul.mubr.msk.bf16.vlgmr.msra.gmra.mxu0 %vm1314_vm2, %v1671_v15  ;;  %v1646_v39 = vmul.f32 %v2977_v1, %v3540_v30  ;;  %v2979_v27 = vpop.eup %2978  ;;  %v460_v15 = vpack.c.bf16 %v440_v10, %v439_v56  ;;  %v442_v1 = vld [vmem:[%s3560_s26 + $0xc8] sm:$0xff] }
 0x22f   : > { %v1569_v11 = vpop.xlane.xlu0 %1568  ;;  %v1566_v23 = vpop.xlane.xlu1 %1565  ;;  %2805 = vmatpush3.bf16.msra.mxu0 %v455_v63  ;;  %2806 = vmatprep.mubr.msk.bf16.mxu0 %vm3043_vm0, %v3042_v0  ;;  %v1647_v31 = vmul.f32 %v2979_v27, %v3542_v32  ;;  %v461_v27 = vpack.c.bf16 %v442_v1, %v441_v62 }
 0x230   : > { %2992 = vrcp.f32 %v1566_v23  ;;  %v1672_v14 = vpack.c.bf16 %v1646_v39, %v1645_v18  ;;  %2816 = vmatprep.subr.bf16.mxu0 %v3042_v0 }
 0x231   : > { %v2981_v17 = vpop.eup %2980  ;;  %2994 = vrcp.f32 %v1569_v11 }
 0x232   : > { %2801 = vmatmul.mubr.msk.bf16.vlgmr.msra.gmra.mxu1 %vm1314_vm2, %v1672_v14  ;;  %v1648_v21 = vmul.f32 %v2981_v17, %v3552_v49  ;;  %v2983_v41 = vpop.eup %2982  ;;  %v443_v14 = vld [vmem:[%s3560_s26 + $0xd0] sm:$0xff] }
 0x233   : > { %v1575_v19 = vpop.xlane.xlu0 %1574  ;;  %v1572_v30 = vpop.xlane.xlu1 %1571  ;;  %2811 = vmatpush3.bf16.msra.mxu1 %v456_v60  ;;  %2812 = vmatprep.mubr.msk.bf16.mxu1 %vm3043_vm0, %v3042_v0  ;;  %v1649_v54 = vmul.f32 %v2983_v41, %v3550_v48  ;;  %v446_v41 = vld [vmem:[%s3560_s26 + $0xe8] sm:$0xff] }
 0x234   : > { %2996 = vrcp.f32 %v1572_v30  ;;  %v1673_v26 = vpack.c.bf16 %v1648_v21, %v1647_v31  ;;  %2822 = vmatprep.subr.bf16.mxu1 %v3042_v0  ;;  %v462_v30 = vpack.c.bf16 %v444_v9, %v443_v14  ;;  %v445_v21 = vld [vmem:[%s3560_s26 + $0xe0] sm:$0xff] }
 0x235   : > { %v2985_v40 = vpop.eup %2984  ;;  %2998 = vrcp.f32 %v1575_v19  ;;  %v463_v37 = vpack.c.bf16 %v446_v41, %v445_v21 }
 0x236   : > { %2807 = vmatmul.mubr.msk.bf16.vlgmr.msra.gmra.mxu0 %vm1314_vm2, %v1673_v26  ;;  %v1650_v36 = vmul.f32 %v2985_v40, %v3570_v8  ;;  %v2987_v46 = vpop.eup %2986  ;;  %v447_v40 = vld [vmem:[%s3560_s26 + $0xf0] sm:$0xff] }
 0x237   : > { %v1581_v32 = vpop.xlane.xlu0 %1580  ;;  %v1578_v49 = vpop.xlane.xlu1 %1577  ;;  %2817 = vmatpush3.bf16.msra.mxu0 %v457_v25  ;;  %2818 = vmatprep.mubr.msk.bf16.mxu0 %vm3043_vm0, %v3042_v0  ;;  %v1651_v57 = vmul.f32 %v2987_v46, %v3572_v12 }
 0x238   : > { %3000 = vrcp.f32 %v1578_v49  ;;  %v1674_v43 = vpack.c.bf16 %v1650_v36, %v1649_v54  ;;  %2828 = vmatprep.subr.bf16.mxu0 %v3042_v0 }
 0x239   : > { %v2989_v55 = vpop.eup %2988  ;;  %3002 = vrcp.f32 %v1581_v32  ;;  %v448_v32 = vld [vmem:[%s3560_s26 + $0xf8] sm:$0xff] }
 0x23a   : > { %2813 = vmatmul.mubr.msk.bf16.vlgmr.msra.gmra.mxu1 %vm1314_vm2, %v1674_v43  ;;  %v1652_v2 = vmul.f32 %v2989_v55, %v3584_v24  ;;  %v2991_v3 = vpop.eup %2990 }
 0x23b   : > { %v1587_v48 = vpop.xlane.xlu0 %1586  ;;  %v1584_v8 = vpop.xlane.xlu1 %1583  ;;  %2823 = vmatpush3.bf16.msra.mxu1 %v458_v59  ;;  %2824 = vmatprep.mubr.msk.bf16.mxu1 %vm3043_vm0, %v3042_v0  ;;  %v1653_v4 = vmul.f32 %v2991_v3, %v3581_v34 }
 0x23c   : > { %3004 = vrcp.f32 %v1584_v8  ;;  %v1675_v52 = vpack.c.bf16 %v1652_v2, %v1651_v57  ;;  %2834 = vmatprep.subr.bf16.mxu1 %v3042_v0 }
 0x23d   : > { %v2993_v53 = vpop.eup %2992  ;;  %3006 = vrcp.f32 %v1587_v48 }
 0x23e   : > { %2819 = vmatmul.mubr.msk.bf16.vlgmr.msra.gmra.mxu0 %vm1314_vm2, %v1675_v52  ;;  %v1654_v20 = vmul.f32 %v2993_v53, %v3592_v50  ;;  %v2995_v63 = vpop.eup %2994 }
 0x23f   : > { %v1593_v12 = vpop.xlane.xlu0 %1592  ;;  %v1590_v24 = vpop.xlane.xlu1 %1589  ;;  %2829 = vmatpush3.bf16.msra.mxu0 %v459_v13  ;;  %2830 = vmatprep.mubr.msk.bf16.mxu0 %vm3043_vm0, %v3042_v0  ;;  %v1655_v23 = vmul.f32 %v2995_v63, %v3594_v35 }
 0x240   : > { %3008 = vrcp.f32 %v1590_v24  ;;  %v1676_v61 = vpack.c.bf16 %v1654_v20, %v1653_v4  ;;  %2840 = vmatprep.subr.bf16.mxu0 %v3042_v0 }
 0x241   : > { %v2997_v11 = vpop.eup %2996  ;;  %3010 = vrcp.f32 %v1593_v12 }
 0x242   : > { %2825 = vmatmul.mubr.msk.bf16.vlgmr.msra.gmra.mxu1 %vm1314_vm2, %v1676_v61  ;;  %v1656_v18 = vmul.f32 %v2997_v11, %v3604_v51  ;;  %v2999_v39 = vpop.eup %2998 }
 0x243   : > { %v1599_v34 = vpop.xlane.xlu0 %1598  ;;  %v1596_v50 = vpop.xlane.xlu1 %1595  ;;  %2835 = vmatpush3.bf16.msra.mxu1 %v460_v15  ;;  %2836 = vmatprep.mubr.msk.bf16.mxu1 %vm3043_vm0, %v3042_v0  ;;  %v1657_v51 = vmul.f32 %v2999_v39, %v3602_v47 }
 0x244   : > { %3012 = vrcp.f32 %v1596_v50  ;;  %v1677_v60 = vpack.c.bf16 %v1656_v18, %v1655_v23  ;;  %2846 = vmatprep.subr.bf16.mxu1 %v3042_v0 }
 0x245   : > { %v3001_v38 = vpop.eup %3000  ;;  %3014 = vrcp.f32 %v1599_v34 }
 0x246   : > { %2831 = vmatmul.mubr.msk.bf16.vlgmr.msra.gmra.mxu0 %vm1314_vm2, %v1677_v60  ;;  %v1658_v17 = vmul.f32 %v3001_v38, %v3611_v33  ;;  %v3003_v19 = vpop.eup %3002 }
 0x247   : > { %v1602_v35 = vpop.xlane.xlu1 %1601  ;;  %2841 = vmatpush3.bf16.msra.mxu0 %v461_v27  ;;  %2842 = vmatprep.mubr.msk.bf16.mxu0 %vm3043_vm0, %v3042_v0  ;;  %v1659_v47 = vmul.f32 %v3003_v19, %v3613_v5 }
 0x248   : > { %3016 = vrcp.f32 %v1602_v35  ;;  %v1678_v31 = vpack.c.bf16 %v1658_v17, %v1657_v51  ;;  %2852 = vmatprep.subr.bf16.mxu0 %v3042_v0 }
 0x249   : > { %v3005_v25 = vpop.eup %3004 }
 0x24a   : > { %2837 = vmatmul.mubr.msk.bf16.vlgmr.msra.gmra.mxu1 %vm1314_vm2, %v1678_v31  ;;  %v1660_v33 = vmul.f32 %v3005_v25, %v3621_v6  ;;  %v3007_v26 = vpop.eup %3006  ;;  %v464_v6 = vpack.c.bf16 %v448_v32, %v447_v40 }
 0x24b   : > { %2847 = vmatpush3.bf16.msra.mxu1 %v462_v30  ;;  %2848 = vmatprep.mubr.msk.bf16.mxu1 %vm3043_vm0, %v3042_v0  ;;  %v1661_v54 = vmul.f32 %v3007_v26, %v3619_v58 }
 0x24c   : > { %v1679_v42 = vpack.c.bf16 %v1660_v33, %v1659_v47  ;;  %2858 = vmatprep.subr.bf16.mxu1 %v3042_v0 }
 0x24d   : > { %v3009_v49 = vpop.eup %3008 }
 0x24e   : > { %2843 = vmatmul.mubr.msk.bf16.vlgmr.msra.gmra.mxu0 %vm1314_vm2, %v1679_v42  ;;  %v1662_v5 = vmul.f32 %v3009_v49, %v3627_v22  ;;  %v3011_v36 = vpop.eup %3010 }
 0x24f   : > { %2853 = vmatpush3.bf16.msra.mxu0 %v463_v37  ;;  %2854 = vmatprep.mubr.msk.bf16.mxu0 %vm3043_vm0, %v3042_v0  ;;  %v1663_v45 = vmul.f32 %v3011_v36, %v3629_v7 }
 0x250   : > { %v1680_v46 = vpack.c.bf16 %v1662_v5, %v1661_v54 }
 0x251   : > { %v3013_v59 = vpop.eup %3012 }
 0x252   : > { %v3015_v43 = vpop.eup %3014  ;;  %2849 = vmatmul.mubr.msk.bf16.vlgmr.msra.gmra.mxu1 %vm1314_vm2, %v1680_v46  ;;  %v1664_v44 = vmul.f32 %v3013_v59, %v3637_v29 }
 0x253   : > { %2859 = vmatpush3.bf16.msra.mxu1 %v464_v6  ;;  %2860 = vmatprep.mubr.msk.bf16.mxu1 %vm3043_vm0, %v3042_v0  ;;  %v1665_v55 = vmul.f32 %v3015_v43, %v3635_v16 }
 0x254   : > { %v1681_v22 = vpack.c.bf16 %v1664_v44, %v1663_v45 }
 0x255   : > { %v3017_v58 = vpop.eup %3016 }
 0x256   : > { %v1666_v48 = vmul.f32 %v3017_v58, %v3643_v28  ;;  %2855 = vmatmul.mubr.msk.bf16.vlgmr.msra.gmra.mxu0 %vm1314_vm2, %v1681_v22 }
 0x258   : > { %v1682_v8 = vpack.c.bf16 %v1666_v48, %v1665_v55 }
 0x25a   : > { %2861 = vmatmul.mubr.msk.bf16.vlgmr.msra.gmra.mxu1 %vm1314_vm2, %v1682_v8 }
 0x2dd   : > { %v1720_v0 = vpop.f32.mrf.mxu0 }
 0x2de   : > { %2387 = vst.msk [vmem:[%s3767_s29] sm:$0xff] %vm465_vm1, %v1720_v0 }
 0x2df   : > { %v2772_v7 = vpop.f32.mrf.mxu0 }
 0x2e1   : > { %v1723_v16 = vpop.f32.mrf.mxu0  ;;  %v1764_v29 = vpop.f32.mrf.mxu1 }
 0x2e2   : > { %2388 = vst.msk [vmem:[%s3767_s29 + $0x8] sm:$0xff] %vm465_vm1, %v1723_v16  ;;  %2389 = vst.msk [vmem:[%s3767_s29 + $0x10] sm:$0xff] %vm465_vm1, %v1764_v29 }
 0x2e3   : > { %v2773_v28 = vpop.f32.mrf.mxu0  ;;  %v2778_v57 = vpop.f32.mrf.mxu1 }
 0x2e5   : > { %v1767_v2 = vpop.f32.mrf.mxu1 }
 0x2e6   : > { %v1808_v3 = vpop.f32.mrf.mxu0  ;;  %2390 = vst.msk [vmem:[%s3767_s29 + $0x18] sm:$0xff] %vm465_vm1, %v1767_v2 }
 0x2e7   : > { %2391 = vst.msk [vmem:[%s3767_s29 + $0x20] sm:$0xff] %vm465_vm1, %v1808_v3  ;;  %v2779_v13 = vpop.f32.mrf.mxu1 }
 0x2e8   : > { %v2784_v52 = vpop.f32.mrf.mxu0 }
 0x2ea   : > { %v1811_v56 = vpop.f32.mrf.mxu0  ;;  %v1852_v10 = vpop.f32.mrf.mxu1 }
 0x2eb   : > { %2392 = vst.msk [vmem:[%s3767_s29 + $0x28] sm:$0xff] %vm465_vm1, %v1811_v56  ;;  %2393 = vst.msk [vmem:[%s3767_s29 + $0x30] sm:$0xff] %vm465_vm1, %v1852_v10 }
 0x2ec   : > { %v2785_v53 = vpop.f32.mrf.mxu0  ;;  %v2790_v12 = vpop.f32.mrf.mxu1 }
 0x2ee   : > { %v1855_v24 = vpop.f32.mrf.mxu1  ;;  %v1896_v4 = vpop.f32.mrf.mxu0 }
 0x2ef   : > { %2394 = vst.msk [vmem:[%s3767_s29 + $0x38] sm:$0xff] %vm465_vm1, %v1855_v24  ;;  %2395 = vst.msk [vmem:[%s3767_s29 + $0x40] sm:$0xff] %vm465_vm1, %v1896_v4 }
 0x2f0   : > { %v2791_v20 = vpop.f32.mrf.mxu1  ;;  %v2796_v63 = vpop.f32.mrf.mxu0 }
 0x2f2   : > { %v1899_v15 = vpop.f32.mrf.mxu0  ;;  %v1940_v61 = vpop.f32.mrf.mxu1 }
 0x2f3   : > { %2396 = vst.msk [vmem:[%s3767_s29 + $0x48] sm:$0xff] %vm465_vm1, %v1899_v15  ;;  %2397 = vst.msk [vmem:[%s3767_s29 + $0x50] sm:$0xff] %vm465_vm1, %v1940_v61 }
 0x2f4   : > { %v2797_v62 = vpop.f32.mrf.mxu0  ;;  %v2802_v1 = vpop.f32.mrf.mxu1 }
 0x2f6   : > { %v1943_v11 = vpop.f32.mrf.mxu1  ;;  %v1984_v34 = vpop.f32.mrf.mxu0 }
 0x2f7   : > { %2398 = vst.msk [vmem:[%s3767_s29 + $0x58] sm:$0xff] %vm465_vm1, %v1943_v11  ;;  %2399 = vst.msk [vmem:[%s3767_s29 + $0x60] sm:$0xff] %vm465_vm1, %v1984_v34 }
 0x2f8   : > { %v2803_v50 = vpop.f32.mrf.mxu1  ;;  %v2808_v23 = vpop.f32.mrf.mxu0 }
 0x2fa   : > { %v1987_v18 = vpop.f32.mrf.mxu0  ;;  %v2028_v39 = vpop.f32.mrf.mxu1 }
 0x2fb   : > { %2400 = vst.msk [vmem:[%s3767_s29 + $0x68] sm:$0xff] %vm465_vm1, %v1987_v18  ;;  %2401 = vst.msk [vmem:[%s3767_s29 + $0x70] sm:$0xff] %vm465_vm1, %v2028_v39 }
 0x2fc   : > { %v2809_v27 = vpop.f32.mrf.mxu0  ;;  %v2814_v60 = vpop.f32.mrf.mxu1 }
 0x2fe   : > { %v2031_v14 = vpop.f32.mrf.mxu1  ;;  %v2072_v9 = vpop.f32.mrf.mxu0 }
 0x2ff   : > { %2402 = vst.msk [vmem:[%s3767_s29 + $0x78] sm:$0xff] %vm465_vm1, %v2031_v14  ;;  %2403 = vst.msk [vmem:[%s3767_s29 + $0x80] sm:$0xff] %vm465_vm1, %v2072_v9 }
 0x300   : > { %v2815_v38 = vpop.f32.mrf.mxu1  ;;  %v2820_v35 = vpop.f32.mrf.mxu0 }
 0x302   : > { %v2075_v51 = vpop.f32.mrf.mxu0  ;;  %v2116_v17 = vpop.f32.mrf.mxu1 }
 0x303   : > { %2404 = vst.msk [vmem:[%s3767_s29 + $0x88] sm:$0xff] %vm465_vm1, %v2075_v51  ;;  %2405 = vst.msk [vmem:[%s3767_s29 + $0x90] sm:$0xff] %vm465_vm1, %v2116_v17 }
 0x304   : > { %v2821_v19 = vpop.f32.mrf.mxu0  ;;  %v2826_v30 = vpop.f32.mrf.mxu1 }
 0x306   : > { %v2119_v31 = vpop.f32.mrf.mxu1  ;;  %v2160_v21 = vpop.f32.mrf.mxu0 }
 0x307   : > { %2406 = vst.msk [vmem:[%s3767_s29 + $0x98] sm:$0xff] %vm465_vm1, %v2119_v31  ;;  %2407 = vst.msk [vmem:[%s3767_s29 + $0xa0] sm:$0xff] %vm465_vm1, %v2160_v21 }
 0x308   : > { %v2827_v41 = vpop.f32.mrf.mxu1  ;;  %v2832_v25 = vpop.f32.mrf.mxu0 }
 0x30a   : > { %v2163_v47 = vpop.f32.mrf.mxu0  ;;  %v2204_v33 = vpop.f32.mrf.mxu1 }
 0x30b   : > { %2408 = vst.msk [vmem:[%s3767_s29 + $0xa8] sm:$0xff] %vm465_vm1, %v2163_v47  ;;  %2409 = vst.msk [vmem:[%s3767_s29 + $0xb0] sm:$0xff] %vm465_vm1, %v2204_v33 }
 0x30c   : > { %v2833_v26 = vpop.f32.mrf.mxu0  ;;  %v2838_v37 = vpop.f32.mrf.mxu1 }
 0x30e   : > { %v2207_v42 = vpop.f32.mrf.mxu1  ;;  %v2248_v40 = vpop.f32.mrf.mxu0 }
 0x30f   : > { %2410 = vst.msk [vmem:[%s3767_s29 + $0xb8] sm:$0xff] %vm465_vm1, %v2207_v42  ;;  %2411 = vst.msk [vmem:[%s3767_s29 + $0xc0] sm:$0xff] %vm465_vm1, %v2248_v40 }
 0x310   : > { %v2839_v32 = vpop.f32.mrf.mxu1  ;;  %v2844_v49 = vpop.f32.mrf.mxu0 }
 0x312   : > { %v2251_v54 = vpop.f32.mrf.mxu0  ;;  %v2292_v5 = vpop.f32.mrf.mxu1 }
 0x313   : > { %2412 = vst.msk [vmem:[%s3767_s29 + $0xc8] sm:$0xff] %vm465_vm1, %v2251_v54  ;;  %2413 = vst.msk [vmem:[%s3767_s29 + $0xd0] sm:$0xff] %vm465_vm1, %v2292_v5 }
 0x314   : > { %v2845_v36 = vpop.f32.mrf.mxu0  ;;  %v2850_v6 = vpop.f32.mrf.mxu1 }
 0x316   : > { %v2295_v46 = vpop.f32.mrf.mxu1  ;;  %v2336_v59 = vpop.f32.mrf.mxu0 }
 0x317   : > { %2414 = vst.msk [vmem:[%s3767_s29 + $0xd8] sm:$0xff] %vm465_vm1, %v2295_v46  ;;  %2415 = vst.msk [vmem:[%s3767_s29 + $0xe0] sm:$0xff] %vm465_vm1, %v2336_v59 }
 0x318   : > { %v2851_v43 = vpop.f32.mrf.mxu1  ;;  %v2856_v45 = vpop.f32.mrf.mxu0 }
 0x31a   : > { %v2339_v44 = vpop.f32.mrf.mxu0  ;;  %v2380_v58 = vpop.f32.mrf.mxu1 }
 0x31b   : > { %2416 = vst.msk [vmem:[%s3767_s29 + $0xe8] sm:$0xff] %vm465_vm1, %v2339_v44  ;;  %2417 = vst.msk [vmem:[%s3767_s29 + $0xf0] sm:$0xff] %vm465_vm1, %v2380_v58 }
 0x31c   : > { %v2857_v22 = vpop.f32.mrf.mxu0  ;;  %v2862_v55 = vpop.f32.mrf.mxu1 }
 0x31e   : > { %v2383_v48 = vpop.f32.mrf.mxu1 }
 0x31f   : > { %2418 = vst.msk [vmem:[%s3767_s29 + $0xf8] sm:$0xff] %vm465_vm1, %v2383_v48 }
 0x320   : > { %v2863_v8 = vpop.f32.mrf.mxu1 }
 0x321 PF: > { %s14_s17 = sadd.s32 1, %s3040_s17   ;;  %s3847_s15 = smov %s3036_s16 }
 0x322   : > { %p11_p5 = scmp.ge.s32.totalorder %s14_s17, 4   ;;  %s3848_s16 = smov %s3850_s18 }
 0x324   :  { %13 = sbr.rel (!%p11_p5) target bundleno = 2 (0x2), region = 72 }

// kernel: _lambda_.8
= control target key start
LH: loop header
LB: loop body
LE: loop exit
PB: predicated region body
PF: predicated region fallthrough
CT: control target
= control target key end

     0   :  { %vm92_vm0 = vcmask 261120   ;;  %s2503_s2 = inlined_call_operand.vmem [shape: bf16[32,32], index: 2, kind: input, shape index: {}]   ;;  %s2504_s0 = inlined_call_operand.vmem [shape: f32[128,32], index: 0, kind: input, shape index: {}]   ;;  %s2505_s1 = inlined_call_operand.vmem [shape: f32[128,32], index: 1, kind: input, shape index: {}]   ;;  %s2506_s3 = inlined_call_operand.vmem [shape: f32[1,32], index: 3, kind: input, shape index: {}]   ;;  %s2507_s6 = inlined_call_operand.vmem [shape: bf16[32,128], index: 6, kind: input, shape index: {}]   ;;  %s2508_s4 = inlined_call_operand.vmem [shape: f32[1,32], index: 4, kind: input, shape index: {}]   ;;  %s2509_s5 = inlined_call_operand.vmem [shape: f32[1,32], index: 5, kind: input, shape index: {}]   ;;  %s2510_s8 = inlined_call_operand.vmem [shape: bf16[128,32], index: 8, kind: input, shape index: {}]   ;;  %s2511_s7 = inlined_call_operand.vmem [shape: f32[1,128], index: 7, kind: input, shape index: {}]   ;;  %s2512_s9 = inlined_call_operand.vmem [shape: f32[1,32], index: 9, kind: input, shape index: {}]   ;;  %s2513_s10 = inlined_call_operand.vmem [shape: f32[128,32], index: 10, kind: output, shape index: {}]  }
   0x1   :  { %v1462_v0 = vld [vmem:[%s2503_s2 + $0x8] sm:$0xff]   ;;  %v1463_v1 = vld [vmem:[%s2503_s2] sm:$0xff]   ;;  %v38_v5 = vld [vmem:[%s2504_s0 + $0x10] sm:$0xff] }
   0x2   :  { %1373 = vmatprep.subr.bf16.mxu0 %v1462_v0  ;;  %v36_v2 = vld [vmem:[%s2504_s0] sm:$0xff]  ;;  %v37_v3 = vld [vmem:[%s2504_s0 + $0x8] sm:$0xff]  ;;  %v39_v6 = vld [vmem:[%s2504_s0 + $0x18] sm:$0xff] }
   0x3   :  { %1374 = vmatpush3.bf16.msra.mxu0 %v1462_v0  ;;  %v68_v4 = vpack.c.bf16 %v37_v3, %v36_v2  ;;  %v40_v7 = vld [vmem:[%s2504_s0 + $0x20] sm:$0xff]  ;;  %v41_v8 = vld [vmem:[%s2504_s0 + $0x28] sm:$0xff]  ;;  %v69_v9 = vpack.c.bf16 %v39_v6, %v38_v5  ;;  %v42_v11 = vld [vmem:[%s2504_s0 + $0x30] sm:$0xff] }
   0x4   :  { %1375 = vmatprep.subr.bf16.mxu0 %v1463_v1  ;;  %v70_v10 = vpack.c.bf16 %v41_v8, %v40_v7  ;;  %v43_v12 = vld [vmem:[%s2504_s0 + $0x38] sm:$0xff]  ;;  %v44_v13 = vld [vmem:[%s2504_s0 + $0x40] sm:$0xff]  ;;  %v45_v14 = vld [vmem:[%s2504_s0 + $0x48] sm:$0xff] }
   0x5   :  { %1377 = vmatprep.mubr.msk.bf16.mxu0 %vm92_vm0, %v68_v4  ;;  %v71_v15 = vpack.c.bf16 %v43_v12, %v42_v11  ;;  %v72_v16 = vpack.c.bf16 %v45_v14, %v44_v13  ;;  %v46_v17 = vld [vmem:[%s2504_s0 + $0x50] sm:$0xff]  ;;  %v47_v18 = vld [vmem:[%s2504_s0 + $0x58] sm:$0xff]  ;;  %v48_v19 = vld [vmem:[%s2504_s0 + $0x60] sm:$0xff] }
   0x6   :  { %v49_v20 = vld [vmem:[%s2504_s0 + $0x68] sm:$0xff]  ;;  %v73_v21 = vpack.c.bf16 %v47_v18, %v46_v17  ;;  %v50_v23 = vld [vmem:[%s2504_s0 + $0x70] sm:$0xff]  ;;  %v51_v24 = vld [vmem:[%s2504_s0 + $0x78] sm:$0xff] }
   0x7   :  { %1376 = vmatpush3.bf16.msra.mxu0 %v1463_v1  ;;  %v74_v22 = vpack.c.bf16 %v49_v20, %v48_v19  ;;  %v75_v25 = vpack.c.bf16 %v51_v24, %v50_v23  ;;  %v54_v26 = vld [vmem:[%s2505_s1 + $0x10] sm:$0xff]  ;;  %v1694_v28 = vld [vmem:[%s2506_s3] ss:$0 sm:$0xff]  ;;  %v55_v32 = vld [vmem:[%s2505_s1 + $0x18] sm:$0xff] }
   0x8   :  { %v52_v29 = vld [vmem:[%s2505_s1] sm:$0xff]  ;;  %v53_v36 = vld [vmem:[%s2505_s1 + $0x8] sm:$0xff]  ;;  %v58_v44 = vld [vmem:[%s2505_s1 + $0x30] sm:$0xff] }
   0x9   :  { %v56_v46 = vld [vmem:[%s2505_s1 + $0x20] sm:$0xff]  ;;  %v59_v53 = vld [vmem:[%s2505_s1 + $0x38] sm:$0xff]  ;;  %v57_v55 = vld [vmem:[%s2505_s1 + $0x28] sm:$0xff] }
   0xa   :  { %1378 = vmatmul.mubr.msk.bf16.vlgmr.msra.gmra.mxu0 %vm92_vm0, %v69_v9  ;;  %v62_v62 = vld [vmem:[%s2505_s1 + $0x50] sm:$0xff]  ;;  %v60_v0 = vld [vmem:[%s2505_s1 + $0x40] sm:$0xff]  ;;  %v63_v8 = vld [vmem:[%s2505_s1 + $0x58] sm:$0xff] }
   0xb   :  { %1381 = vmatprep.mubr.msk.bf16.mxu0 %vm92_vm0, %v70_v10  ;;  %v61_v10 = vld [vmem:[%s2505_s1 + $0x48] sm:$0xff]  ;;  %v66_v18 = vld [vmem:[%s2505_s1 + $0x70] sm:$0xff]  ;;  %v64_v20 = vld [vmem:[%s2505_s1 + $0x60] sm:$0xff] }
  0x12   :  { %1382 = vmatmul.mubr.msk.bf16.gmra.mxu0 %vm92_vm0, %v71_v15 }
  0x13   :  { %1385 = vmatprep.mubr.msk.bf16.mxu0 %vm92_vm0, %v72_v16 }
  0x1a   :  { %1386 = vmatmul.mubr.msk.bf16.gmra.mxu0 %vm92_vm0, %v73_v21 }
  0x1b   :  { %1389 = vmatprep.mubr.msk.bf16.mxu0 %vm92_vm0, %v74_v22 }
  0x22   :  { %1390 = vmatmul.mubr.msk.bf16.gmra.mxu0 %vm92_vm0, %v75_v25 }
  0xca   :  { %v1379_v27 = vpop.f32.mrf.mxu0 }
  0xcb   :  { %v216_v30 = vadd.f32 %v1379_v27, %v54_v26 }
  0xcc   :  { %v151_v31 = vpop.f32.mrf.mxu0 }
  0xcd   :  { %v1703_v33 = vadd.f32 %v1694_v28, %v216_v30  ;;  %v214_v34 = vadd.f32 %v151_v31, %v52_v29  ;;  %v67_v29 = vld [vmem:[%s2505_s1 + $0x78] sm:$0xff]  ;;  %v65_v31 = vld [vmem:[%s2505_s1 + $0x68] sm:$0xff] }
  0xce   :  { %v1380_v35 = vpop.f32.mrf.mxu0 }
  0xcf   :  { %v1709_v37 = vadd.f32 %v1694_v28, %v214_v34  ;;  %v217_v38 = vadd.f32 %v1380_v35, %v55_v32  ;;  %v259_v39 = vsel %vm92_vm0, %v1703_v33, 0.0 }
  0xd0   :  { %260 = vadd.xlane.f32.xlu1 %v259_v39  ;;  %v154_v40 = vpop.f32.mrf.mxu0 }
  0xd1   :  { %v1714_v41 = vadd.f32 %v1694_v28, %v217_v38  ;;  %v215_v42 = vadd.f32 %v154_v40, %v53_v36  ;;  %v253_v43 = vsel %vm92_vm0, %v1709_v37, 0.0 }
  0xd2   :  { %254 = vadd.xlane.f32.xlu0 %v253_v43  ;;  %v1383_v45 = vpop.f32.mrf.mxu0 }
  0xd3   :  { %v1725_v47 = vadd.f32 %v1694_v28, %v215_v42  ;;  %v262_v48 = vsel %vm92_vm0, %v1714_v41, 0.0  ;;  %v220_v49 = vadd.f32 %v1383_v45, %v58_v44 }
  0xd4   :  { %263 = vadd.xlane.f32.xlu1 %v262_v48  ;;  %v167_v50 = vpop.f32.mrf.mxu0 }
  0xd5   :  { %v218_v51 = vadd.f32 %v167_v50, %v56_v46  ;;  %v256_v52 = vsel %vm92_vm0, %v1725_v47, 0.0  ;;  %v1741_v57 = vadd.f32 %v1694_v28, %v220_v49 }
  0xd6   :  { %257 = vadd.xlane.f32.xlu0 %v256_v52  ;;  %v1384_v54 = vpop.f32.mrf.mxu0 }
  0xd7   :  { %v1738_v56 = vadd.f32 %v1694_v28, %v218_v51  ;;  %v221_v59 = vadd.f32 %v1384_v54, %v59_v53  ;;  %v271_v3 = vsel %vm92_vm0, %v1741_v57, 0.0 }
  0xd8   :  { %v170_v58 = vpop.f32.mrf.mxu0 }
  0xd9   :  { %v219_v60 = vadd.f32 %v170_v58, %v57_v55  ;;  %v265_v61 = vsel %vm92_vm0, %v1738_v56, 0.0  ;;  %v1757_v4 = vadd.f32 %v1694_v28, %v221_v59 }
  0xda   :  { %266 = vadd.xlane.f32.xlu0 %v265_v61  ;;  %v1387_v63 = vpop.f32.mrf.mxu0 }
  0xdb   :  { %v1752_v1 = vadd.f32 %v1694_v28, %v219_v60  ;;  %v224_v5 = vadd.f32 %v1387_v63, %v62_v62  ;;  %v274_v16 = vsel %vm92_vm0, %v1757_v4, 0.0 }
  0xdc   :  { %v183_v2 = vpop.f32.mrf.mxu0 }
  0xdd   :  { %2525 = vst [vmem:[#allocation2_spill] sm:$0xff] %v1752_v1  ;;  %v222_v6 = vadd.f32 %v183_v2, %v60_v0  ;;  %v268_v7 = vsel %vm92_vm0, %v1752_v1, 0.0  ;;  %v1771_v14 = vadd.f32 %v1694_v28, %v224_v5 }
  0xde   :  { %272 = vadd.xlane.f32.xlu0 %v271_v3  ;;  %269 = vadd.xlane.f32.xlu1 %v268_v7  ;;  %v1388_v9 = vpop.f32.mrf.mxu0 }
  0xdf   :  { %v1768_v11 = vadd.f32 %v1694_v28, %v222_v6  ;;  %v225_v12 = vadd.f32 %v1388_v9, %v63_v8  ;;  %2527 = vst [vmem:[#allocation4_spill] sm:$0xff] %v1771_v14  ;;  %v283_v26 = vsel %vm92_vm0, %v1771_v14, 0.0 }
  0xe0   :  { %v186_v13 = vpop.f32.mrf.mxu0 }
  0xe1   :  { %2526 = vst [vmem:[#allocation3_spill] sm:$0xff] %v1768_v11  ;;  %v223_v15 = vadd.f32 %v186_v13, %v61_v10  ;;  %v277_v17 = vsel %vm92_vm0, %v1768_v11, 0.0  ;;  %v1787_v22 = vadd.f32 %v1694_v28, %v225_v12 }
  0xe2   :  { %275 = vadd.xlane.f32.xlu1 %v274_v16  ;;  %278 = vadd.xlane.f32.xlu0 %v277_v17  ;;  %v1391_v19 = vpop.f32.mrf.mxu0 }
  0xe3   :  { %v1784_v21 = vadd.f32 %v1694_v28, %v223_v15  ;;  %2529 = vst [vmem:[#allocation6_spill] sm:$0xff] %v1787_v22  ;;  %v228_v24 = vadd.f32 %v1391_v19, %v66_v18  ;;  %v286_v35 = vsel %vm92_vm0, %v1787_v22, 0.0 }
  0xe4   :  { %v199_v23 = vpop.f32.mrf.mxu0 }
  0xe5   :  { %2528 = vst [vmem:[#allocation5_spill] sm:$0xff] %v1784_v21  ;;  %v226_v25 = vadd.f32 %v199_v23, %v64_v20  ;;  %v280_v27 = vsel %vm92_vm0, %v1784_v21, 0.0  ;;  %v1805_v36 = vadd.f32 %v1694_v28, %v228_v24 }
  0xe6   :  { %284 = vadd.xlane.f32.xlu0 %v283_v26  ;;  %281 = vadd.xlane.f32.xlu1 %v280_v27  ;;  %v1392_v30 = vpop.f32.mrf.mxu0 }
  0xe7   :  { %v1800_v32 = vadd.f32 %v1694_v28, %v226_v25  ;;  %2531 = vst [vmem:[#allocation8_spill] sm:$0xff] %v1805_v36  ;;  %v229_v38 = vadd.f32 %v1392_v30, %v67_v29  ;;  %v295_v44 = vsel %vm92_vm0, %v1805_v36, 0.0 }
  0xe8   :  { %v202_v34 = vpop.f32.mrf.mxu0 }
  0xe9   :  { %2530 = vst [vmem:[#allocation7_spill] sm:$0xff] %v1800_v32  ;;  %v227_v39 = vadd.f32 %v202_v34, %v65_v31  ;;  %v289_v40 = vsel %vm92_vm0, %v1800_v32, 0.0  ;;  %v1813_v43 = vadd.f32 %v1694_v28, %v229_v38 }
  0xea   :  { %287 = vadd.xlane.f32.xlu1 %v286_v35  ;;  %290 = vadd.xlane.f32.xlu0 %v289_v40 }
  0xeb   :  { %v1810_v42 = vadd.f32 %v1694_v28, %v227_v39  ;;  %2533 = vst [vmem:[#allocation10_spill] sm:$0xff] %v1813_v43  ;;  %v298_v46 = vsel %vm92_vm0, %v1813_v43, 0.0 }
  0xed   :  { %2532 = vst [vmem:[#allocation9_spill] sm:$0xff] %v1810_v42  ;;  %v292_v45 = vsel %vm92_vm0, %v1810_v42, 0.0 }
  0xee   :  { %296 = vadd.xlane.f32.xlu0 %v295_v44  ;;  %293 = vadd.xlane.f32.xlu1 %v292_v45 }
  0xf2   :  { %299 = vadd.xlane.f32.xlu1 %v298_v46 }
 0x159   :  { %v261_v48 = vpop.xlane.xlu1 %260 }
 0x15a   :  { %v304_v49 = vmul.f32 0.03125, %v261_v48 }
 0x15b   :  { %v255_v50 = vpop.xlane.xlu0 %254 }
 0x15c   :  { %v302_v51 = vmul.f32 0.03125, %v255_v50  ;;  %v1822_v28 = vsub.f32 %v1703_v33, %v304_v49 }
 0x15d   :  { %v264_v52 = vpop.xlane.xlu1 %263 }
 0x15e   :  { %v1825_v53 = vsub.f32 %v1709_v37, %v302_v51  ;;  %v305_v54 = vmul.f32 0.03125, %v264_v52  ;;  %v336_v63 = vmul.f32 %v1822_v28, %v1822_v28 }
 0x15f   :  { %v258_v55 = vpop.xlane.xlu0 %257 }
 0x160   :  { %v303_v58 = vmul.f32 0.03125, %v258_v55  ;;  %v334_v59 = vmul.f32 %v1825_v53, %v1825_v53  ;;  %v1830_v60 = vsub.f32 %v1714_v41, %v305_v54  ;;  %v356_v6 = vsel %vm92_vm0, %v336_v63, 0.0 }
 0x162   :  { %v1833_v61 = vsub.f32 %v1725_v47, %v303_v58  ;;  %v350_v62 = vsel %vm92_vm0, %v334_v59, 0.0  ;;  %v337_v8 = vmul.f32 %v1830_v60, %v1830_v60 }
 0x163   :  { %v267_v0 = vpop.xlane.xlu0 %266  ;;  %351 = vadd.xlane.f32.xlu0 %v350_v62 }
 0x164   :  { %v306_v2 = vmul.f32 0.03125, %v267_v0  ;;  %v335_v3 = vmul.f32 %v1833_v61, %v1833_v61  ;;  %v359_v19 = vsel %vm92_vm0, %v337_v8, 0.0 }
 0x166   :  { %v1841_v5 = vsub.f32 %v1738_v56, %v306_v2  ;;  %v353_v7 = vsel %vm92_vm0, %v335_v3, 0.0 }
 0x167   :  { %v273_v9 = vpop.xlane.xlu0 %272  ;;  %v270_v10 = vpop.xlane.xlu1 %269  ;;  %357 = vadd.xlane.f32.xlu0 %v356_v6  ;;  %354 = vadd.xlane.f32.xlu1 %v353_v7 }
 0x168   :  { %v308_v12 = vmul.f32 0.03125, %v273_v9  ;;  %v307_v13 = vmul.f32 0.03125, %v270_v10  ;;  %v338_v15 = vmul.f32 %v1841_v5, %v1841_v5 }
 0x16a   :  { %v1850_v16 = vsub.f32 %v1741_v57, %v308_v12  ;;  %v1853_v17 = vsub.f32 %v1752_v1, %v307_v13  ;;  %v362_v18 = vsel %vm92_vm0, %v338_v15, 0.0 }
 0x16b   :  { %v276_v20 = vpop.xlane.xlu1 %275  ;;  %v279_v23 = vpop.xlane.xlu0 %278  ;;  %363 = vadd.xlane.f32.xlu0 %v362_v18  ;;  %360 = vadd.xlane.f32.xlu1 %v359_v19 }
 0x16c   :  { %v309_v24 = vmul.f32 0.03125, %v276_v20  ;;  %v310_v25 = vmul.f32 0.03125, %v279_v23  ;;  %v340_v26 = vmul.f32 %v1850_v16, %v1850_v16  ;;  %v339_v27 = vmul.f32 %v1853_v17, %v1853_v17 }
 0x16e   :  { %v1862_v29 = vsub.f32 %v1757_v4, %v309_v24  ;;  %v1865_v30 = vsub.f32 %v1768_v11, %v310_v25  ;;  %v368_v31 = vsel %vm92_vm0, %v340_v26, 0.0  ;;  %v365_v34 = vsel %vm92_vm0, %v339_v27, 0.0 }
 0x16f   :  { %v285_v35 = vpop.xlane.xlu0 %284  ;;  %v282_v38 = vpop.xlane.xlu1 %281  ;;  %369 = vadd.xlane.f32.xlu0 %v368_v31  ;;  %366 = vadd.xlane.f32.xlu1 %v365_v34 }
 0x170   :  { %v312_v39 = vmul.f32 0.03125, %v285_v35  ;;  %v311_v40 = vmul.f32 0.03125, %v282_v38  ;;  %v342_v44 = vmul.f32 %v1865_v30, %v1865_v30  ;;  %v341_v45 = vmul.f32 %v1862_v29, %v1862_v29  ;;  %v1464_v35 = vld [vmem:[%s2507_s6 + $0x8] sm:$0xff]   ;;  %v1465_v38 = vld [vmem:[%s2507_s6] sm:$0xff]  }
 0x171   :  { %1393 = vmatprep.subr.bf16.mxu1 %v1464_v35 }
 0x172   :  { %v1874_v46 = vsub.f32 %v1771_v14, %v312_v39  ;;  %v1877_v48 = vsub.f32 %v1784_v21, %v311_v40  ;;  %v374_v49 = vsel %vm92_vm0, %v342_v44, 0.0  ;;  %v371_v50 = vsel %vm92_vm0, %v341_v45, 0.0  ;;  %1394 = vmatpush3.bf16.msra.mxu1 %v1464_v35 }
 0x173   :  { %v288_v51 = vpop.xlane.xlu1 %287  ;;  %375 = vadd.xlane.f32.xlu0 %v374_v49  ;;  %v291_v52 = vpop.xlane.xlu0 %290  ;;  %372 = vadd.xlane.f32.xlu1 %v371_v50 }
 0x174   :  { %v313_v54 = vmul.f32 0.03125, %v288_v51  ;;  %v314_v55 = vmul.f32 0.03125, %v291_v52  ;;  %v344_v58 = vmul.f32 %v1874_v46, %v1874_v46  ;;  %v343_v59 = vmul.f32 %v1877_v48, %v1877_v48  ;;  %1395 = vmatprep.subr.bf16.mxu1 %v1465_v38 }
 0x176   :  { %v1886_v62 = vsub.f32 %v1787_v22, %v313_v54  ;;  %v1889_v63 = vsub.f32 %v1800_v32, %v314_v55  ;;  %v380_v0 = vsel %vm92_vm0, %v344_v58, 0.0  ;;  %v377_v2 = vsel %vm92_vm0, %v343_v59, 0.0  ;;  %1396 = vmatpush3.bf16.msra.mxu1 %v1465_v38 }
 0x177   :  { %381 = vadd.xlane.f32.xlu0 %v380_v0  ;;  %v297_v3 = vpop.xlane.xlu0 %296  ;;  %378 = vadd.xlane.f32.xlu1 %v377_v2  ;;  %v294_v6 = vpop.xlane.xlu1 %293 }
 0x178   :  { %v316_v7 = vmul.f32 0.03125, %v297_v3  ;;  %v315_v8 = vmul.f32 0.03125, %v294_v6  ;;  %v346_v9 = vmul.f32 %v1889_v63, %v1889_v63  ;;  %v345_v10 = vmul.f32 %v1886_v62, %v1886_v62 }
 0x17a   :  { %v1898_v12 = vsub.f32 %v1805_v36, %v316_v7  ;;  %v1901_v13 = vsub.f32 %v1810_v42, %v315_v8  ;;  %v386_v15 = vsel %vm92_vm0, %v346_v9, 0.0  ;;  %v383_v18 = vsel %vm92_vm0, %v345_v10, 0.0 }
 0x17b   :  { %387 = vadd.xlane.f32.xlu0 %v386_v15  ;;  %384 = vadd.xlane.f32.xlu1 %v383_v18  ;;  %v300_v19 = vpop.xlane.xlu1 %299  ;;  %v2534_v42 = vmov -1.0  }
 0x17c   :  { %v317_v20 = vmul.f32 0.03125, %v300_v19  ;;  %v348_v23 = vmul.f32 %v1898_v12, %v1898_v12  ;;  %v347_v24 = vmul.f32 %v1901_v13, %v1901_v13 }
 0x17e   :  { %v1910_v25 = vsub.f32 %v1813_v43, %v317_v20  ;;  %v392_v26 = vsel %vm92_vm0, %v348_v23, 0.0  ;;  %v389_v27 = vsel %vm92_vm0, %v347_v24, 0.0 }
 0x17f   :  { %393 = vadd.xlane.f32.xlu0 %v392_v26  ;;  %390 = vadd.xlane.f32.xlu1 %v389_v27 }
 0x180   :  { %v349_v31 = vmul.f32 %v1910_v25, %v1910_v25 }
 0x182   :  { %v395_v34 = vsel %vm92_vm0, %v349_v31, 0.0 }
 0x183   :  { %396 = vadd.xlane.f32.xlu1 %v395_v34 }
 0x1ec   :  { %v352_v39 = vpop.xlane.xlu0 %351 }
 0x1ed   :  { %v398_v40 = vmul.f32 0.03125, %v352_v39 }
 0x1ef   :  { %v414_v44 = vadd.f32 1e-05, %v398_v40  ;;  %v1927_v40 = vld [vmem:[%s2508_s4] ss:$0 sm:$0xff] }
 0x1f0   :  { %v358_v45 = vpop.xlane.xlu0 %357  ;;  %v355_v49 = vpop.xlane.xlu1 %354 }
 0x1f1   :  { %1474 = vrsqrt.f32 %v414_v44  ;;  %v400_v50 = vmul.f32 0.03125, %v358_v45  ;;  %v399_v51 = vmul.f32 0.03125, %v355_v49 }
 0x1f3   :  { %v416_v52 = vadd.f32 1e-05, %v400_v50  ;;  %v415_v54 = vadd.f32 1e-05, %v399_v51 }
 0x1f4   :  { %v364_v55 = vpop.xlane.xlu0 %363  ;;  %v361_v58 = vpop.xlane.xlu1 %360 }
 0x1f5   :  { %1476 = vrsqrt.f32 %v416_v52  ;;  %v402_v59 = vmul.f32 0.03125, %v364_v55  ;;  %v401_v0 = vmul.f32 0.03125, %v361_v58 }
 0x1f6   :  { %1478 = vrsqrt.f32 %v415_v54 }
 0x1f7   :  { %v418_v2 = vadd.f32 1e-05, %v402_v59  ;;  %v417_v3 = vadd.f32 1e-05, %v401_v0  ;;  %v1935_v0 = vld [vmem:[%s2509_s5] ss:$0 sm:$0xff] }
 0x1f8   :  { %v370_v6 = vpop.xlane.xlu0 %369  ;;  %v367_v7 = vpop.xlane.xlu1 %366 }
 0x1f9   :  { %1480 = vrsqrt.f32 %v418_v2  ;;  %v404_v8 = vmul.f32 0.03125, %v370_v6  ;;  %v403_v9 = vmul.f32 0.03125, %v367_v7 }
 0x1fa   :  { %1482 = vrsqrt.f32 %v417_v3 }
 0x1fb   :  { %v420_v10 = vadd.f32 1e-05, %v404_v8  ;;  %v419_v15 = vadd.f32 1e-05, %v403_v9 }
 0x1fc   :  { %v376_v18 = vpop.xlane.xlu0 %375  ;;  %v373_v19 = vpop.xlane.xlu1 %372 }
 0x1fd   :  { %1484 = vrsqrt.f32 %v420_v10  ;;  %v406_v20 = vmul.f32 0.03125, %v376_v18  ;;  %v405_v23 = vmul.f32 0.03125, %v373_v19 }
 0x1fe   :  { %v1475_v24 = vpop.eup %1474  ;;  %1486 = vrsqrt.f32 %v419_v15 }
 0x1ff   :  { %v422_v26 = vadd.f32 1e-05, %v406_v20  ;;  %v421_v27 = vadd.f32 1e-05, %v405_v23  ;;  %v446_v35 = vmul.f32 %v1475_v24, %v1825_v53 }
 0x200   :  { %v382_v31 = vpop.xlane.xlu0 %381  ;;  %v379_v34 = vpop.xlane.xlu1 %378 }
 0x201   :  { %1488 = vrsqrt.f32 %v422_v26  ;;  %v408_v38 = vmul.f32 0.03125, %v382_v31  ;;  %v407_v39 = vmul.f32 0.03125, %v379_v34  ;;  %v469_v53 = vmul.f32 %v1927_v40, %v446_v35 }
 0x202   :  { %v1477_v44 = vpop.eup %1476  ;;  %1490 = vrsqrt.f32 %v421_v27 }
 0x203   :  { %v1479_v45 = vpop.eup %1478  ;;  %v424_v49 = vadd.f32 1e-05, %v408_v38  ;;  %v423_v50 = vadd.f32 1e-05, %v407_v39  ;;  %v448_v51 = vmul.f32 %v1477_v44, %v1822_v28  ;;  %v492_v10 = vadd.f32 %v1935_v0, %v469_v53 }
 0x204   :  { %v388_v52 = vpop.xlane.xlu0 %387  ;;  %v385_v54 = vpop.xlane.xlu1 %384  ;;  %v447_v55 = vmul.f32 %v1479_v45, %v1833_v61 }
 0x205   :  { %1492 = vrsqrt.f32 %v424_v49  ;;  %v410_v58 = vmul.f32 0.03125, %v388_v52  ;;  %v409_v59 = vmul.f32 0.03125, %v385_v54  ;;  %v471_v8 = vmul.f32 %v1927_v40, %v448_v51 }
 0x206   :  { %v1481_v2 = vpop.eup %1480  ;;  %1494 = vrsqrt.f32 %v423_v50  ;;  %v470_v3 = vmul.f32 %v1927_v40, %v447_v55 }
 0x207   :  { %v1483_v6 = vpop.eup %1482  ;;  %v426_v28 = vadd.f32 1e-05, %v410_v58  ;;  %v425_v7 = vadd.f32 1e-05, %v409_v59  ;;  %v450_v19 = vmul.f32 %v1481_v2, %v1841_v5  ;;  %v494_v38 = vadd.f32 %v1935_v0, %v471_v8 }
 0x208   :  { %v394_v61 = vpop.xlane.xlu0 %393  ;;  %v391_v9 = vpop.xlane.xlu1 %390  ;;  %v493_v15 = vadd.f32 %v1935_v0, %v470_v3  ;;  %v449_v18 = vmul.f32 %v1483_v6, %v1830_v60 }
 0x209   :  { %1496 = vrsqrt.f32 %v426_v28  ;;  %v412_v20 = vmul.f32 0.03125, %v394_v61  ;;  %v411_v23 = vmul.f32 0.03125, %v391_v9  ;;  %v473_v44 = vmul.f32 %v1927_v40, %v450_v19 }
 0x20a   :  { %v1485_v24 = vpop.eup %1484  ;;  %1498 = vrsqrt.f32 %v425_v7  ;;  %v508_v26 = vpack.c.bf16 %v493_v15, %v492_v10  ;;  %v472_v27 = vmul.f32 %v1927_v40, %v449_v18 }
 0x20b   :  { %v1487_v31 = vpop.eup %1486  ;;  %v428_v34 = vadd.f32 1e-05, %v412_v20  ;;  %v427_v35 = vadd.f32 1e-05, %v411_v23  ;;  %v452_v45 = vmul.f32 %v1485_v24, %v1850_v16  ;;  %v496_v58 = vadd.f32 %v1935_v0, %v473_v44 }
 0x20c   :  { %1397 = vmatprep.mubr.msk.bf16.mxu1 %vm92_vm0, %v508_v26  ;;  %v397_v39 = vpop.xlane.xlu1 %396  ;;  %v495_v60 = vadd.f32 %v1935_v0, %v472_v27  ;;  %v451_v5 = vmul.f32 %v1487_v31, %v1853_v17 }
 0x20d   :  { %1500 = vrsqrt.f32 %v428_v34  ;;  %v413_v49 = vmul.f32 0.03125, %v397_v39  ;;  %v475_v16 = vmul.f32 %v1927_v40, %v452_v45 }
 0x20e   :  { %v1489_v50 = vpop.eup %1488  ;;  %1502 = vrsqrt.f32 %v427_v35  ;;  %v509_v51 = vpack.c.bf16 %v495_v60, %v494_v38  ;;  %v474_v52 = vmul.f32 %v1927_v40, %v451_v5 }
 0x20f   :  { %v1491_v54 = vpop.eup %1490  ;;  %v429_v55 = vadd.f32 1e-05, %v413_v49  ;;  %v454_v53 = vmul.f32 %v1489_v50, %v1865_v30  ;;  %v498_v30 = vadd.f32 %v1935_v0, %v475_v16  ;;  %v2016_v16 = vld [vmem:[%s2511_s7] ss:$0 sm:$0xff] }
 0x210   :  { %1398 = vmatmul.mubr.msk.bf16.vlgmr.msra.gmra.mxu1 %vm92_vm0, %v509_v51  ;;  %v497_v17 = vadd.f32 %v1935_v0, %v474_v52  ;;  %v453_v59 = vmul.f32 %v1491_v54, %v1862_v29 }
 0x211   :  { %1504 = vrsqrt.f32 %v429_v55  ;;  %v477_v7 = vmul.f32 %v1927_v40, %v454_v53  ;;  %v1469_v55 = vld [vmem:[%s2510_s8 + $0x20] sm:$0xff]   ;;  %v1470_v53 = vld [vmem:[%s2510_s8 + $0x18] sm:$0xff]  }
 0x212   :  { %v1493_v2 = vpop.eup %1492  ;;  %v510_v3 = vpack.c.bf16 %v497_v17, %v496_v58  ;;  %v476_v6 = vmul.f32 %v1927_v40, %v453_v59  ;;  %v1471_v58 = vld [vmem:[%s2510_s8 + $0x10] sm:$0xff]   ;;  %v1472_v17 = vld [vmem:[%s2510_s8 + $0x8] sm:$0xff]   ;;  %v1473_v59 = vld [vmem:[%s2510_s8] sm:$0xff]  }
 0x213   :  { %v1495_v28 = vpop.eup %1494  ;;  %v456_v29 = vmul.f32 %v1493_v2, %v1874_v46  ;;  %v500_v19 = vadd.f32 %v1935_v0, %v477_v7 }
 0x214   :  { %1401 = vmatprep.mubr.msk.bf16.mxu1 %vm92_vm0, %v510_v3  ;;  %v499_v8 = vadd.f32 %v1935_v0, %v476_v6  ;;  %v455_v61 = vmul.f32 %v1495_v28, %v1877_v48 }
 0x215   :  { %v479_v24 = vmul.f32 %v1927_v40, %v456_v29 }
 0x216   :  { %v1497_v9 = vpop.eup %1496  ;;  %v511_v10 = vpack.c.bf16 %v499_v8, %v498_v30  ;;  %v478_v15 = vmul.f32 %v1927_v40, %v455_v61 }
 0x217   :  { %v1499_v18 = vpop.eup %1498  ;;  %v458_v26 = vmul.f32 %v1497_v9, %v1889_v63  ;;  %v502_v35 = vadd.f32 %v1935_v0, %v479_v24 }
 0x218   :  { %1402 = vmatmul.mubr.msk.bf16.gmra.mxu1 %vm92_vm0, %v511_v10  ;;  %v501_v20 = vadd.f32 %v1935_v0, %v478_v15  ;;  %v457_v23 = vmul.f32 %v1499_v18, %v1886_v62 }
 0x219   :  { %v481_v62 = vmul.f32 %v1927_v40, %v458_v26 }
 0x21a   :  { %v1501_v48 = vpop.eup %1500  ;;  %v512_v27 = vpack.c.bf16 %v501_v20, %v500_v19  ;;  %v480_v46 = vmul.f32 %v1927_v40, %v457_v23 }
 0x21b   :  { %v1503_v31 = vpop.eup %1502  ;;  %v460_v34 = vmul.f32 %v1501_v48, %v1898_v12  ;;  %v504_v12 = vadd.f32 %v1935_v0, %v481_v62 }
 0x21c   :  { %1405 = vmatprep.mubr.msk.bf16.mxu1 %vm92_vm0, %v512_v27  ;;  %v503_v38 = vadd.f32 %v1935_v0, %v480_v46  ;;  %v459_v39 = vmul.f32 %v1503_v31, %v1901_v13 }
 0x21d   :  { %v483_v45 = vmul.f32 %v1927_v40, %v460_v34 }
 0x21e   :  { %v1505_v60 = vpop.eup %1504  ;;  %v513_v5 = vpack.c.bf16 %v503_v38, %v502_v35  ;;  %v482_v63 = vmul.f32 %v1927_v40, %v459_v39 }
 0x21f   :  { %v461_v44 = vmul.f32 %v1505_v60, %v1910_v25  ;;  %v506_v13 = vadd.f32 %v1935_v0, %v483_v45  ;;  %v1466_v25 = vld [vmem:[%s2510_s8 + $0x38] sm:$0xff]  }
 0x220   :  { %1406 = vmatmul.mubr.msk.bf16.gmra.mxu1 %vm92_vm0, %v513_v5  ;;  %v505_v49 = vadd.f32 %v1935_v0, %v482_v63  ;;  %1413 = vmatprep.subr.bf16.mxu0 %v1466_v25 }
 0x221   :  { %v484_v50 = vmul.f32 %v1927_v40, %v461_v44  ;;  %1445 = vmatprep.subr.bf16.mxu1 %v1466_v25  ;;  %1414 = vmatpush3.bf16.msra.mxu0 %v1466_v25  ;;  %v1467_v40 = vld [vmem:[%s2510_s8 + $0x30] sm:$0xff]  }
 0x222   :  { %v514_v51 = vpack.c.bf16 %v505_v49, %v504_v12  ;;  %1453 = vmatpush3.bf16.msra.mxu1 %v1466_v25  ;;  %1415 = vmatprep.subr.bf16.mxu0 %v1467_v40 }
 0x223   :  { %v507_v52 = vadd.f32 %v1935_v0, %v484_v50  ;;  %1446 = vmatprep.subr.bf16.mxu1 %v1467_v40  ;;  %v1468_v0 = vld [vmem:[%s2510_s8 + $0x28] sm:$0xff]  }
 0x224   :  { %1409 = vmatprep.mubr.msk.bf16.mxu1 %vm92_vm0, %v514_v51 }
 0x225   :  { %v515_v54 = vpack.c.bf16 %v507_v52, %v506_v13  ;;  %1416 = vmatpush3.bf16.msra.mxu0 %v1467_v40 }
 0x226   :  { %1454 = vmatpush3.bf16.msra.mxu1 %v1467_v40  ;;  %1417 = vmatprep.subr.bf16.mxu0 %v1468_v0 }
 0x227   :  { %1447 = vmatprep.subr.bf16.mxu1 %v1468_v0 }
 0x228   :  { %1410 = vmatmul.mubr.msk.bf16.gmra.mxu1 %vm92_vm0, %v515_v54 }
 0x229   :  { %1418 = vmatpush3.bf16.msra.mxu0 %v1468_v0 }
 0x22a   :  { %1455 = vmatpush3.bf16.msra.mxu1 %v1468_v0  ;;  %1419 = vmatprep.subr.bf16.mxu0 %v1469_v55 }
 0x22b   :  { %1448 = vmatprep.subr.bf16.mxu1 %v1469_v55 }
 0x22d   :  { %1420 = vmatpush3.bf16.msra.mxu0 %v1469_v55 }
 0x22e   :  { %1456 = vmatpush3.bf16.msra.mxu1 %v1469_v55  ;;  %1421 = vmatprep.subr.bf16.mxu0 %v1470_v53 }
 0x22f   :  { %1449 = vmatprep.subr.bf16.mxu1 %v1470_v53 }
 0x231   :  { %1422 = vmatpush3.bf16.msra.mxu0 %v1470_v53 }
 0x232   :  { %1457 = vmatpush3.bf16.msra.mxu1 %v1470_v53  ;;  %1423 = vmatprep.subr.bf16.mxu0 %v1471_v58 }
 0x233   :  { %1450 = vmatprep.subr.bf16.mxu1 %v1471_v58 }
 0x235   :  { %1424 = vmatpush3.bf16.msra.mxu0 %v1471_v58 }
 0x236   :  { %1458 = vmatpush3.bf16.msra.mxu1 %v1471_v58  ;;  %1425 = vmatprep.subr.bf16.mxu0 %v1472_v17 }
 0x237   :  { %1451 = vmatprep.subr.bf16.mxu1 %v1472_v17 }
 0x239   :  { %1426 = vmatpush3.bf16.msra.mxu0 %v1472_v17 }
 0x23a   :  { %1459 = vmatpush3.bf16.msra.mxu1 %v1472_v17  ;;  %1427 = vmatprep.subr.bf16.mxu0 %v1473_v59 }
 0x23b   :  { %1452 = vmatprep.subr.bf16.mxu1 %v1473_v59 }
 0x23d   :  { %1428 = vmatpush3.bf16.msra.mxu0 %v1473_v59 }
 0x23e   :  { %1460 = vmatpush3.bf16.msra.mxu1 %v1473_v59 }
 0x2d0   :  { %v1399_v2 = vpop.f32.mrf.mxu1 }
 0x2d1   :  { %v606_v3 = vadd.f32 %v1399_v2, %v2016_v16 }
 0x2d2   :  { %v597_v6 = vpop.f32.mrf.mxu1 }
 0x2d3   :  { %v2019_v28 = vmul.f32 0.70710677, %v606_v3  ;;  %v598_v7 = vadd.f32 %v2016_v16, %v597_v6  ;;  %v2091_v59 = vmul.f32 0.5, %v606_v3 }
 0x2d4   :  { %v1400_v30 = vpop.f32.mrf.mxu1 }
 0x2d5   :  { %v2023_v8 = vand.u32 2147483647, %v2019_v28  ;;  %v2025_v61 = vmul.f32 0.70710677, %v598_v7  ;;  %v2028_v29 = vadd.f32 %v1400_v30, %v2016_v16  ;;  %vm694_vm1 = vcmp.ge.f32.partialorder %v2019_v28, 0.0 }
 0x2d6   :  { %v600_v9 = vpop.f32.mrf.mxu1 }
 0x2d7   :  { %v742_v10 = vmul.f32 0.3275911, %v2023_v8  ;;  %v2032_v15 = vand.u32 2147483647, %v2025_v61  ;;  %v2035_v18 = vmul.f32 0.70710677, %v2028_v29  ;;  %v2038_v19 = vadd.f32 %v2016_v16, %v600_v9 }
 0x2d8   :  { %v1403_v20 = vpop.f32.mrf.mxu1  ;;  %v950_v2 = vsub.f32 0.0, %v2023_v8  ;;  %vm692_vm2 = vcmp.ge.f32.partialorder %v2025_v61, 0.0 }
 0x2d9   :  { %v758_v23 = vadd.f32 1.0, %v742_v10  ;;  %v740_v24 = vmul.f32 0.3275911, %v2032_v15  ;;  %v2042_v26 = vand.u32 2147483647, %v2035_v18  ;;  %v2052_v38 = vadd.f32 %v1403_v20, %v2016_v16 }
 0x2da   :  { %v2045_v48 = vmul.f32 0.70710677, %v2038_v19  ;;  %v613_v27 = vpop.f32.mrf.mxu1  ;;  %v948_v10 = vsub.f32 0.0, %v2032_v15  ;;  %vm695_vm3 = vcmp.ge.f32.partialorder %v2035_v18, 0.0 }
 0x2db   :  { %1506 = vrcp.f32 %v758_v23  ;;  %v756_v46 = vadd.f32 1.0, %v740_v24  ;;  %v743_v31 = vmul.f32 0.3275911, %v2042_v26  ;;  %v2056_v60 = vadd.f32 %v2016_v16, %v613_v27 }
 0x2dc   :  { %v2049_v34 = vand.u32 2147483647, %v2045_v48  ;;  %v1404_v39 = vpop.f32.mrf.mxu1  ;;  %v2059_v5 = vmul.f32 0.70710677, %v2052_v38  ;;  %v2101_v24 = vmul.f32 0.5, %v598_v7  ;;  %v2145_v18 = vsel %vm695_vm3, 1.0, %v2534_v42 }
 0x2dd   :  { %1508 = vrcp.f32 %v756_v46  ;;  %v759_v35 = vadd.f32 1.0, %v743_v31  ;;  %v2062_v44 = vmul.f32 0.70710677, %v2056_v60  ;;  %v2068_v12 = vadd.f32 %v1404_v39, %v2016_v16 }
 0x2de   :  { %v741_v62 = vmul.f32 0.3275911, %v2049_v34  ;;  %v2065_v45 = vand.u32 2147483647, %v2059_v5  ;;  %v616_v49 = vpop.f32.mrf.mxu1  ;;  %v2514_v46 = vmov -1.0   ;;  %v951_v39 = vsub.f32 0.0, %v2042_v26 }
 0x2df   :  { %1510 = vrcp.f32 %v759_v35  ;;  %v2072_v51 = vand.u32 2147483647, %v2062_v44  ;;  %v2075_v13 = vmul.f32 0.70710677, %v2068_v12  ;;  %v2078_v52 = vadd.f32 %v2016_v16, %v616_v49 }
 0x2e0   :  { %v757_v63 = vadd.f32 1.0, %v741_v62  ;;  %v746_v50 = vmul.f32 0.3275911, %v2065_v45  ;;  %v1407_v23 = vpop.f32.mrf.mxu1  ;;  %v2109_v31 = vsel %vm694_vm1, 1.0, %v2514_v46  ;;  %vm693_vm4 = vcmp.ge.f32.partialorder %v2045_v48, 0.0 }
 0x2e1   :  { %v744_v25 = vmul.f32 0.3275911, %v2072_v51  ;;  %v2082_v40 = vand.u32 2147483647, %v2075_v13  ;;  %v2085_v0 = vmul.f32 0.70710677, %v2078_v52  ;;  %v2115_v61 = vadd.f32 %v1407_v23, %v2016_v16 }
 0x2e2   :  { %1512 = vrcp.f32 %v757_v63  ;;  %v762_v54 = vadd.f32 1.0, %v746_v50  ;;  %v966_v50 = vmul.f32 %v950_v2, %v2023_v8  ;;  %v2128_v23 = vmul.f32 0.5, %v2028_v29 }
 0x2e3   :  { %v760_v53 = vadd.f32 1.0, %v744_v25  ;;  %v747_v17 = vmul.f32 0.3275911, %v2082_v40  ;;  %v2096_v6 = vand.u32 2147483647, %v2085_v0  ;;  %v964_v25 = vmul.f32 %v948_v10, %v2032_v15 }
 0x2e4   :  { %1514 = vrcp.f32 %v762_v54  ;;  %v2119_v54 = vsel %vm692_vm2, 1.0, %v2514_v46  ;;  %v2132_v2 = vmul.f32 0.70710677, %v2115_v61  ;;  %v967_v10 = vmul.f32 %v951_v39, %v2042_v26 }
 0x2e5   :  { %1516 = vrcp.f32 %v760_v53  ;;  %v763_v20 = vadd.f32 1.0, %v747_v17  ;;  %v745_v28 = vmul.f32 0.3275911, %v2096_v6  ;;  %vm698_vm5 = vcmp.ge.f32.partialorder %v2059_v5, 0.0 }
 0x2e6   :  { %v986_v39 = vmul.f32 1.442695, %v967_v10  ;;  %vm696_vm6 = vcmp.ge.f32.partialorder %v2062_v44, 0.0  ;;  %vm699_vm7 = vcmp.ge.f32.partialorder %v2075_v13, 0.0  ;;  %vm697_vm8 = vcmp.ge.f32.partialorder %v2085_v0, 0.0 }
 0x2e7   :  { %1518 = vrcp.f32 %v763_v20  ;;  %v761_v63 = vadd.f32 1.0, %v745_v28  ;;  %v984_v28 = vmul.f32 1.442695, %v966_v50  ;;  %vm702_vm9 = vcmp.ge.f32.partialorder %v2132_v2, 0.0 }
 0x2e8   :  { %v2087_v55 = vpop.eup %1506 }
 0x2e9   :  { %v806_v58 = vmul.f32 1.0614054, %v2087_v55  ;;  %1520 = vrcp.f32 %v761_v63 }
 0x2ea   :  { %v2098_v30 = vpop.eup %1508  ;;  %1522 = vpow2.f32 %v984_v28 }
 0x2eb   :  { %v822_v9 = vadd.f32 -1.4531521, %v806_v58  ;;  %v804_v3 = vmul.f32 1.0614054, %v2098_v30 }
 0x2ec   :  { %v2106_v27 = vpop.eup %1510 }
 0x2ed   :  { %v838_v35 = vmul.f32 %v2087_v55, %v822_v9  ;;  %v820_v62 = vadd.f32 -1.4531521, %v804_v3  ;;  %v807_v7 = vmul.f32 1.0614054, %v2106_v27  ;;  %v949_v9 = vsub.f32 0.0, %v2049_v34 }
 0x2ef   :  { %v854_v49 = vadd.f32 1.4214138, %v838_v35  ;;  %v2122_v53 = vpop.eup %1512  ;;  %v836_v58 = vmul.f32 %v2098_v30, %v820_v62  ;;  %v823_v17 = vadd.f32 -1.4531521, %v807_v7  ;;  %v980_v35 = vmul.f32 1.442695, %v964_v25 }
 0x2f0   :  { %v805_v8 = vmul.f32 1.0614054, %v2122_v53  ;;  %v965_v29 = vmul.f32 %v949_v9, %v2049_v34 }
 0x2f1   :  { %v870_v20 = vmul.f32 %v2087_v55, %v854_v49  ;;  %v852_v3 = vadd.f32 1.4214138, %v836_v58  ;;  %v839_v15 = vmul.f32 %v2106_v27, %v823_v17  ;;  %v2140_v49 = vand.u32 2147483647, %v2132_v2  ;;  %v2142_v46 = vpop.eup %1514 }
 0x2f2   :  { %v821_v62 = vadd.f32 -1.4531521, %v805_v8  ;;  %v2148_v17 = vmul.f32 0.5, %v2038_v19  ;;  %v810_v50 = vmul.f32 1.0614054, %v2142_v46  ;;  %v629_v8 = vpop.f32.mrf.mxu1  ;;  %1524 = vpow2.f32 %v980_v35 }
 0x2f3   :  { %v868_v7 = vmul.f32 %v2098_v30, %v852_v3  ;;  %v855_v63 = vadd.f32 1.4214138, %v839_v15  ;;  %v886_v58 = vadd.f32 -0.28449672, %v870_v20  ;;  %v750_v25 = vmul.f32 0.3275911, %v2140_v49  ;;  %v2155_v3 = vpop.eup %1516 }
 0x2f4   :  { %v837_v26 = vmul.f32 %v2122_v53, %v821_v62  ;;  %v982_v19 = vmul.f32 1.442695, %v965_v29  ;;  %v826_v15 = vadd.f32 -1.4531521, %v810_v50  ;;  %v952_v62 = vsub.f32 0.0, %v2072_v51 }
 0x2f5   :  { %v884_v34 = vadd.f32 -0.28449672, %v868_v7  ;;  %v871_v9 = vmul.f32 %v2106_v27, %v855_v63  ;;  %v902_v10 = vmul.f32 %v2087_v55, %v886_v58  ;;  %v808_v28 = vmul.f32 1.0614054, %v2155_v3  ;;  %v2162_v63 = vpop.eup %1518 }
 0x2f6   :  { %v853_v20 = vadd.f32 1.4214138, %v837_v26  ;;  %v953_v7 = vsub.f32 0.0, %v2096_v6  ;;  %1526 = vpow2.f32 %v986_v39  ;;  %v954_v26 = vsub.f32 0.0, %v2065_v45  ;;  %v2172_v11 = vpop.eup %1520 }
 0x2f7   :  { %v766_v32 = vadd.f32 1.0, %v750_v25  ;;  %v2166_v35 = vadd.f32 %v2016_v16, %v629_v8  ;;  %v900_v29 = vmul.f32 %v2098_v30, %v884_v34  ;;  %v887_v50 = vadd.f32 -0.28449672, %v871_v9 }
 0x2f8   :  { %v869_v43 = vmul.f32 %v2122_v53, %v853_v20  ;;  %v824_v36 = vadd.f32 -1.4531521, %v808_v28  ;;  %v811_v58 = vmul.f32 1.0614054, %v2162_v63  ;;  %1528 = vpow2.f32 %v982_v19 }
 0x2f9   :  { %v842_v21 = vmul.f32 %v2142_v46, %v826_v15  ;;  %v968_v22 = vmul.f32 %v952_v62, %v2072_v51  ;;  %v918_v39 = vadd.f32 0.2548296, %v902_v10  ;;  %v969_v8 = vmul.f32 %v953_v7, %v2096_v6 }
 0x2fa   :  { %v885_v20 = vadd.f32 -0.28449672, %v869_v43  ;;  %v840_v25 = vmul.f32 %v2155_v3, %v824_v36  ;;  %v827_v14 = vadd.f32 -1.4531521, %v811_v58  ;;  %v955_v34 = vsub.f32 0.0, %v2082_v40 }
 0x2fb   :  { %v809_v9 = vmul.f32 1.0614054, %v2172_v11  ;;  %1530 = vrcp.f32 %v766_v32  ;;  %v2179_v43 = vmul.f32 0.70710677, %v2166_v35  ;;  %v916_v19 = vadd.f32 0.2548296, %v900_v29 }
 0x2fc   :  { %v903_v15 = vmul.f32 %v2106_v27, %v887_v50  ;;  %v856_v51 = vadd.f32 1.4214138, %v840_v25  ;;  %v843_v62 = vmul.f32 %v2162_v63, %v827_v14  ;;  %v901_v10 = vmul.f32 %v2122_v53, %v885_v20 }
 0x2fd   :  { %v858_v36 = vadd.f32 1.4214138, %v842_v21  ;;  %v970_v28 = vmul.f32 %v954_v26, %v2065_v45  ;;  %v825_v6 = vadd.f32 -1.4531521, %v809_v9  ;;  %v934_v7 = vmul.f32 %v2087_v55, %v918_v39  ;;  %v1523_v39 = vpop.eup %1522 }
 0x2fe   :  { %v872_v58 = vmul.f32 %v2155_v3, %v856_v51  ;;  %v859_v32 = vadd.f32 1.4214138, %v843_v62  ;;  %v990_v1 = vmul.f32 1.442695, %v969_v8  ;;  %v2190_v29 = vsel %vm693_vm4, 1.0, %v2534_v42 }
 0x2ff   :  { %v2193_v50 = vmul.f32 0.5, %v2056_v60  ;;  %v971_v14 = vmul.f32 %v955_v34, %v2082_v40  ;;  %v841_v21 = vmul.f32 %v2172_v11, %v825_v6  ;;  %v932_v45 = vmul.f32 %v2098_v30, %v916_v19  ;;  %v1525_v60 = vpop.eup %1524 }
 0x300   :  { %v919_v26 = vadd.f32 0.2548296, %v903_v15  ;;  %v988_v55 = vmul.f32 1.442695, %v968_v22  ;;  %v2199_v20 = vand.u32 2147483647, %v2179_v43  ;;  %v874_v48 = vmul.f32 %v2142_v46, %v858_v36  ;;  %v1408_v36 = vpop.f32.mrf.mxu1 }
 0x301   :  { %v917_v25 = vadd.f32 0.2548296, %v901_v10  ;;  %v875_v8 = vmul.f32 %v2162_v63, %v859_v32  ;;  %v857_v9 = vadd.f32 1.4214138, %v841_v21  ;;  %v1014_v51 = vmul.f32 %v1523_v39, %v934_v7 }
 0x302   :  { %v992_v62 = vmul.f32 1.442695, %v970_v28  ;;  %v888_v40 = vadd.f32 -0.28449672, %v872_v58  ;;  %1532 = vpow2.f32 %v990_v1  ;;  %v994_v22 = vmul.f32 1.442695, %v971_v14 }
 0x303   :  { %v873_v30 = vmul.f32 %v2172_v11, %v857_v9  ;;  %v1527_v34 = vpop.eup %1526  ;;  %v1012_v19 = vmul.f32 %v1525_v60, %v932_v45  ;;  %v935_v15 = vmul.f32 %v2106_v27, %v919_v26  ;;  %1534 = vpow2.f32 %v988_v55 }
 0x304   :  { %v748_v10 = vmul.f32 0.3275911, %v2199_v20  ;;  %v933_v6 = vmul.f32 %v2122_v53, %v917_v25  ;;  %v890_v28 = vadd.f32 -0.28449672, %v874_v48  ;;  %v891_v7 = vadd.f32 -0.28449672, %v875_v8  ;;  %v632_v48 = vpop.f32.mrf.mxu1 }
 0x305   :  { %v889_v1 = vadd.f32 -0.28449672, %v873_v30  ;;  %v1529_v58 = vpop.eup %1528  ;;  %v1030_v32 = vsub.f32 1.0, %v1014_v51  ;;  %1536 = vpow2.f32 %v992_v62  ;;  %v904_v14 = vmul.f32 %v2155_v3, %v888_v40 }
 0x306   :  { %v764_v21 = vadd.f32 1.0, %v748_v10  ;;  %v2213_v45 = vsel %vm698_vm5, 1.0, %v2534_v42  ;;  %1538 = vpow2.f32 %v994_v22  ;;  %v958_v26 = vsub.f32 0.0, %v2140_v49 }
 0x307   :  { %v905_v27 = vmul.f32 %v2172_v11, %v889_v1  ;;  %v1028_v55 = vsub.f32 1.0, %v1012_v19  ;;  %v1015_v39 = vmul.f32 %v1527_v34, %v935_v15  ;;  %v2222_v25 = vsel %vm696_vm6, 1.0, %v2534_v42 }
 0x308   :  { %v2217_v53 = vpop.eup %1530  ;;  %1540 = vrcp.f32 %v764_v21  ;;  %v1013_v8 = vmul.f32 %v1529_v58, %v933_v6  ;;  %v906_v5 = vmul.f32 %v2142_v46, %v890_v28  ;;  %v907_v9 = vmul.f32 %v2162_v63, %v891_v7 }
 0x309   :  { %v921_v60 = vadd.f32 0.2548296, %v905_v27  ;;  %v1046_v51 = vmul.f32 %v1030_v32, %v2109_v31  ;;  %v920_v62 = vadd.f32 0.2548296, %v904_v14  ;;  %v2228_v40 = vmul.f32 0.5, %v2068_v12  ;;  %v1411_v12 = vpop.f32.mrf.mxu1 }
 0x30a   :  { %v2231_v22 = vadd.f32 %v1408_v36, %v2016_v16  ;;  %v814_v44 = vmul.f32 1.0614054, %v2217_v53  ;;  %v974_v30 = vmul.f32 %v958_v26, %v2140_v49  ;;  %v1044_v34 = vmul.f32 %v1028_v55, %v2119_v54 }
 0x30b   :  { %v1031_v19 = vsub.f32 1.0, %v1015_v39  ;;  %v937_v31 = vmul.f32 %v2172_v11, %v921_v60  ;;  %v1029_v10 = vsub.f32 1.0, %v1013_v8  ;;  %v922_v36 = vadd.f32 0.2548296, %v906_v5  ;;  %v645_v55 = vpop.f32.mrf.mxu1 }
 0x30c   :  { %v2240_v15 = vmul.f32 0.70710677, %v2231_v22  ;;  %v923_v6 = vadd.f32 0.2548296, %v907_v9  ;;  %v2243_v28 = vadd.f32 %v2016_v16, %v632_v48  ;;  %v1062_v7 = vadd.f32 1.0, %v1046_v51 }
 0x30d   :  { %v936_v1 = vmul.f32 %v2155_v3, %v920_v62  ;;  %v2247_v49 = vmul.f32 0.5, %v2078_v52  ;;  %v2253_v11 = vsel %vm699_vm7, 1.0, %v2534_v42  ;;  %v713_v32 = vsel %vm697_vm8, 1.0, %v2534_v42 }
 0x30e   :  { %v735_v54 = vand.u32 2147483647, %v2240_v15  ;;  %v830_v14 = vadd.f32 -1.4531521, %v814_v44  ;;  %v1000_v21 = vmul.f32 1.442695, %v974_v30  ;;  %v1047_v3 = vmul.f32 %v1031_v19, %v2145_v18 }
 0x30f   :  { %v1533_v58 = vpop.eup %1532  ;;  %v1060_v27 = vadd.f32 1.0, %v1044_v34  ;;  %v1045_v48 = vmul.f32 %v1029_v10, %v2190_v29  ;;  %v938_v8 = vmul.f32 %v2142_v46, %v922_v36  ;;  %v939_v13 = vmul.f32 %v2162_v63, %v923_v6  ;;  %v1412_v34 = vpop.f32.mrf.mxu1 }
 0x310   :  { %v1017_v26 = vmul.f32 %v1533_v58, %v937_v31  ;;  %v751_v52 = vmul.f32 0.3275911, %v735_v54  ;;  %v1535_v39 = vpop.eup %1534  ;;  %v2263_v5 = vmul.f32 0.70710677, %v2243_v28  ;;  %v2266_v0 = vmul.f32 %v1062_v7, %v2091_v59 }
 0x311   :  { %v1016_v9 = vmul.f32 %v1535_v39, %v936_v1  ;;  %v2269_v18 = vadd.f32 %v1411_v12, %v2016_v16  ;;  %v846_v62 = vmul.f32 %v2217_v53, %v830_v14  ;;  %1542 = vpow2.f32 %v1000_v21 }
 0x312   :  { %v767_v60 = vadd.f32 1.0, %v751_v52  ;;  %v1537_v51 = vpop.eup %1536  ;;  %v956_v29 = vsub.f32 0.0, %v2199_v20  ;;  %v2274_v46 = vand.u32 2147483647, %v2263_v5  ;;  %v2277_v44 = vmul.f32 %v1060_v27, %v2101_v24 }
 0x313   :  { %v1539_v63 = vpop.eup %1538  ;;  %v1063_v59 = vadd.f32 1.0, %v1047_v3  ;;  %v1033_v30 = vsub.f32 1.0, %v1017_v26  ;;  %v1061_v31 = vadd.f32 1.0, %v1045_v48  ;;  %v1018_v12 = vmul.f32 %v1537_v51, %v938_v8 }
 0x314   :  { %1544 = vrcp.f32 %v767_v60  ;;  %v1019_v10 = vmul.f32 %v1539_v63, %v939_v13  ;;  %v749_v36 = vmul.f32 0.3275911, %v2274_v46  ;;  %v1032_v6 = vsub.f32 1.0, %v1016_v9 }
 0x315   :  { %v2279_v19 = vpop.eup %1540  ;;  %v2284_v1 = vmul.f32 0.70710677, %v2269_v18  ;;  %v2287_v24 = vadd.f32 %v2016_v16, %v645_v55  ;;  %v862_v58 = vadd.f32 1.4214138, %v846_v62  ;;  %v972_v14 = vmul.f32 %v956_v29, %v2199_v20 }
 0x316   :  { %v812_v7 = vmul.f32 1.0614054, %v2279_v19  ;;  %v765_v21 = vadd.f32 1.0, %v749_v36  ;;  %v2291_v27 = vadd.f32 %v1412_v34, %v2016_v16  ;;  %v1049_v3 = vmul.f32 %v1033_v30, %v713_v32 }
 0x317   :  { %v959_v52 = vsub.f32 0.0, %v735_v54  ;;  %v2294_v39 = vand.u32 2147483647, %v2284_v1  ;;  %v1079_v48 = vmul.f32 %v1063_v59, %v2128_v23  ;;  %v1034_v8 = vsub.f32 1.0, %v1018_v12 }
 0x318   :  { %v828_v26 = vadd.f32 -1.4531521, %v812_v7  ;;  %v1035_v13 = vsub.f32 1.0, %v1019_v10  ;;  %1546 = vrcp.f32 %v765_v21  ;;  %v1048_v55 = vmul.f32 %v1032_v6, %v2222_v25 }
 0x319   :  { %v754_v20 = vmul.f32 0.3275911, %v2294_v39  ;;  %v2301_v60 = vmul.f32 0.70710677, %v2287_v24  ;;  %v1077_v32 = vmul.f32 %v1061_v31, %v2148_v17  ;;  %v878_v51 = vmul.f32 %v2217_v53, %v862_v58  ;;  %v648_v17 = vpop.f32.mrf.mxu1 }
 0x31a   :  { %v844_v9 = vmul.f32 %v2279_v19, %v828_v26  ;;  %v996_v62 = vmul.f32 1.442695, %v972_v14  ;;  %v2306_v29 = vmul.f32 0.70710677, %v2291_v27  ;;  %v1065_v23 = vadd.f32 1.0, %v1049_v3 }
 0x31b   :  { %v975_v59 = vmul.f32 %v959_v52, %v735_v54  ;;  %v770_v30 = vadd.f32 1.0, %v754_v20  ;;  %v1093_v25 = vpack.c.bf16 %v1079_v48, %v2266_v0  ;;  %v1050_v34 = vmul.f32 %v1034_v8, %v2213_v45 }
 0x31c   :  { %v860_v63 = vadd.f32 1.4214138, %v844_v9  ;;  %v1051_v12 = vmul.f32 %v1035_v13, %v2253_v11  ;;  %v2312_v10 = vand.u32 2147483647, %v2301_v60  ;;  %v1064_v31 = vadd.f32 1.0, %v1048_v55 }
 0x31d   :  { %v957_v6 = vsub.f32 0.0, %v2274_v46  ;;  %1548 = vrcp.f32 %v770_v30  ;;  %v894_v7 = vadd.f32 -0.28449672, %v878_v51  ;;  %v2318_v0 = vand.u32 2147483647, %v2306_v29 }
 0x31e   :  { %v876_v36 = vmul.f32 %v2279_v19, %v860_v63  ;;  %1550 = vpow2.f32 %v996_v62  ;;  %v752_v54 = vmul.f32 0.3275911, %v2312_v10  ;;  %v2320_v45 = vpop.eup %1542  ;;  %v1081_v11 = vmul.f32 %v1065_v23, %v2247_v49 }
 0x31f   :  { %v1002_v58 = vmul.f32 1.442695, %v975_v59  ;;  %v2324_v14 = vadd.f32 %v2016_v16, %v648_v17  ;;  %v1092_v21 = vpack.c.bf16 %v1077_v32, %v2277_v44  ;;  %v1067_v26 = vadd.f32 1.0, %v1051_v12 }
 0x320   :  { %v892_v52 = vadd.f32 -0.28449672, %v876_v36  ;;  %v768_v48 = vadd.f32 1.0, %v752_v54  ;;  %v755_v8 = vmul.f32 0.3275911, %v2318_v0  ;;  %v1080_v13 = vmul.f32 %v1064_v31, %v2193_v50 }
 0x321   :  { %v2327_v3 = vpop.eup %1544  ;;  %v973_v9 = vmul.f32 %v957_v6, %v2274_v46  ;;  %v2334_v49 = vmul.f32 0.70710677, %v2324_v14  ;;  %1429 = vmatprep.mubr.bf16.mxu0 %v1092_v21  ;;  %v1066_v16 = vadd.f32 1.0, %v1050_v34  ;;  %v910_v44 = vmul.f32 %v2217_v53, %v894_v7 }
 0x322   :  { %v815_v55 = vmul.f32 1.0614054, %v2327_v3  ;;  %1552 = vrcp.f32 %v768_v48  ;;  %v771_v20 = vadd.f32 1.0, %v755_v8  ;;  %1430 = vmatmul.mubr.bf16.vlgmr.msra.gmra.mxu0 %v1093_v25  ;;  %v666_v32 = vmul.f32 0.5, %v2052_v38 }
 0x323   :  { %v1094_v62 = vpack.c.bf16 %v1081_v11, %v1080_v13  ;;  %v1083_v50 = vmul.f32 %v1067_v26, %v2228_v40  ;;  %v908_v23 = vmul.f32 %v2279_v19, %v892_v52  ;;  %1554 = vpow2.f32 %v1002_v58 }
 0x324   :  { %v831_v51 = vadd.f32 -1.4531521, %v815_v55  ;;  %v2341_v46 = vand.u32 2147483647, %v2334_v49  ;;  %v998_v30 = vmul.f32 1.442695, %v973_v9  ;;  %1556 = vrcp.f32 %v771_v20 }
 0x325   :  { %v2343_v63 = vpop.eup %1546  ;;  %1433 = vmatprep.mubr.bf16.mxu0 %v1094_v62  ;;  %v1082_v25 = vmul.f32 %v1066_v16, %v666_v32  ;;  %v926_v34 = vadd.f32 0.2548296, %v910_v44  ;;  %v960_v17 = vsub.f32 0.0, %v2312_v10  ;;  %v924_v31 = vadd.f32 0.2548296, %v908_v23 }
 0x326   :  { %v847_v59 = vmul.f32 %v2327_v3, %v831_v51  ;;  %v813_v38 = vmul.f32 1.0614054, %v2343_v63  ;;  %v753_v12 = vmul.f32 0.3275911, %v2341_v46  ;;  %1558 = vpow2.f32 %v998_v30 }
 0x327   :  { %v1095_v7 = vpack.c.bf16 %v1083_v50, %v1082_v25  ;;  %v962_v11 = vsub.f32 0.0, %v2294_v39  ;;  %v942_v21 = vmul.f32 %v2217_v53, %v926_v34  ;;  %v963_v52 = vsub.f32 0.0, %v2318_v0 }
 0x328   :  { %v863_v40 = vadd.f32 1.4214138, %v847_v59  ;;  %v829_v36 = vadd.f32 -1.4531521, %v813_v38  ;;  %v769_v6 = vadd.f32 1.0, %v753_v12  ;;  %vm700_vm10 = vcmp.ge.f32.partialorder %v2179_v43, 0.0 }
 0x329   :  { %v940_v55 = vmul.f32 %v2279_v19, %v924_v31  ;;  %v976_v16 = vmul.f32 %v960_v17, %v2312_v10  ;;  %v718_v53 = vsel %vm702_vm9, 1.0, %v2534_v42  ;;  %v978_v32 = vmul.f32 %v962_v11, %v2294_v39 }
 0x32a   :  { %v879_v54 = vmul.f32 %v2327_v3, %v863_v40  ;;  %v2352_v58 = vpop.eup %1548  ;;  %v845_v26 = vmul.f32 %v2343_v63, %v829_v36  ;;  %1560 = vrcp.f32 %v769_v6  ;;  %1434 = vmatmul.mubr.bf16.gmra.mxu0 %v1095_v7  ;;  %v1022_v51 = vmul.f32 %v2320_v45, %v942_v21 }
 0x32b   :  { %v1551_v48 = vpop.eup %1550  ;;  %v818_v13 = vmul.f32 1.0614054, %v2352_v58  ;;  %vm703_vm11 = vcmp.ge.f32.partialorder %v2240_v15, 0.0  ;;  %v979_v19 = vmul.f32 %v963_v52, %v2318_v0  ;;  %v716_v10 = vsel %vm700_vm10, 1.0, %v2534_v42 }
 0x32c   :  { %v895_v8 = vadd.f32 -0.28449672, %v879_v54  ;;  %v861_v9 = vadd.f32 1.4214138, %v845_v26  ;;  %v961_v23 = vsub.f32 0.0, %v2341_v46  ;;  %v1020_v59 = vmul.f32 %v1551_v48, %v940_v55 }
 0x32d   :  { %v834_v20 = vadd.f32 -1.4531521, %v818_v13  ;;  %v1004_v45 = vmul.f32 1.442695, %v976_v16  ;;  %v719_v15 = vsel %vm703_vm11, 1.0, %v2534_v42  ;;  %v1038_v40 = vsub.f32 1.0, %v1022_v51 }
 0x32e   :  { %v911_v44 = vmul.f32 %v2327_v3, %v895_v8  ;;  %v877_v43 = vmul.f32 %v2343_v63, %v861_v9  ;;  %v1008_v38 = vmul.f32 1.442695, %v978_v32  ;;  %v1010_v36 = vmul.f32 1.442695, %v979_v19 }
 0x32f   :  { %v2370_v62 = vpop.eup %1552  ;;  %v850_v2 = vmul.f32 %v2352_v58, %v834_v20  ;;  %v977_v11 = vmul.f32 %v961_v23, %v2341_v46  ;;  %v1036_v21 = vsub.f32 1.0, %v1020_v59  ;;  %1562 = vpow2.f32 %v1004_v45 }
 0x330   :  { %v927_v50 = vadd.f32 0.2548296, %v911_v44  ;;  %v893_v30 = vadd.f32 -0.28449672, %v877_v43  ;;  %v816_v39 = vmul.f32 1.0614054, %v2370_v62  ;;  %v1555_v25 = vpop.eup %1554  ;;  %1564 = vpow2.f32 %v1008_v38 }
 0x331   :  { %v866_v0 = vadd.f32 1.4214138, %v850_v2  ;;  %v2378_v12 = vpop.eup %1556  ;;  %vm701_vm12 = vcmp.ge.f32.partialorder %v2263_v5, 0.0  ;;  %1566 = vpow2.f32 %v1010_v36  ;;  %v1006_v32 = vmul.f32 1.442695, %v977_v11 }
 0x332   :  { %v943_v34 = vmul.f32 %v2327_v3, %v927_v50  ;;  %v909_v17 = vmul.f32 %v2343_v63, %v893_v30  ;;  %v832_v31 = vadd.f32 -1.4531521, %v816_v39  ;;  %v819_v54 = vmul.f32 1.0614054, %v2378_v12 }
 0x333   :  { %v882_v7 = vmul.f32 %v2352_v58, %v866_v0  ;;  %v1559_v13 = vpop.eup %1558  ;;  %v1052_v51 = vmul.f32 %v1036_v21, %v716_v10  ;;  %v1054_v2 = vmul.f32 %v1038_v40, %v718_v53  ;;  %1568 = vpow2.f32 %v1006_v32 }
 0x334   :  { %v1023_v6 = vmul.f32 %v1555_v25, %v943_v34  ;;  %v925_v26 = vadd.f32 0.2548296, %v909_v17  ;;  %v848_v3 = vmul.f32 %v2370_v62, %v832_v31  ;;  %v835_v8 = vadd.f32 -1.4531521, %v819_v54 }
 0x335   :  { %v898_v48 = vadd.f32 -0.28449672, %v882_v7  ;;  %v1070_v38 = vadd.f32 1.0, %v1054_v2  ;;  %v668_v53 = vmul.f32 0.5, %v2166_v35  ;;  %v671_v40 = vmul.f32 0.5, %v2231_v22 }
 0x336   :  { %v1039_v52 = vsub.f32 1.0, %v1023_v6  ;;  %v941_v55 = vmul.f32 %v2343_v63, %v925_v26  ;;  %v864_v9 = vadd.f32 1.4214138, %v848_v3  ;;  %v851_v20 = vmul.f32 %v2378_v12, %v835_v8 }
 0x337   :  { %v2387_v16 = vpop.eup %1560  ;;  %v914_v46 = vmul.f32 %v2352_v58, %v898_v48  ;;  %v717_v63 = vsel %vm701_vm12, 1.0, %v2534_v42  ;;  %v669_v31 = vmul.f32 0.5, %v2243_v28  ;;  %v670_v54 = vmul.f32 0.5, %v2115_v61 }
 0x338   :  { %v1055_v44 = vmul.f32 %v1039_v52, %v719_v15  ;;  %v1021_v43 = vmul.f32 %v1559_v13, %v941_v55  ;;  %v880_v19 = vmul.f32 %v2370_v62, %v864_v9  ;;  %v817_v50 = vmul.f32 1.0614054, %v2387_v16 }
 0x339   :  { %v867_v5 = vadd.f32 1.4214138, %v851_v20  ;;  %v930_v45 = vadd.f32 0.2548296, %v914_v46  ;;  %v1068_v15 = vadd.f32 1.0, %v1052_v51  ;;  %v1086_v8 = vmul.f32 %v1070_v38, %v670_v54 }
 0x33a   :  { %v1037_v23 = vsub.f32 1.0, %v1021_v43  ;;  %v896_v59 = vadd.f32 -0.28449672, %v880_v19  ;;  %v833_v30 = vadd.f32 -1.4531521, %v817_v50  ;;  %v1071_v39 = vadd.f32 1.0, %v1055_v44 }
 0x33b   :  { %v883_v25 = vmul.f32 %v2378_v12, %v867_v5  ;;  %v946_v21 = vmul.f32 %v2352_v58, %v930_v45  ;;  %v1084_v3 = vmul.f32 %v1068_v15, %v668_v53  ;;  %vm707_vm13 = vcmp.ge.f32.partialorder %v2306_v29, 0.0 }
 0x33c   :  { %v1053_v34 = vmul.f32 %v1037_v23, %v717_v63  ;;  %v912_v10 = vmul.f32 %v2370_v62, %v896_v59  ;;  %v849_v0 = vmul.f32 %v2387_v16, %v833_v30  ;;  %v1087_v11 = vmul.f32 %v1071_v39, %v671_v40  ;;  %v1563_v22 = vpop.eup %1562 }
 0x33d   :  { %v899_v17 = vadd.f32 -0.28449672, %v883_v25  ;;  %v1565_v28 = vpop.eup %1564  ;;  %vm704_vm14 = vcmp.ge.f32.partialorder %v2301_v60, 0.0  ;;  %vm706_vm15 = vcmp.ge.f32.partialorder %v2284_v1, 0.0  ;;  %v723_v5 = vsel %vm707_vm13, 1.0, %v2534_v42 }
 0x33e   :  { %v1069_v36 = vadd.f32 1.0, %v1053_v34  ;;  %v928_v6 = vadd.f32 0.2548296, %v912_v10  ;;  %v865_v7 = vadd.f32 1.4214138, %v849_v0  ;;  %v1567_v46 = vpop.eup %1566  ;;  %v1097_v61 = vpack.c.bf16 %v1087_v11, %v1086_v8 }
 0x33f   :  { %v915_v26 = vmul.f32 %v2378_v12, %v899_v17  ;;  %v1026_v20 = vmul.f32 %v1565_v28, %v946_v21  ;;  %v720_v63 = vsel %vm704_vm14, 1.0, %v2534_v42  ;;  %v722_v29 = vsel %vm706_vm15, 1.0, %v2534_v42 }
 0x340   :  { %v1085_v52 = vmul.f32 %v1069_v36, %v669_v31  ;;  %v944_v48 = vmul.f32 %v2370_v62, %v928_v6  ;;  %v881_v35 = vmul.f32 %v2387_v16, %v865_v7  ;;  %v1569_v2 = vpop.eup %1568  ;;  %vm705_vm1 = vcmp.ge.f32.partialorder %v2334_v49, 0.0 }
 0x341   :  { %v931_v13 = vadd.f32 0.2548296, %v915_v26  ;;  %v1042_v19 = vsub.f32 1.0, %v1026_v20  ;;  %v721_v1 = vsel %vm705_vm1, 1.0, %v2534_v42  ;;  %v675_v10 = vmul.f32 0.5, %v2291_v27  ;;  %v2536_v20 = vld [vmem:[#allocation4_spill] sm:$0xff] }
 0x342   :  { %v1024_v55 = vmul.f32 %v1563_v22, %v944_v48  ;;  %v897_v9 = vadd.f32 -0.28449672, %v881_v35  ;;  %v1096_v44 = vpack.c.bf16 %v1085_v52, %v1084_v3  ;;  %v673_v0 = vmul.f32 0.5, %v2324_v14  ;;  %v1328_v42 = vld [vmem:[%s2512_s9] ss:$0 sm:$0xff] }
 0x343   :  { %v947_v58 = vmul.f32 %v2378_v12, %v931_v13  ;;  %v1058_v30 = vmul.f32 %v1042_v19, %v722_v29  ;;  %v674_v53 = vmul.f32 0.5, %v2269_v18 }
 0x344   :  { %v913_v32 = vmul.f32 %v2387_v16, %v897_v9  ;;  %1437 = vmatprep.mubr.bf16.mxu1 %v1096_v44  ;;  %v1040_v51 = vsub.f32 1.0, %v1024_v55 }
 0x345   :  { %v1027_v62 = vmul.f32 %v1567_v46, %v947_v58  ;;  %1438 = vmatmul.mubr.bf16.vlgmr.msra.gmra.mxu1 %v1097_v61  ;;  %v1074_v34 = vadd.f32 1.0, %v1058_v30 }
 0x346   :  { %v929_v43 = vadd.f32 0.2548296, %v913_v32  ;;  %v1056_v59 = vmul.f32 %v1040_v51, %v720_v63 }
 0x347   :  { %v1043_v50 = vsub.f32 1.0, %v1027_v62  ;;  %v1090_v31 = vmul.f32 %v1074_v34, %v674_v53  ;;  %v2537_v62 = vld [vmem:[#allocation3_spill] sm:$0xff] }
 0x348   :  { %v945_v12 = vmul.f32 %v2387_v16, %v929_v43  ;;  %v1072_v25 = vadd.f32 1.0, %v1056_v59  ;;  %v672_v16 = vmul.f32 0.5, %v2287_v24 }
 0x349   :  { %v1059_v23 = vmul.f32 %v1043_v50, %v723_v5  ;;  %v2538_v50 = vld [vmem:[#allocation6_spill] sm:$0xff] }
 0x34a   :  { %v1025_v60 = vmul.f32 %v1569_v2, %v945_v12  ;;  %v1088_v49 = vmul.f32 %v1072_v25, %v672_v16  ;;  %v2539_v12 = vld [vmem:[#allocation5_spill] sm:$0xff] }
 0x34b   :  { %v1075_v45 = vadd.f32 1.0, %v1059_v23 }
 0x34c   :  { %v1041_v39 = vsub.f32 1.0, %v1025_v60  ;;  %v2540_v60 = vld [vmem:[#allocation8_spill] sm:$0xff] }
 0x34d   :  { %v1091_v40 = vmul.f32 %v1075_v45, %v675_v10  ;;  %v2542_v10 = vld [vmem:[#allocation10_spill] sm:$0xff] }
 0x34e   :  { %v1057_v15 = vmul.f32 %v1041_v39, %v721_v1  ;;  %v2541_v1 = vld [vmem:[#allocation7_spill] sm:$0xff] }
 0x34f   :  { %v1099_v6 = vpack.c.bf16 %v1091_v40, %v1090_v31 }
 0x350   :  { %v1073_v38 = vadd.f32 1.0, %v1057_v15 }
 0x352   :  { %v1089_v17 = vmul.f32 %v1073_v38, %v673_v0  ;;  %v2543_v38 = vld [vmem:[#allocation9_spill] sm:$0xff] }
 0x354   :  { %v1098_v36 = vpack.c.bf16 %v1089_v17, %v1088_v49 }
 0x356   :  { %1441 = vmatprep.mubr.bf16.mxu1 %v1098_v36 }
 0x357   :  { %1442 = vmatmul.mubr.bf16.gmra.mxu1 %v1099_v6 }
 0x3e2   :  { %v1431_v27 = vpop.f32.mrf.mxu0 }
 0x3e3   :  { %v1214_v7 = vadd.f32 %v1431_v27, %v1328_v42 }
 0x3e4   :  { %v1205_v24 = vpop.f32.mrf.mxu0 }
 0x3e5   :  { %v1270_v14 = vadd.f32 %v1214_v7, %v1703_v33  ;;  %v1206_v54 = vadd.f32 %v1328_v42, %v1205_v24 }
 0x3e6   :  { %v1432_v11 = vpop.f32.mrf.mxu0 }
 0x3e7   :  { %1286 = vst.msk [vmem:[%s2513_s10 + $0x10] sm:$0xff] %vm92_vm0, %v1270_v14  ;;  %v1268_v18 = vadd.f32 %v1206_v54, %v1709_v37  ;;  %v1217_v21 = vadd.f32 %v1432_v11, %v1328_v42 }
 0x3e8   :  { %v1208_v26 = vpop.f32.mrf.mxu0 }
 0x3e9   :  { %1284 = vst.msk [vmem:[%s2513_s10] sm:$0xff] %vm92_vm0, %v1268_v18  ;;  %v1271_v3 = vadd.f32 %v1217_v21, %v1714_v41  ;;  %v1209_v52 = vadd.f32 %v1328_v42, %v1208_v26 }
 0x3ea   :  { %v1435_v33 = vpop.f32.mrf.mxu0 }
 0x3eb   :  { %1287 = vst.msk [vmem:[%s2513_s10 + $0x18] sm:$0xff] %vm92_vm0, %v1271_v3  ;;  %v1269_v48 = vadd.f32 %v1209_v52, %v1725_v47  ;;  %v1230_v35 = vadd.f32 %v1435_v33, %v1328_v42 }
 0x3ec   :  { %v1221_v37 = vpop.f32.mrf.mxu0 }
 0x3ed   :  { %1285 = vst.msk [vmem:[%s2513_s10 + $0x8] sm:$0xff] %vm92_vm0, %v1269_v48  ;;  %v1274_v22 = vadd.f32 %v1230_v35, %v1741_v57  ;;  %v1222_v8 = vadd.f32 %v1328_v42, %v1221_v37  ;;  %v2535_v57 = vld [vmem:[#allocation2_spill] sm:$0xff] }
 0x3ee   :  { %v1436_v41 = vpop.f32.mrf.mxu0 }
 0x3ef   :  { %1290 = vst.msk [vmem:[%s2513_s10 + $0x30] sm:$0xff] %vm92_vm0, %v1274_v22  ;;  %v1272_v13 = vadd.f32 %v1222_v8, %v1738_v56  ;;  %v1233_v28 = vadd.f32 %v1436_v41, %v1328_v42 }
 0x3f0   :  { %v1224_v47 = vpop.f32.mrf.mxu0 }
 0x3f1   :  { %1288 = vst.msk [vmem:[%s2513_s10 + $0x20] sm:$0xff] %vm92_vm0, %v1272_v13  ;;  %v1275_v55 = vadd.f32 %v1233_v28, %v1757_v4  ;;  %v1225_v9 = vadd.f32 %v1328_v42, %v1224_v47 }
 0x3f3   :  { %1291 = vst.msk [vmem:[%s2513_s10 + $0x38] sm:$0xff] %vm92_vm0, %v1275_v55  ;;  %v1273_v44 = vadd.f32 %v1225_v9, %v2535_v57 }
 0x3f5   :  { %1289 = vst.msk [vmem:[%s2513_s10 + $0x28] sm:$0xff] %vm92_vm0, %v1273_v44 }
 0x405   :  { %v1439_v56 = vpop.f32.mrf.mxu1 }
 0x406   :  { %v1246_v46 = vadd.f32 %v1439_v56, %v1328_v42 }
 0x407   :  { %v1237_v61 = vpop.f32.mrf.mxu1 }
 0x408   :  { %v1278_v58 = vadd.f32 %v1246_v46, %v2536_v20  ;;  %v1238_v32 = vadd.f32 %v1328_v42, %v1237_v61 }
 0x409   :  { %v1440_v4 = vpop.f32.mrf.mxu1 }
 0x40a   :  { %1294 = vst.msk [vmem:[%s2513_s10 + $0x50] sm:$0xff] %vm92_vm0, %v1278_v58  ;;  %v1276_v51 = vadd.f32 %v1238_v32, %v2537_v62  ;;  %v1249_v43 = vadd.f32 %v1440_v4, %v1328_v42 }
 0x40b   :  { %v1240_v19 = vpop.f32.mrf.mxu1 }
 0x40c   :  { %1292 = vst.msk [vmem:[%s2513_s10 + $0x40] sm:$0xff] %vm92_vm0, %v1276_v51  ;;  %v1279_v2 = vadd.f32 %v1249_v43, %v2538_v50  ;;  %v1241_v5 = vadd.f32 %v1328_v42, %v1240_v19 }
 0x40e   :  { %1295 = vst.msk [vmem:[%s2513_s10 + $0x58] sm:$0xff] %vm92_vm0, %v1279_v2  ;;  %v1277_v63 = vadd.f32 %v1241_v5, %v2539_v12 }
 0x410   :  { %1293 = vst.msk [vmem:[%s2513_s10 + $0x48] sm:$0xff] %vm92_vm0, %v1277_v63 }
 0x417   :  { %v1443_v23 = vpop.f32.mrf.mxu1 }
 0x418   :  { %v1262_v29 = vadd.f32 %v1443_v23, %v1328_v42 }
 0x419   :  { %v1253_v59 = vpop.f32.mrf.mxu1 }
 0x41a   :  { %v1282_v30 = vadd.f32 %v1262_v29, %v2540_v60  ;;  %v1254_v39 = vadd.f32 %v1328_v42, %v1253_v59 }
 0x41b   :  { %v1444_v45 = vpop.f32.mrf.mxu1 }
 0x41c   :  { %1298 = vst.msk [vmem:[%s2513_s10 + $0x70] sm:$0xff] %vm92_vm0, %v1282_v30  ;;  %v1280_v25 = vadd.f32 %v1254_v39, %v2541_v1  ;;  %v1265_v15 = vadd.f32 %v1444_v45, %v1328_v42 }
 0x41d   :  { %v1256_v34 = vpop.f32.mrf.mxu1 }
 0x41e   :  { %1296 = vst.msk [vmem:[%s2513_s10 + $0x60] sm:$0xff] %vm92_vm0, %v1280_v25  ;;  %v1283_v16 = vadd.f32 %v1265_v15, %v2542_v10  ;;  %v1257_v0 = vadd.f32 %v1328_v42, %v1256_v34 }
 0x420   :  { %1299 = vst.msk [vmem:[%s2513_s10 + $0x78] sm:$0xff] %vm92_vm0, %v1283_v16  ;;  %v1281_v53 = vadd.f32 %v1257_v0, %v2543_v38 }
 0x422   :  { %1297 = vst.msk [vmem:[%s2513_s10 + $0x68] sm:$0xff] %vm92_vm0, %v1281_v53 }

// kernel: _lambda_.10
= control target key start
LH: loop header
LB: loop body
LE: loop exit
PB: predicated region body
PF: predicated region fallthrough
CT: control target
= control target key end

     0   :  { %s3110_s15 = smov 0   ;;  %s3112_s16 = smov 0   ;;  %s3883_s0 = inlined_call_operand.vmem [shape: f32[2,16,16,8], index: 0, kind: input, shape index: {}]   ;;  %s3884_s1 = inlined_call_operand.vmem [shape: f32[2,16,16,8], index: 1, kind: input, shape index: {}]   ;;  %s3885_s2 = inlined_call_operand.vmem [shape: f32[2,16,16,8], index: 2, kind: input, shape index: {}]   ;;  %s3886_s3 = inlined_call_operand.vmem [shape: f32[16,16,16], index: 3, kind: input, shape index: {}]   ;;  %s3887_s4 = inlined_call_operand.vmem [shape: f32[2,16,16,8], index: 4, kind: output, shape index: {}]  }
   0x1   :  { %s3114_s17 = smov 0  }
   0x2 LB: > { %s26_s18 = sadd.s32 1, %s3077_s16  ;;  %p2602_p0 = scmp.ge.s32.totalorder %s3081_s17, 1  ;;  %s3081_s17 = sphi %s3114_s17, %s14_s17   ;;  %s3077_s16 = sphi %s3112_s16, %s3889_s16   ;;  %s3073_s15 = sphi %s3110_s15, %s3888_s15  }
   0x3   : > { %p28_p1 = scmp.ge.s32.totalorder %s26_s18, 2  ;;  %p232_p2 = scmp.lt.s32.totalorder %s3081_s17, 3 }
   0x5   : > { %s3891_s18 = smov (%p28_p1, %s26_s18), 0  ;;  %p233_p3 = pnand %p2602_p0, %p232_p2 }
   0x6   : > { %p295_p4 = scmp.lt.s32.totalorder (!%p233_p3), %s3073_s15, 1 }
   0x7   : > { %236 = sbr.rel (%p233_p3) target bundleno = 801 (0x321), region = 36 }
   0xc   : > { %v3083_v0 = vmov 0.0   ;;  %s3893_s15 = smov (!%p295_p4, %s3073_s15), 1  ;;  %vm3084_vm0 = vmmov 0   ;;  %vm490_vm1 = vcmask 64512   ;;  %vm1339_vm2 = vcmask 130048  }
   0xd   : > { %2713 = vmatprep.subr.bf16.mxu0 %v3083_v0  ;;  %2719 = vmatprep.subr.bf16.mxu1 %v3083_v0  ;;  %s3134_s19 = sshll.u32 %s3893_s15, 8 }
   0xe   : > { %2715 = vmatprep.mubr.msk.bf16.mxu0 %vm3084_vm0, %v3083_v0  ;;  %2721 = vmatprep.mubr.msk.bf16.mxu1 %vm3084_vm0, %v3083_v0  ;;  %s3140_s22 = scalar_lea.vmem %s3884_s1, %s3134_s19  ;;  %s3150_s25 = scalar_lea.vmem %s3883_s0, %s3134_s19 }
   0xf   : > { %v394_v1 = vld [vmem:[%s3140_s22] sm:$0xff]  ;;  %v395_v2 = vld [vmem:[%s3140_s22 + $0x8] sm:$0xff]  ;;  %v396_v3 = vld [vmem:[%s3140_s22 + $0x10] sm:$0xff]  ;;  %s3601_s26 = scalar_lea.vmem %s3885_s2, %s3134_s19  ;;  %s3808_s29 = scalar_lea.vmem %s3887_s4, %s3134_s19 }
  0x10   : > { %v426_v4 = vpack.c.bf16 %v395_v2, %v394_v1  ;;  %v397_v5 = vld [vmem:[%s3140_s22 + $0x18] sm:$0xff]  ;;  %v398_v7 = vld [vmem:[%s3140_s22 + $0x20] sm:$0xff]  ;;  %v399_v9 = vld [vmem:[%s3140_s22 + $0x28] sm:$0xff] }
  0x11   : > { %v427_v6 = vpack.c.bf16 %v397_v5, %v396_v3  ;;  %v400_v10 = vld [vmem:[%s3140_s22 + $0x30] sm:$0xff]  ;;  %v401_v11 = vld [vmem:[%s3140_s22 + $0x38] sm:$0xff]  ;;  %v346_v13 = vld [vmem:[%s3150_s25] sm:$0xff]  ;;  %v428_v17 = vpack.c.bf16 %v399_v9, %v398_v7 }
  0x12   : > { %v495_v8 = vsel %vm490_vm1, %v426_v4, 0  ;;  %v347_v14 = vld [vmem:[%s3150_s25 + $0x8] sm:$0xff]  ;;  %v348_v15 = vld [vmem:[%s3150_s25 + $0x10] sm:$0xff]  ;;  %v349_v16 = vld [vmem:[%s3150_s25 + $0x18] sm:$0xff]  ;;  %v429_v18 = vpack.c.bf16 %v401_v11, %v400_v10 }
  0x13   : > { %2714 = vmatpush3.bf16.xpose.msra.mxu0 %v495_v8  ;;  %v542_v12 = vsel %vm490_vm1, %v427_v6, 0  ;;  %v378_v19 = vpack.c.bf16 %v347_v14, %v346_v13  ;;  %v379_v20 = vpack.c.bf16 %v349_v16, %v348_v15  ;;  %v589_v21 = vsel %vm490_vm1, %v428_v17, 0  ;;  %v402_v23 = vld [vmem:[%s3140_s22 + $0x40] sm:$0xff]  ;;  %v403_v24 = vld [vmem:[%s3140_s22 + $0x48] sm:$0xff]  ;;  %v404_v25 = vld [vmem:[%s3140_s22 + $0x50] sm:$0xff] }
  0x14   : > { %2720 = vmatpush3.bf16.xpose.msra.mxu1 %v542_v12  ;;  %2725 = vmatprep.subr.bf16.mxu0 %v3083_v0  ;;  %v636_v22 = vsel %vm490_vm1, %v429_v18, 0  ;;  %v405_v26 = vld [vmem:[%s3140_s22 + $0x58] sm:$0xff]  ;;  %v350_v27 = vld [vmem:[%s3150_s25 + $0x20] sm:$0xff]  ;;  %v351_v28 = vld [vmem:[%s3150_s25 + $0x28] sm:$0xff]  ;;  %v430_v31 = vpack.c.bf16 %v403_v24, %v402_v23 }
  0x15   : > { %2731 = vmatprep.subr.bf16.mxu1 %v3083_v0  ;;  %v352_v29 = vld [vmem:[%s3150_s25 + $0x30] sm:$0xff]  ;;  %v353_v30 = vld [vmem:[%s3150_s25 + $0x38] sm:$0xff]  ;;  %v431_v32 = vpack.c.bf16 %v405_v26, %v404_v25  ;;  %v380_v33 = vpack.c.bf16 %v351_v28, %v350_v27  ;;  %v406_v37 = vld [vmem:[%s3140_s22 + $0x60] sm:$0xff] }
  0x16   : > { %v381_v34 = vpack.c.bf16 %v353_v30, %v352_v29  ;;  %v683_v35 = vsel %vm490_vm1, %v430_v31, 0  ;;  %v407_v38 = vld [vmem:[%s3140_s22 + $0x68] sm:$0xff]  ;;  %v408_v39 = vld [vmem:[%s3140_s22 + $0x70] sm:$0xff]  ;;  %v409_v40 = vld [vmem:[%s3140_s22 + $0x78] sm:$0xff] }
  0x17   : > { %v730_v36 = vsel %vm490_vm1, %v431_v32, 0  ;;  %v354_v41 = vld [vmem:[%s3150_s25 + $0x40] sm:$0xff]  ;;  %v355_v42 = vld [vmem:[%s3150_s25 + $0x48] sm:$0xff]  ;;  %v356_v43 = vld [vmem:[%s3150_s25 + $0x50] sm:$0xff]  ;;  %v432_v45 = vpack.c.bf16 %v407_v38, %v406_v37  ;;  %v433_v46 = vpack.c.bf16 %v409_v40, %v408_v39 }
  0x18   : > { %v357_v44 = vld [vmem:[%s3150_s25 + $0x58] sm:$0xff]  ;;  %v382_v47 = vpack.c.bf16 %v355_v42, %v354_v41  ;;  %v410_v51 = vld [vmem:[%s3140_s22 + $0x80] sm:$0xff]  ;;  %v411_v52 = vld [vmem:[%s3140_s22 + $0x88] sm:$0xff] }
  0x19   : > { %v383_v48 = vpack.c.bf16 %v357_v44, %v356_v43  ;;  %v777_v49 = vsel %vm490_vm1, %v432_v45, 0  ;;  %v824_v50 = vsel %vm490_vm1, %v433_v46, 0  ;;  %v412_v53 = vld [vmem:[%s3140_s22 + $0x90] sm:$0xff]  ;;  %v413_v54 = vld [vmem:[%s3140_s22 + $0x98] sm:$0xff]  ;;  %v358_v55 = vld [vmem:[%s3150_s25 + $0x60] sm:$0xff]  ;;  %v434_v59 = vpack.c.bf16 %v411_v52, %v410_v51 }
  0x1a   : > { %2716 = vmatmul.mubr.msk.bf16.vlgmr.msra.gmra.mxu0 %vm490_vm1, %v378_v19  ;;  %v359_v56 = vld [vmem:[%s3150_s25 + $0x68] sm:$0xff]  ;;  %v360_v57 = vld [vmem:[%s3150_s25 + $0x70] sm:$0xff]  ;;  %v361_v58 = vld [vmem:[%s3150_s25 + $0x78] sm:$0xff]  ;;  %v435_v60 = vpack.c.bf16 %v413_v54, %v412_v53 }
  0x1b   : > { %2722 = vmatmul.mubr.msk.bf16.vlgmr.msra.gmra.mxu1 %vm490_vm1, %v379_v20  ;;  %2726 = vmatpush3.bf16.xpose.msra.mxu0 %v589_v21  ;;  %v384_v61 = vpack.c.bf16 %v359_v56, %v358_v55  ;;  %v385_v62 = vpack.c.bf16 %v361_v58, %v360_v57  ;;  %v871_v63 = vsel %vm490_vm1, %v434_v59, 0  ;;  %v414_v2 = vld [vmem:[%s3140_s22 + $0xa0] sm:$0xff]  ;;  %v415_v3 = vld [vmem:[%s3140_s22 + $0xa8] sm:$0xff]  ;;  %v416_v4 = vld [vmem:[%s3140_s22 + $0xb0] sm:$0xff] }
  0x1c   : > { %2732 = vmatpush3.bf16.xpose.msra.mxu1 %v636_v22  ;;  %2727 = vmatprep.mubr.msk.bf16.mxu0 %vm3084_vm0, %v3083_v0  ;;  %v918_v1 = vsel %vm490_vm1, %v435_v60, 0  ;;  %v417_v5 = vld [vmem:[%s3140_s22 + $0xb8] sm:$0xff]  ;;  %v362_v6 = vld [vmem:[%s3150_s25 + $0x80] sm:$0xff]  ;;  %v363_v7 = vld [vmem:[%s3150_s25 + $0x88] sm:$0xff]  ;;  %v436_v10 = vpack.c.bf16 %v415_v3, %v414_v2 }
  0x1d   : > { %2733 = vmatprep.mubr.msk.bf16.mxu1 %vm3084_vm0, %v3083_v0  ;;  %2737 = vmatprep.subr.bf16.mxu0 %v3083_v0  ;;  %v364_v8 = vld [vmem:[%s3150_s25 + $0x90] sm:$0xff]  ;;  %v365_v9 = vld [vmem:[%s3150_s25 + $0x98] sm:$0xff]  ;;  %v437_v11 = vpack.c.bf16 %v417_v5, %v416_v4  ;;  %v386_v12 = vpack.c.bf16 %v363_v7, %v362_v6  ;;  %v418_v16 = vld [vmem:[%s3140_s22 + $0xc0] sm:$0xff] }
  0x1e   : > { %2743 = vmatprep.subr.bf16.mxu1 %v3083_v0  ;;  %v387_v13 = vpack.c.bf16 %v365_v9, %v364_v8  ;;  %v965_v14 = vsel %vm490_vm1, %v436_v10, 0  ;;  %v419_v17 = vld [vmem:[%s3140_s22 + $0xc8] sm:$0xff]  ;;  %v420_v18 = vld [vmem:[%s3140_s22 + $0xd0] sm:$0xff]  ;;  %v421_v19 = vld [vmem:[%s3140_s22 + $0xd8] sm:$0xff] }
  0x1f   : > { %v1012_v15 = vsel %vm490_vm1, %v437_v11, 0  ;;  %v366_v20 = vld [vmem:[%s3150_s25 + $0xa0] sm:$0xff]  ;;  %v367_v21 = vld [vmem:[%s3150_s25 + $0xa8] sm:$0xff]  ;;  %v368_v22 = vld [vmem:[%s3150_s25 + $0xb0] sm:$0xff]  ;;  %v438_v24 = vpack.c.bf16 %v419_v17, %v418_v16  ;;  %v439_v25 = vpack.c.bf16 %v421_v19, %v420_v18 }
  0x20   : > { %v369_v23 = vld [vmem:[%s3150_s25 + $0xb8] sm:$0xff]  ;;  %v388_v26 = vpack.c.bf16 %v367_v21, %v366_v20  ;;  %v422_v30 = vld [vmem:[%s3140_s22 + $0xe0] sm:$0xff]  ;;  %v423_v31 = vld [vmem:[%s3140_s22 + $0xe8] sm:$0xff] }
  0x21   : > { %v389_v27 = vpack.c.bf16 %v369_v23, %v368_v22  ;;  %v1059_v28 = vsel %vm490_vm1, %v438_v24, 0  ;;  %v1106_v29 = vsel %vm490_vm1, %v439_v25, 0  ;;  %v424_v32 = vld [vmem:[%s3140_s22 + $0xf0] sm:$0xff]  ;;  %v373_v37 = vld [vmem:[%s3150_s25 + $0xd8] sm:$0xff]  ;;  %v440_v38 = vpack.c.bf16 %v423_v31, %v422_v30  ;;  %v374_v44 = vld [vmem:[%s3150_s25 + $0xe0] sm:$0xff] }
  0x22   : > { %2728 = vmatmul.mubr.msk.bf16.vlgmr.msra.gmra.mxu0 %vm490_vm1, %v380_v33  ;;  %v425_v33 = vld [vmem:[%s3140_s22 + $0xf8] sm:$0xff]  ;;  %v375_v45 = vld [vmem:[%s3150_s25 + $0xe8] sm:$0xff]  ;;  %v376_v46 = vld [vmem:[%s3150_s25 + $0xf0] sm:$0xff] }
  0x23   : > { %2734 = vmatmul.mubr.msk.bf16.vlgmr.msra.gmra.mxu1 %vm490_vm1, %v381_v34  ;;  %2738 = vmatpush3.bf16.xpose.msra.mxu0 %v683_v35  ;;  %v370_v34 = vld [vmem:[%s3150_s25 + $0xc0] sm:$0xff]  ;;  %v371_v35 = vld [vmem:[%s3150_s25 + $0xc8] sm:$0xff]  ;;  %v441_v39 = vpack.c.bf16 %v425_v33, %v424_v32  ;;  %v1153_v42 = vsel %vm490_vm1, %v440_v38, 0  ;;  %v1277_v54 = vld [vmem:[%s3886_s3 + $0x10] sm:$0xff] }
  0x24   : > { %2744 = vmatpush3.bf16.xpose.msra.mxu1 %v730_v36  ;;  %2739 = vmatprep.mubr.msk.bf16.mxu0 %vm3084_vm0, %v3083_v0  ;;  %v372_v36 = vld [vmem:[%s3150_s25 + $0xd0] sm:$0xff]  ;;  %v390_v40 = vpack.c.bf16 %v371_v35, %v370_v34  ;;  %v1275_v51 = vld [vmem:[%s3886_s3] sm:$0xff]  ;;  %v1278_v2 = vld [vmem:[%s3886_s3 + $0x18] sm:$0xff] }
  0x25   : > { %2745 = vmatprep.mubr.msk.bf16.mxu1 %vm3084_vm0, %v3083_v0  ;;  %2749 = vmatprep.subr.bf16.mxu0 %v3083_v0  ;;  %v391_v41 = vpack.c.bf16 %v373_v37, %v372_v36  ;;  %v1200_v43 = vsel %vm490_vm1, %v441_v39, 0  ;;  %v1279_v10 = vld [vmem:[%s3886_s3 + $0x20] sm:$0xff]  ;;  %v1280_v22 = vld [vmem:[%s3886_s3 + $0x28] sm:$0xff]  ;;  %v1285_v38 = vld [vmem:[%s3886_s3 + $0x50] sm:$0xff] }
  0x26   : > { %2755 = vmatprep.subr.bf16.mxu1 %v3083_v0  ;;  %v1283_v33 = vld [vmem:[%s3886_s3 + $0x40] sm:$0xff] }
  0x2a   : > { %2740 = vmatmul.mubr.msk.bf16.vlgmr.msra.gmra.mxu0 %vm490_vm1, %v382_v47  ;;  %v377_v47 = vld [vmem:[%s3150_s25 + $0xf8] sm:$0xff] }
  0x2b   : > { %2746 = vmatmul.mubr.msk.bf16.vlgmr.msra.gmra.mxu1 %vm490_vm1, %v383_v48  ;;  %2750 = vmatpush3.bf16.xpose.msra.mxu0 %v777_v49  ;;  %v392_v48 = vpack.c.bf16 %v375_v45, %v374_v44  ;;  %v393_v49 = vpack.c.bf16 %v377_v47, %v376_v46  ;;  %v1284_v45 = vld [vmem:[%s3886_s3 + $0x48] sm:$0xff] }
  0x2c   : > { %2756 = vmatpush3.bf16.xpose.msra.mxu1 %v824_v50  ;;  %2751 = vmatprep.mubr.msk.bf16.mxu0 %vm3084_vm0, %v3083_v0 }
  0x2d   : > { %2757 = vmatprep.mubr.msk.bf16.mxu1 %vm3084_vm0, %v3083_v0  ;;  %2761 = vmatprep.subr.bf16.mxu0 %v3083_v0 }
  0x2e   : > { %2767 = vmatprep.subr.bf16.mxu1 %v3083_v0 }
  0x32   : > { %2752 = vmatmul.mubr.msk.bf16.vlgmr.msra.gmra.mxu0 %vm490_vm1, %v384_v61  ;;  %v1276_v61 = vld [vmem:[%s3886_s3 + $0x8] sm:$0xff] }
  0x33   : > { %2758 = vmatmul.mubr.msk.bf16.vlgmr.msra.gmra.mxu1 %vm490_vm1, %v385_v62  ;;  %2762 = vmatpush3.bf16.xpose.msra.mxu0 %v871_v63 }
  0x34   : > { %2768 = vmatpush3.bf16.xpose.msra.mxu1 %v918_v1  ;;  %2763 = vmatprep.mubr.msk.bf16.mxu0 %vm3084_vm0, %v3083_v0 }
  0x35   : > { %2769 = vmatprep.mubr.msk.bf16.mxu1 %vm3084_vm0, %v3083_v0  ;;  %2773 = vmatprep.subr.bf16.mxu0 %v3083_v0 }
  0x36   : > { %2779 = vmatprep.subr.bf16.mxu1 %v3083_v0 }
  0x3a   : > { %2764 = vmatmul.mubr.msk.bf16.vlgmr.msra.gmra.mxu0 %vm490_vm1, %v386_v12 }
  0x3b   : > { %2770 = vmatmul.mubr.msk.bf16.vlgmr.msra.gmra.mxu1 %vm490_vm1, %v387_v13  ;;  %2774 = vmatpush3.bf16.xpose.msra.mxu0 %v965_v14  ;;  %v1281_v14 = vld [vmem:[%s3886_s3 + $0x30] sm:$0xff] }
  0x3c   : > { %2780 = vmatpush3.bf16.xpose.msra.mxu1 %v1012_v15  ;;  %2775 = vmatprep.mubr.msk.bf16.mxu0 %vm3084_vm0, %v3083_v0 }
  0x3d   : > { %2781 = vmatprep.mubr.msk.bf16.mxu1 %vm3084_vm0, %v3083_v0  ;;  %2785 = vmatprep.subr.bf16.mxu0 %v3083_v0 }
  0x3e   : > { %2791 = vmatprep.subr.bf16.mxu1 %v3083_v0 }
  0x42   : > { %2776 = vmatmul.mubr.msk.bf16.vlgmr.msra.gmra.mxu0 %vm490_vm1, %v388_v26 }
  0x43   : > { %2782 = vmatmul.mubr.msk.bf16.vlgmr.msra.gmra.mxu1 %vm490_vm1, %v389_v27  ;;  %2786 = vmatpush3.bf16.xpose.msra.mxu0 %v1059_v28  ;;  %v1282_v28 = vld [vmem:[%s3886_s3 + $0x38] sm:$0xff] }
  0x44   : > { %2792 = vmatpush3.bf16.xpose.msra.mxu1 %v1106_v29  ;;  %2787 = vmatprep.mubr.msk.bf16.mxu0 %vm3084_vm0, %v3083_v0 }
  0x45   : > { %2793 = vmatprep.mubr.msk.bf16.mxu1 %vm3084_vm0, %v3083_v0  ;;  %2797 = vmatprep.subr.bf16.mxu0 %v3083_v0 }
  0x46   : > { %2803 = vmatprep.subr.bf16.mxu1 %v3083_v0 }
  0x4a   : > { %2788 = vmatmul.mubr.msk.bf16.vlgmr.msra.gmra.mxu0 %vm490_vm1, %v390_v40 }
  0x4b   : > { %2794 = vmatmul.mubr.msk.bf16.vlgmr.msra.gmra.mxu1 %vm490_vm1, %v391_v41  ;;  %2798 = vmatpush3.bf16.xpose.msra.mxu0 %v1153_v42 }
  0x4c   : > { %2804 = vmatpush3.bf16.xpose.msra.mxu1 %v1200_v43  ;;  %2799 = vmatprep.mubr.msk.bf16.mxu0 %vm3084_vm0, %v3083_v0 }
  0x4d   : > { %2805 = vmatprep.mubr.msk.bf16.mxu1 %vm3084_vm0, %v3083_v0  ;;  %2809 = vmatprep.subr.bf16.mxu0 %v3083_v0 }
  0x4e   : > { %2815 = vmatprep.subr.bf16.mxu1 %v3083_v0 }
  0x52   : > { %2800 = vmatmul.mubr.msk.bf16.vlgmr.msra.gmra.mxu0 %vm490_vm1, %v392_v48 }
  0x53   : > { %2806 = vmatmul.mubr.msk.bf16.vlgmr.msra.gmra.mxu1 %vm490_vm1, %v393_v49  ;;  %2811 = vmatprep.mubr.msk.bf16.mxu0 %vm3084_vm0, %v3083_v0 }
  0x54   : > { %2817 = vmatprep.mubr.msk.bf16.mxu1 %vm3084_vm0, %v3083_v0 }
  0xda   : > { %v531_v50 = vpop.f32.mrf.mxu0 }
  0xdb   : > { %v1243_v52 = vmul.f32 0.35355338, %v531_v50  ;;  %v578_v53 = vpop.f32.mrf.mxu1 }
  0xdc   : > { %v1245_v55 = vmul.f32 0.35355338, %v578_v53  ;;  %v2717_v56 = vpop.f32.mrf.mxu0 }
  0xdd   : > { %v2723_v57 = vpop.f32.mrf.mxu1  ;;  %v3298_v58 = vadd.f32 %v1275_v51, %v1243_v52  ;;  %v1286_v52 = vld [vmem:[%s3886_s3 + $0x58] sm:$0xff] }
  0xde   : > { %v534_v59 = vpop.f32.mrf.mxu0  ;;  %v3300_v60 = vadd.f32 %v1277_v54, %v1245_v55  ;;  %v1287_v57 = vld [vmem:[%s3886_s3 + $0x60] sm:$0xff] }
  0xdf   : > { %v1244_v62 = vmul.f32 0.35355338, %v534_v59  ;;  %v581_v63 = vpop.f32.mrf.mxu1  ;;  %v1340_v1 = vsel %vm1339_vm2, %v3298_v58, -inf }
  0xe0   : > { %v1246_v3 = vmul.f32 0.35355338, %v581_v63  ;;  %v1346_v4 = vsel %vm1339_vm2, %v3300_v60, -inf  ;;  %1341 = vmax.xlane.f32.xlu0 %v1340_v1  ;;  %v2718_v5 = vpop.f32.mrf.mxu0  ;;  %v1289_v1 = vld [vmem:[%s3886_s3 + $0x70] sm:$0xff] }
  0xe1   : > { %1347 = vmax.xlane.f32.xlu1 %v1346_v4  ;;  %v2724_v6 = vpop.f32.mrf.mxu1  ;;  %v3312_v7 = vadd.f32 %v1276_v61, %v1244_v62 }
  0xe2   : > { %v625_v8 = vpop.f32.mrf.mxu0  ;;  %v3314_v9 = vadd.f32 %v1278_v2, %v1246_v3 }
  0xe3   : > { %v1247_v11 = vmul.f32 0.35355338, %v625_v8  ;;  %v672_v12 = vpop.f32.mrf.mxu1  ;;  %v1343_v13 = vsel %vm1339_vm2, %v3312_v7, -inf }
  0xe4   : > { %v1249_v15 = vmul.f32 0.35355338, %v672_v12  ;;  %v1349_v16 = vsel %vm1339_vm2, %v3314_v9, -inf  ;;  %1344 = vmax.xlane.f32.xlu0 %v1343_v13  ;;  %v2729_v17 = vpop.f32.mrf.mxu0 }
  0xe5   : > { %1350 = vmax.xlane.f32.xlu1 %v1349_v16  ;;  %v2735_v18 = vpop.f32.mrf.mxu1  ;;  %v3326_v19 = vadd.f32 %v1279_v10, %v1247_v11  ;;  %v1288_v10 = vld [vmem:[%s3886_s3 + $0x68] sm:$0xff]  ;;  %v1290_v17 = vld [vmem:[%s3886_s3 + $0x78] sm:$0xff] }
  0xe6   : > { %v628_v20 = vpop.f32.mrf.mxu0  ;;  %v3328_v21 = vadd.f32 %v1281_v14, %v1249_v15 }
  0xe7   : > { %v1248_v23 = vmul.f32 0.35355338, %v628_v20  ;;  %v675_v24 = vpop.f32.mrf.mxu1  ;;  %v1352_v25 = vsel %vm1339_vm2, %v3326_v19, -inf }
  0xe8   : > { %v1250_v26 = vmul.f32 0.35355338, %v675_v24  ;;  %1353 = vmax.xlane.f32.xlu0 %v1352_v25  ;;  %v2730_v27 = vpop.f32.mrf.mxu0  ;;  %v1358_v30 = vsel %vm1339_vm2, %v3328_v21, -inf  ;;  %v1291_v24 = vld [vmem:[%s3886_s3 + $0x80] sm:$0xff] }
  0xe9   : > { %v2736_v29 = vpop.f32.mrf.mxu1  ;;  %v3340_v31 = vadd.f32 %v1280_v22, %v1248_v23 }
  0xea   : > { %v719_v32 = vpop.f32.mrf.mxu0  ;;  %v3347_v37 = vadd.f32 %v1282_v28, %v1250_v26  ;;  %v1293_v29 = vld [vmem:[%s3886_s3 + $0x90] sm:$0xff] }
  0xeb   : > { %v1251_v34 = vmul.f32 0.35355338, %v719_v32  ;;  %v766_v35 = vpop.f32.mrf.mxu1  ;;  %v1355_v36 = vsel %vm1339_vm2, %v3340_v31, -inf }
  0xec   : > { %v1253_v39 = vmul.f32 0.35355338, %v766_v35  ;;  %1359 = vmax.xlane.f32.xlu0 %v1358_v30  ;;  %1356 = vmax.xlane.f32.xlu1 %v1355_v36  ;;  %v2741_v40 = vpop.f32.mrf.mxu0  ;;  %v1361_v48 = vsel %vm1339_vm2, %v3347_v37, -inf }
  0xed   : > { %v2747_v41 = vpop.f32.mrf.mxu1  ;;  %v3352_v42 = vadd.f32 %v1283_v33, %v1251_v34 }
  0xee   : > { %v722_v43 = vpop.f32.mrf.mxu0  ;;  %v3354_v44 = vadd.f32 %v1285_v38, %v1253_v39  ;;  %v1292_v38 = vld [vmem:[%s3886_s3 + $0x88] sm:$0xff] }
  0xef   : > { %v1252_v46 = vmul.f32 0.35355338, %v722_v43  ;;  %v769_v47 = vpop.f32.mrf.mxu1  ;;  %v1364_v49 = vsel %vm1339_vm2, %v3352_v42, -inf }
  0xf0   : > { %v1254_v50 = vmul.f32 0.35355338, %v769_v47  ;;  %1362 = vmax.xlane.f32.xlu1 %v1361_v48  ;;  %1365 = vmax.xlane.f32.xlu0 %v1364_v49  ;;  %v2742_v51 = vpop.f32.mrf.mxu0  ;;  %v1370_v54 = vsel %vm1339_vm2, %v3354_v44, -inf  ;;  %v1294_v47 = vld [vmem:[%s3886_s3 + $0x98] sm:$0xff] }
  0xf1   : > { %v2748_v53 = vpop.f32.mrf.mxu1  ;;  %v3368_v55 = vadd.f32 %v1284_v45, %v1252_v46 }
  0xf2   : > { %v813_v56 = vpop.f32.mrf.mxu0  ;;  %v3375_v63 = vadd.f32 %v1286_v52, %v1254_v50  ;;  %v1295_v52 = vld [vmem:[%s3886_s3 + $0xa0] sm:$0xff] }
  0xf3   : > { %v1255_v59 = vmul.f32 0.35355338, %v813_v56  ;;  %v860_v61 = vpop.f32.mrf.mxu1  ;;  %v1367_v62 = vsel %vm1339_vm2, %v3368_v55, -inf }
  0xf4   : > { %v1257_v2 = vmul.f32 0.35355338, %v860_v61  ;;  %1371 = vmax.xlane.f32.xlu0 %v1370_v54  ;;  %1368 = vmax.xlane.f32.xlu1 %v1367_v62  ;;  %v2753_v3 = vpop.f32.mrf.mxu0  ;;  %v1373_v13 = vsel %vm1339_vm2, %v3375_v63, -inf }
  0xf5   : > { %v2759_v4 = vpop.f32.mrf.mxu1  ;;  %v3380_v5 = vadd.f32 %v1287_v57, %v1255_v59  ;;  %v1297_v59 = vld [vmem:[%s3886_s3 + $0xb0] sm:$0xff] }
  0xf6   : > { %v816_v6 = vpop.f32.mrf.mxu0  ;;  %v3382_v8 = vadd.f32 %v1289_v1, %v1257_v2 }
  0xf7   : > { %v1256_v11 = vmul.f32 0.35355338, %v816_v6  ;;  %v863_v12 = vpop.f32.mrf.mxu1  ;;  %v1376_v14 = vsel %vm1339_vm2, %v3380_v5, -inf  ;;  %v1296_v6 = vld [vmem:[%s3886_s3 + $0xa8] sm:$0xff] }
  0xf8   : > { %v1258_v15 = vmul.f32 0.35355338, %v863_v12  ;;  %1374 = vmax.xlane.f32.xlu1 %v1373_v13  ;;  %1377 = vmax.xlane.f32.xlu0 %v1376_v14  ;;  %v2754_v16 = vpop.f32.mrf.mxu0  ;;  %v1382_v20 = vsel %vm1339_vm2, %v3382_v8, -inf }
  0xf9   : > { %v2760_v18 = vpop.f32.mrf.mxu1  ;;  %v3396_v22 = vadd.f32 %v1288_v10, %v1256_v11  ;;  %v1298_v16 = vld [vmem:[%s3886_s3 + $0xb8] sm:$0xff] }
  0xfa   : > { %v907_v23 = vpop.f32.mrf.mxu0  ;;  %v3403_v28 = vadd.f32 %v1290_v17, %v1258_v15 }
  0xfb   : > { %v1259_v25 = vmul.f32 0.35355338, %v907_v23  ;;  %v954_v26 = vpop.f32.mrf.mxu1  ;;  %v1379_v27 = vsel %vm1339_vm2, %v3396_v22, -inf }
  0xfc   : > { %v1261_v30 = vmul.f32 0.35355338, %v954_v26  ;;  %1383 = vmax.xlane.f32.xlu0 %v1382_v20  ;;  %1380 = vmax.xlane.f32.xlu1 %v1379_v27  ;;  %v2765_v32 = vpop.f32.mrf.mxu0  ;;  %v1385_v41 = vsel %vm1339_vm2, %v3403_v28, -inf }
  0xfd   : > { %v2771_v33 = vpop.f32.mrf.mxu1  ;;  %v3408_v34 = vadd.f32 %v1291_v24, %v1259_v25  ;;  %v1299_v24 = vld [vmem:[%s3886_s3 + $0xc0] sm:$0xff] }
  0xfe   : > { %v910_v35 = vpop.f32.mrf.mxu0  ;;  %v3410_v36 = vadd.f32 %v1293_v29, %v1261_v30  ;;  %v1301_v30 = vld [vmem:[%s3886_s3 + $0xd0] sm:$0xff] }
  0xff   : > { %v1260_v39 = vmul.f32 0.35355338, %v910_v35  ;;  %v957_v40 = vpop.f32.mrf.mxu1  ;;  %v1388_v43 = vsel %vm1339_vm2, %v3408_v34, -inf }
 0x100   : > { %v1262_v45 = vmul.f32 0.35355338, %v957_v40  ;;  %1386 = vmax.xlane.f32.xlu1 %v1385_v41  ;;  %1389 = vmax.xlane.f32.xlu0 %v1388_v43  ;;  %v2766_v46 = vpop.f32.mrf.mxu0  ;;  %v1394_v49 = vsel %vm1339_vm2, %v3410_v36, -inf  ;;  %v1300_v41 = vld [vmem:[%s3886_s3 + $0xc8] sm:$0xff] }
 0x101   : > { %v2772_v48 = vpop.f32.mrf.mxu1  ;;  %v3424_v50 = vadd.f32 %v1292_v38, %v1260_v39 }
 0x102   : > { %v1001_v51 = vpop.f32.mrf.mxu0  ;;  %v3431_v57 = vadd.f32 %v1294_v47, %v1262_v45 }
 0x103   : > { %v1263_v53 = vmul.f32 0.35355338, %v1001_v51  ;;  %v1048_v54 = vpop.f32.mrf.mxu1  ;;  %v1391_v56 = vsel %vm1339_vm2, %v3424_v50, -inf  ;;  %v1302_v51 = vld [vmem:[%s3886_s3 + $0xd8] sm:$0xff] }
 0x104   : > { %v1265_v61 = vmul.f32 0.35355338, %v1048_v54  ;;  %1395 = vmax.xlane.f32.xlu0 %v1394_v49  ;;  %1392 = vmax.xlane.f32.xlu1 %v1391_v56  ;;  %v2777_v62 = vpop.f32.mrf.mxu0  ;;  %v1397_v12 = vsel %vm1339_vm2, %v3431_v57, -inf }
 0x105   : > { %v2783_v1 = vpop.f32.mrf.mxu1  ;;  %v3436_v2 = vadd.f32 %v1295_v52, %v1263_v53 }
 0x106   : > { %v1004_v3 = vpop.f32.mrf.mxu0  ;;  %v3438_v4 = vadd.f32 %v1297_v59, %v1265_v61  ;;  %v1303_v59 = vld [vmem:[%s3886_s3 + $0xe0] sm:$0xff] }
 0x107   : > { %v1264_v10 = vmul.f32 0.35355338, %v1004_v3  ;;  %v1051_v11 = vpop.f32.mrf.mxu1  ;;  %v1400_v13 = vsel %vm1339_vm2, %v3436_v2, -inf }
 0x108   : > { %v1266_v14 = vmul.f32 0.35355338, %v1051_v11  ;;  %1398 = vmax.xlane.f32.xlu1 %v1397_v12  ;;  %1401 = vmax.xlane.f32.xlu0 %v1400_v13  ;;  %v2778_v15 = vpop.f32.mrf.mxu0  ;;  %v1406_v18 = vsel %vm1339_vm2, %v3438_v4, -inf }
 0x109   : > { %v2784_v17 = vpop.f32.mrf.mxu1  ;;  %v3452_v20 = vadd.f32 %v1296_v6, %v1264_v10  ;;  %v1305_v6 = vld [vmem:[%s3886_s3 + $0xf0] sm:$0xff] }
 0x10a   : > { %v1095_v23 = vpop.f32.mrf.mxu0  ;;  %v3459_v29 = vadd.f32 %v1298_v16, %v1266_v14  ;;  %v1304_v16 = vld [vmem:[%s3886_s3 + $0xe8] sm:$0xff] }
 0x10b   : > { %v1267_v25 = vmul.f32 0.35355338, %v1095_v23  ;;  %v1142_v26 = vpop.f32.mrf.mxu1  ;;  %v1403_v27 = vsel %vm1339_vm2, %v3452_v20, -inf }
 0x10c   : > { %v1269_v32 = vmul.f32 0.35355338, %v1142_v26  ;;  %1407 = vmax.xlane.f32.xlu0 %v1406_v18  ;;  %1404 = vmax.xlane.f32.xlu1 %v1403_v27  ;;  %v2789_v33 = vpop.f32.mrf.mxu0  ;;  %v1409_v46 = vsel %vm1339_vm2, %v3459_v29, -inf  ;;  %v1306_v27 = vld [vmem:[%s3886_s3 + $0xf8] sm:$0xff] }
 0x10d   : > { %v2795_v35 = vpop.f32.mrf.mxu1  ;;  %v3464_v38 = vadd.f32 %v1299_v24, %v1267_v25 }
 0x10e   : > { %v1098_v39 = vpop.f32.mrf.mxu0  ;;  %v3466_v40 = vadd.f32 %v1301_v30, %v1269_v32 }
 0x10f   : > { %v1268_v43 = vmul.f32 0.35355338, %v1098_v39  ;;  %v1145_v45 = vpop.f32.mrf.mxu1  ;;  %v1412_v47 = vsel %vm1339_vm2, %v3464_v38, -inf }
 0x110   : > { %v1270_v48 = vmul.f32 0.35355338, %v1145_v45  ;;  %1410 = vmax.xlane.f32.xlu1 %v1409_v46  ;;  %1413 = vmax.xlane.f32.xlu0 %v1412_v47  ;;  %v2790_v49 = vpop.f32.mrf.mxu0  ;;  %v1418_v53 = vsel %vm1339_vm2, %v3466_v40, -inf }
 0x111   : > { %v2796_v52 = vpop.f32.mrf.mxu1  ;;  %v3480_v54 = vadd.f32 %v1300_v41, %v1268_v43 }
 0x112   : > { %v1189_v56 = vpop.f32.mrf.mxu0  ;;  %v3487_v3 = vadd.f32 %v1302_v51, %v1270_v48 }
 0x113   : > { %v1271_v61 = vmul.f32 0.35355338, %v1189_v56  ;;  %v1236_v62 = vpop.f32.mrf.mxu1  ;;  %v1415_v1 = vsel %vm1339_vm2, %v3480_v54, -inf }
 0x114   : > { %v1273_v10 = vmul.f32 0.35355338, %v1236_v62  ;;  %1419 = vmax.xlane.f32.xlu0 %v1418_v53  ;;  %1416 = vmax.xlane.f32.xlu1 %v1415_v1  ;;  %v2801_v11 = vpop.f32.mrf.mxu0  ;;  %v1421_v23 = vsel %vm1339_vm2, %v3487_v3, -inf }
 0x115   : > { %v2807_v12 = vpop.f32.mrf.mxu1  ;;  %v3492_v13 = vadd.f32 %v1303_v59, %v1271_v61 }
 0x116   : > { %v1192_v14 = vpop.f32.mrf.mxu0  ;;  %v3494_v15 = vadd.f32 %v1305_v6, %v1273_v10 }
 0x117   : > { %v1272_v17 = vmul.f32 0.35355338, %v1192_v14  ;;  %v1239_v18 = vpop.f32.mrf.mxu1  ;;  %v1424_v24 = vsel %vm1339_vm2, %v3492_v13, -inf }
 0x118   : > { %v1274_v25 = vmul.f32 0.35355338, %v1239_v18  ;;  %1422 = vmax.xlane.f32.xlu1 %v1421_v23  ;;  %1425 = vmax.xlane.f32.xlu0 %v1424_v24  ;;  %v2802_v26 = vpop.f32.mrf.mxu0  ;;  %v1430_v32 = vsel %vm1339_vm2, %v3494_v15, -inf }
 0x119   : > { %v2808_v30 = vpop.f32.mrf.mxu1  ;;  %v3508_v33 = vadd.f32 %v1304_v16, %v1272_v17 }
 0x11a   : > { %v3512_v39 = vadd.f32 %v1306_v27, %v1274_v25 }
 0x11b   : > { %v1427_v35 = vsel %vm1339_vm2, %v3508_v33, -inf }
 0x11c   : > { %1431 = vmax.xlane.f32.xlu0 %v1430_v32  ;;  %1428 = vmax.xlane.f32.xlu1 %v1427_v35  ;;  %v1433_v41 = vsel %vm1339_vm2, %v3512_v39, -inf }
 0x120   : > { %1434 = vmax.xlane.f32.xlu1 %v1433_v41 }
 0x169   : > { %v1342_v43 = vpop.xlane.xlu0 %1341 }
 0x16a   : > { %v1348_v45 = vpop.xlane.xlu1 %1347  ;;  %v1436_v46 = vsub.f32 %v3298_v58, %v1342_v43 }
 0x16b   : > { %v1438_v47 = vsub.f32 %v3300_v60, %v1348_v45 }
 0x16c   : > { %v1468_v48 = vmul.f32 1.442695, %v1436_v46 }
 0x16d   : > { %v1472_v49 = vmul.f32 1.442695, %v1438_v47  ;;  %v1345_v51 = vpop.xlane.xlu0 %1344 }
 0x16e   : > { %2931 = vpow2.f32 %v1468_v48  ;;  %v1351_v52 = vpop.xlane.xlu1 %1350  ;;  %v1437_v53 = vsub.f32 %v3312_v7, %v1345_v51 }
 0x16f   : > { %v1439_v56 = vsub.f32 %v3314_v9, %v1351_v52  ;;  %2933 = vpow2.f32 %v1472_v49 }
 0x170   : > { %v1470_v59 = vmul.f32 1.442695, %v1437_v53 }
 0x171   : > { %v1474_v61 = vmul.f32 1.442695, %v1439_v56  ;;  %v1354_v62 = vpop.xlane.xlu0 %1353 }
 0x172   : > { %2935 = vpow2.f32 %v1470_v59  ;;  %v1440_v1 = vsub.f32 %v3326_v19, %v1354_v62 }
 0x173   : > { %2937 = vpow2.f32 %v1474_v61 }
 0x174   : > { %v1476_v58 = vmul.f32 1.442695, %v1440_v1 }
 0x175   : > { %v1360_v6 = vpop.xlane.xlu0 %1359  ;;  %v1357_v60 = vpop.xlane.xlu1 %1356 }
 0x176   : > { %2939 = vpow2.f32 %v1476_v58  ;;  %v1442_v10 = vsub.f32 %v3328_v21, %v1360_v6  ;;  %v1441_v11 = vsub.f32 %v3340_v31, %v1357_v60 }
 0x178   : > { %v1480_v12 = vmul.f32 1.442695, %v1442_v10  ;;  %v1478_v7 = vmul.f32 1.442695, %v1441_v11 }
 0x179   : > { %v1363_v14 = vpop.xlane.xlu1 %1362  ;;  %v1366_v9 = vpop.xlane.xlu0 %1365 }
 0x17a   : > { %2941 = vpow2.f32 %v1480_v12  ;;  %v1443_v16 = vsub.f32 %v3347_v37, %v1363_v14  ;;  %v1444_v17 = vsub.f32 %v3352_v42, %v1366_v9 }
 0x17b   : > { %v3525_v18 = vpop.eup %2931  ;;  %2943 = vpow2.f32 %v1478_v7 }
 0x17c   : > { %v1482_v19 = vmul.f32 1.442695, %v1443_v16  ;;  %v1484_v23 = vmul.f32 1.442695, %v1444_v17  ;;  %v1532_v24 = vsel %vm1339_vm2, %v3525_v18, 0.0  ;;  %v3529_v21 = vpop.eup %2933 }
 0x17d   : > { %v1372_v31 = vpop.xlane.xlu0 %1371  ;;  %v1369_v25 = vpop.xlane.xlu1 %1368  ;;  %1533 = vadd.xlane.f32.xlu0 %v1532_v24  ;;  %v1538_v32 = vsel %vm1339_vm2, %v3529_v21, 0.0 }
 0x17e   : > { %2945 = vpow2.f32 %v1482_v19  ;;  %v1446_v26 = vsub.f32 %v3354_v44, %v1372_v31  ;;  %v1445_v37 = vsub.f32 %v3368_v55, %v1369_v25 }
 0x17f   : > { %v3533_v27 = vpop.eup %2935  ;;  %2947 = vpow2.f32 %v1484_v23 }
 0x180   : > { %v1488_v42 = vmul.f32 1.442695, %v1446_v26  ;;  %v1486_v30 = vmul.f32 1.442695, %v1445_v37  ;;  %v1535_v35 = vsel %vm1339_vm2, %v3533_v27, 0.0  ;;  %v3539_v41 = vpop.eup %2937 }
 0x181   : > { %v1375_v43 = vpop.xlane.xlu1 %1374  ;;  %v1378_v45 = vpop.xlane.xlu0 %1377  ;;  %1539 = vadd.xlane.f32.xlu0 %v1538_v32  ;;  %1536 = vadd.xlane.f32.xlu1 %v1535_v35  ;;  %v1541_v51 = vsel %vm1339_vm2, %v3539_v41, 0.0 }
 0x182   : > { %2949 = vpow2.f32 %v1488_v42  ;;  %v1447_v44 = vsub.f32 %v3375_v63, %v1375_v43  ;;  %v1448_v55 = vsub.f32 %v3380_v5, %v1378_v45 }
 0x183   : > { %v3543_v46 = vpop.eup %2939  ;;  %2951 = vpow2.f32 %v1486_v30 }
 0x184   : > { %v1490_v47 = vmul.f32 1.442695, %v1447_v44  ;;  %v1492_v48 = vmul.f32 1.442695, %v1448_v55  ;;  %v1544_v49 = vsel %vm1339_vm2, %v3543_v46, 0.0 }
 0x185   : > { %v1384_v52 = vpop.xlane.xlu0 %1383  ;;  %v1381_v53 = vpop.xlane.xlu1 %1380  ;;  %1545 = vadd.xlane.f32.xlu0 %v1544_v49  ;;  %1542 = vadd.xlane.f32.xlu1 %v1541_v51 }
 0x186   : > { %2953 = vpow2.f32 %v1490_v47  ;;  %v1450_v63 = vsub.f32 %v3382_v8, %v1384_v52  ;;  %v1449_v5 = vsub.f32 %v3396_v22, %v1381_v53 }
 0x187   : > { %v3551_v56 = vpop.eup %2941  ;;  %2955 = vpow2.f32 %v1492_v48 }
 0x188   : > { %v3553_v59 = vpop.eup %2943  ;;  %v1496_v61 = vmul.f32 1.442695, %v1450_v63  ;;  %v1494_v62 = vmul.f32 1.442695, %v1449_v5  ;;  %v1550_v1 = vsel %vm1339_vm2, %v3551_v56, 0.0  ;;  %v442_v5 = vld [vmem:[%s3601_s26] sm:$0xff] }
 0x189   : > { %v1387_v58 = vpop.xlane.xlu1 %1386  ;;  %v1390_v6 = vpop.xlane.xlu0 %1389  ;;  %1551 = vadd.xlane.f32.xlu0 %v1550_v1  ;;  %v1547_v60 = vsel %vm1339_vm2, %v3553_v59, 0.0 }
 0x18a   : > { %2957 = vpow2.f32 %v1496_v61  ;;  %v1451_v8 = vsub.f32 %v3403_v28, %v1387_v58  ;;  %v1452_v22 = vsub.f32 %v3408_v34, %v1390_v6  ;;  %1548 = vadd.xlane.f32.xlu1 %v1547_v60  ;;  %v443_v61 = vld [vmem:[%s3601_s26 + $0x8] sm:$0xff]  ;;  %v445_v60 = vld [vmem:[%s3601_s26 + $0x18] sm:$0xff] }
 0x18b   : > { %v3561_v10 = vpop.eup %2945  ;;  %2959 = vpow2.f32 %v1494_v62  ;;  %v444_v62 = vld [vmem:[%s3601_s26 + $0x10] sm:$0xff]  ;;  %v474_v6 = vpack.c.bf16 %v443_v61, %v442_v5 }
 0x18c   : > { %v3563_v11 = vpop.eup %2947  ;;  %v1498_v12 = vmul.f32 1.442695, %v1451_v8  ;;  %v1500_v7 = vmul.f32 1.442695, %v1452_v22  ;;  %v1553_v14 = vsel %vm1339_vm2, %v3561_v10, 0.0  ;;  %v475_v22 = vpack.c.bf16 %v445_v60, %v444_v62 }
 0x18d   : > { %v1396_v9 = vpop.xlane.xlu0 %1395  ;;  %v1393_v16 = vpop.xlane.xlu1 %1392  ;;  %v1556_v17 = vsel %vm1339_vm2, %v3563_v11, 0.0  ;;  %2810 = vmatpush3.bf16.msra.mxu0 %v474_v6 }
 0x18e   : > { %2961 = vpow2.f32 %v1498_v12  ;;  %v1454_v28 = vsub.f32 %v3410_v36, %v1396_v9  ;;  %v1453_v34 = vsub.f32 %v3424_v50, %v1393_v16  ;;  %1557 = vadd.xlane.f32.xlu0 %v1556_v17  ;;  %1554 = vadd.xlane.f32.xlu1 %v1553_v14 }
 0x18f   : > { %v3571_v19 = vpop.eup %2949  ;;  %2963 = vpow2.f32 %v1500_v7  ;;  %2816 = vmatpush3.bf16.msra.mxu1 %v475_v22  ;;  %2821 = vmatprep.subr.bf16.mxu0 %v3083_v0 }
 0x190   : > { %v3573_v23 = vpop.eup %2951  ;;  %v1504_v24 = vmul.f32 1.442695, %v1454_v28  ;;  %v1502_v31 = vmul.f32 1.442695, %v1453_v34  ;;  %v1562_v25 = vsel %vm1339_vm2, %v3571_v19, 0.0  ;;  %2827 = vmatprep.subr.bf16.mxu1 %v3083_v0 }
 0x191   : > { %v1399_v26 = vpop.xlane.xlu1 %1398  ;;  %v1402_v37 = vpop.xlane.xlu0 %1401  ;;  %v1559_v42 = vsel %vm1339_vm2, %v3573_v23, 0.0 }
 0x192   : > { %2965 = vpow2.f32 %v1504_v24  ;;  %v1455_v36 = vsub.f32 %v3431_v57, %v1399_v26  ;;  %v1456_v50 = vsub.f32 %v3436_v2, %v1402_v37  ;;  %1563 = vadd.xlane.f32.xlu0 %v1562_v25  ;;  %1560 = vadd.xlane.f32.xlu1 %v1559_v42 }
 0x193   : > { %v3581_v30 = vpop.eup %2953  ;;  %2967 = vpow2.f32 %v1502_v31 }
 0x194   : > { %v3583_v32 = vpop.eup %2955  ;;  %v1506_v35 = vmul.f32 1.442695, %v1455_v36  ;;  %v1508_v43 = vmul.f32 1.442695, %v1456_v50  ;;  %v1565_v45 = vsel %vm1339_vm2, %v3581_v30, 0.0 }
 0x195   : > { %v1408_v44 = vpop.xlane.xlu0 %1407  ;;  %v1405_v55 = vpop.xlane.xlu1 %1404  ;;  %v1568_v57 = vsel %vm1339_vm2, %v3583_v32, 0.0 }
 0x196   : > { %2969 = vpow2.f32 %v1506_v35  ;;  %v1458_v2 = vsub.f32 %v3438_v4, %v1408_v44  ;;  %v1457_v47 = vsub.f32 %v3452_v20, %v1405_v55  ;;  %1569 = vadd.xlane.f32.xlu0 %v1568_v57  ;;  %1566 = vadd.xlane.f32.xlu1 %v1565_v45 }
 0x197   : > { %v3591_v48 = vpop.eup %2957  ;;  %2971 = vpow2.f32 %v1508_v43 }
 0x198   : > { %v3593_v49 = vpop.eup %2959  ;;  %v1512_v51 = vmul.f32 1.442695, %v1458_v2  ;;  %v1510_v52 = vmul.f32 1.442695, %v1457_v47  ;;  %v1574_v53 = vsel %vm1339_vm2, %v3591_v48, 0.0 }
 0x199   : > { %v1411_v4 = vpop.xlane.xlu1 %1410  ;;  %v1414_v20 = vpop.xlane.xlu0 %1413  ;;  %v1571_v63 = vsel %vm1339_vm2, %v3593_v49, 0.0 }
 0x19a   : > { %2973 = vpow2.f32 %v1512_v51  ;;  %v1459_v1 = vsub.f32 %v3459_v29, %v1411_v4  ;;  %v1460_v58 = vsub.f32 %v3464_v38, %v1414_v20  ;;  %1575 = vadd.xlane.f32.xlu0 %v1574_v53  ;;  %1572 = vadd.xlane.f32.xlu1 %v1571_v63 }
 0x19b   : > { %v3611_v8 = vpop.eup %2961  ;;  %2975 = vpow2.f32 %v1510_v52 }
 0x19c   : > { %v3613_v12 = vpop.eup %2963  ;;  %v1514_v7 = vmul.f32 1.442695, %v1459_v1  ;;  %v1516_v14 = vmul.f32 1.442695, %v1460_v58  ;;  %v1577_v9 = vsel %vm1339_vm2, %v3611_v8, 0.0 }
 0x19d   : > { %v1420_v16 = vpop.xlane.xlu0 %1419  ;;  %v1417_v29 = vpop.xlane.xlu1 %1416  ;;  %v1580_v38 = vsel %vm1339_vm2, %v3613_v12, 0.0 }
 0x19e   : > { %2977 = vpow2.f32 %v1514_v7  ;;  %v1462_v17 = vsub.f32 %v3466_v40, %v1420_v16  ;;  %v1461_v28 = vsub.f32 %v3480_v54, %v1417_v29  ;;  %1581 = vadd.xlane.f32.xlu0 %v1580_v38  ;;  %1578 = vadd.xlane.f32.xlu1 %v1577_v9 }
 0x19f   : > { %v3622_v34 = vpop.eup %2965  ;;  %2979 = vpow2.f32 %v1516_v14 }
 0x1a0   : > { %v3625_v24 = vpop.eup %2967  ;;  %v1520_v31 = vmul.f32 1.442695, %v1462_v17  ;;  %v1518_v25 = vmul.f32 1.442695, %v1461_v28  ;;  %v1586_v26 = vsel %vm1339_vm2, %v3622_v34, 0.0 }
 0x1a1   : > { %v1423_v37 = vpop.xlane.xlu1 %1422  ;;  %v1426_v42 = vpop.xlane.xlu0 %1425  ;;  %v1583_v40 = vsel %vm1339_vm2, %v3625_v24, 0.0 }
 0x1a2   : > { %2981 = vpow2.f32 %v1520_v31  ;;  %v1463_v54 = vsub.f32 %v3487_v3, %v1423_v37  ;;  %1587 = vadd.xlane.f32.xlu0 %v1586_v26  ;;  %v1464_v36 = vsub.f32 %v3492_v13, %v1426_v42  ;;  %1584 = vadd.xlane.f32.xlu1 %v1583_v40 }
 0x1a3   : > { %v3633_v50 = vpop.eup %2969  ;;  %2983 = vpow2.f32 %v1518_v25 }
 0x1a4   : > { %v3635_v35 = vpop.eup %2971  ;;  %v1522_v43 = vmul.f32 1.442695, %v1463_v54  ;;  %v1524_v45 = vmul.f32 1.442695, %v1464_v36  ;;  %v1589_v44 = vsel %vm1339_vm2, %v3633_v50, 0.0 }
 0x1a5   : > { %v1592_v55 = vsel %vm1339_vm2, %v3635_v35, 0.0  ;;  %v1432_v57 = vpop.xlane.xlu0 %1431  ;;  %v1429_v2 = vpop.xlane.xlu1 %1428 }
 0x1a6   : > { %2985 = vpow2.f32 %v1522_v43  ;;  %1593 = vadd.xlane.f32.xlu0 %v1592_v55  ;;  %v1466_v3 = vsub.f32 %v3494_v15, %v1432_v57  ;;  %1590 = vadd.xlane.f32.xlu1 %v1589_v44  ;;  %v1465_v13 = vsub.f32 %v3508_v33, %v1429_v2  ;;  %v446_v55 = vld [vmem:[%s3601_s26 + $0x20] sm:$0xff]  ;;  %v447_v57 = vld [vmem:[%s3601_s26 + $0x28] sm:$0xff] }
 0x1a7   : > { %v3643_v47 = vpop.eup %2973  ;;  %2987 = vpow2.f32 %v1524_v45 }
 0x1a8   : > { %v3645_v51 = vpop.eup %2975  ;;  %v1528_v52 = vmul.f32 1.442695, %v1466_v3  ;;  %v1526_v53 = vmul.f32 1.442695, %v1465_v13  ;;  %v1598_v4 = vsel %vm1339_vm2, %v3643_v47, 0.0 }
 0x1a9   : > { %v1595_v20 = vsel %vm1339_vm2, %v3645_v51, 0.0  ;;  %v1435_v63 = vpop.xlane.xlu1 %1434 }
 0x1aa   : > { %2989 = vpow2.f32 %v1528_v52  ;;  %1599 = vadd.xlane.f32.xlu0 %v1598_v4  ;;  %1596 = vadd.xlane.f32.xlu1 %v1595_v20  ;;  %v1467_v15 = vsub.f32 %v3512_v39, %v1435_v63  ;;  %v476_v20 = vpack.c.bf16 %v447_v57, %v446_v55 }
 0x1ab   : > { %v3652_v33 = vpop.eup %2977  ;;  %2991 = vpow2.f32 %v1526_v53 }
 0x1ac   : > { %v3654_v5 = vpop.eup %2979  ;;  %v1530_v61 = vmul.f32 1.442695, %v1467_v15  ;;  %v1601_v62 = vsel %vm1339_vm2, %v3652_v33, 0.0  ;;  %v448_v15 = vld [vmem:[%s3601_s26 + $0x30] sm:$0xff] }
 0x1ad   : > { %v1604_v1 = vsel %vm1339_vm2, %v3654_v5, 0.0 }
 0x1ae   : > { %2993 = vpow2.f32 %v1530_v61  ;;  %1605 = vadd.xlane.f32.xlu0 %v1604_v1  ;;  %1602 = vadd.xlane.f32.xlu1 %v1601_v62  ;;  %v449_v61 = vld [vmem:[%s3601_s26 + $0x38] sm:$0xff] }
 0x1af   : > { %v3660_v58 = vpop.eup %2981 }
 0x1b0   : > { %v3662_v6 = vpop.eup %2983  ;;  %v1610_v39 = vsel %vm1339_vm2, %v3660_v58, 0.0 }
 0x1b1   : > { %v1607_v60 = vsel %vm1339_vm2, %v3662_v6, 0.0 }
 0x1b2   : > { %1611 = vadd.xlane.f32.xlu0 %v1610_v39  ;;  %1608 = vadd.xlane.f32.xlu1 %v1607_v60 }
 0x1b3   : > { %v3668_v22 = vpop.eup %2985 }
 0x1b4   : > { %v3670_v7 = vpop.eup %2987  ;;  %v1613_v14 = vsel %vm1339_vm2, %v3668_v22, 0.0 }
 0x1b5   : > { %v1616_v9 = vsel %vm1339_vm2, %v3670_v7, 0.0 }
 0x1b6   : > { %1617 = vadd.xlane.f32.xlu0 %v1616_v9  ;;  %1614 = vadd.xlane.f32.xlu1 %v1613_v14  ;;  %v477_v14 = vpack.c.bf16 %v449_v61, %v448_v15  ;;  %v456_v61 = vld [vmem:[%s3601_s26 + $0x70] sm:$0xff] }
 0x1b7   : > { %v3676_v16 = vpop.eup %2989 }
 0x1b8   : > { %v3678_v29 = vpop.eup %2991  ;;  %v1622_v38 = vsel %vm1339_vm2, %v3676_v16, 0.0 }
 0x1b9   : > { %v1619_v17 = vsel %vm1339_vm2, %v3678_v29, 0.0 }
 0x1ba   : > { %1623 = vadd.xlane.f32.xlu0 %v1622_v38  ;;  %1620 = vadd.xlane.f32.xlu1 %v1619_v17  ;;  %v450_v38 = vld [vmem:[%s3601_s26 + $0x40] sm:$0xff]  ;;  %v451_v17 = vld [vmem:[%s3601_s26 + $0x48] sm:$0xff] }
 0x1bb   : > { %v3684_v28 = vpop.eup %2993 }
 0x1bc   : > { %v1625_v31 = vsel %vm1339_vm2, %v3684_v28, 0.0 }
 0x1be   : > { %1626 = vadd.xlane.f32.xlu1 %v1625_v31 }
 0x206   : > { %v1534_v25 = vpop.xlane.xlu0 %1533 }
 0x207   : > { %2995 = vrcp.f32 %v1534_v25 }
 0x20a   : > { %v1540_v26 = vpop.xlane.xlu0 %1539  ;;  %v1537_v37 = vpop.xlane.xlu1 %1536 }
 0x20b   : > { %2997 = vrcp.f32 %v1537_v37  ;;  %v478_v37 = vpack.c.bf16 %v451_v17, %v450_v38  ;;  %v459_v38 = vld [vmem:[%s3601_s26 + $0x88] sm:$0xff] }
 0x20c   : > { %2999 = vrcp.f32 %v1540_v26 }
 0x20e   : > { %v1546_v42 = vpop.xlane.xlu0 %1545  ;;  %v1543_v40 = vpop.xlane.xlu1 %1542 }
 0x20f   : > { %3001 = vrcp.f32 %v1543_v40 }
 0x210   : > { %3003 = vrcp.f32 %v1546_v42 }
 0x212   : > { %v1552_v54 = vpop.xlane.xlu0 %1551 }
 0x213   : > { %v1549_v36 = vpop.xlane.xlu1 %1548 }
 0x214   : > { %3005 = vrcp.f32 %v1549_v36  ;;  %v2996_v43 = vpop.eup %2995  ;;  %v453_v36 = vld [vmem:[%s3601_s26 + $0x58] sm:$0xff] }
 0x215   : > { %3007 = vrcp.f32 %v1552_v54  ;;  %v1660_v3 = vmul.f32 %v2996_v43, %v3525_v18  ;;  %v452_v54 = vld [vmem:[%s3601_s26 + $0x50] sm:$0xff] }
 0x216   : > { %v479_v57 = vpack.c.bf16 %v453_v36, %v452_v54 }
 0x217   : > { %v1558_v45 = vpop.xlane.xlu0 %1557  ;;  %v1555_v44 = vpop.xlane.xlu1 %1554 }
 0x218   : > { %v2998_v2 = vpop.eup %2997  ;;  %3009 = vrcp.f32 %v1555_v44 }
 0x219   : > { %v1661_v13 = vmul.f32 %v2998_v2, %v3533_v27  ;;  %v3000_v52 = vpop.eup %2999  ;;  %3011 = vrcp.f32 %v1558_v45 }
 0x21a   : > { %v1662_v1 = vmul.f32 %v3000_v52, %v3529_v21 }
 0x21b   : > { %v1564_v53 = vpop.xlane.xlu0 %1563  ;;  %v1561_v4 = vpop.xlane.xlu1 %1560  ;;  %v1692_v63 = vpack.c.bf16 %v1661_v13, %v1660_v3  ;;  %v454_v3 = vld [vmem:[%s3601_s26 + $0x60] sm:$0xff]  ;;  %v455_v13 = vld [vmem:[%s3601_s26 + $0x68] sm:$0xff] }
 0x21c   : > { %v3002_v62 = vpop.eup %3001  ;;  %3013 = vrcp.f32 %v1561_v4 }
 0x21d   : > { %2812 = vmatmul.mubr.msk.bf16.vlgmr.msra.gmra.mxu0 %vm1339_vm2, %v1692_v63  ;;  %v1663_v18 = vmul.f32 %v3002_v62, %v3539_v41  ;;  %v3004_v39 = vpop.eup %3003  ;;  %3015 = vrcp.f32 %v1564_v53  ;;  %v480_v63 = vpack.c.bf16 %v455_v13, %v454_v3  ;;  %v457_v62 = vld [vmem:[%s3601_s26 + $0x78] sm:$0xff] }
 0x21e   : > { %2822 = vmatpush3.bf16.msra.mxu0 %v476_v20  ;;  %2823 = vmatprep.mubr.msk.bf16.mxu0 %vm3084_vm0, %v3083_v0  ;;  %v1664_v21 = vmul.f32 %v3004_v39, %v3543_v46 }
 0x21f   : > { %v1570_v27 = vpop.xlane.xlu0 %1569  ;;  %v1567_v60 = vpop.xlane.xlu1 %1566  ;;  %v1693_v9 = vpack.c.bf16 %v1663_v18, %v1662_v1  ;;  %2833 = vmatprep.subr.bf16.mxu0 %v3083_v0 }
 0x220   : > { %3017 = vrcp.f32 %v1567_v60  ;;  %v481_v60 = vpack.c.bf16 %v457_v62, %v456_v61  ;;  %v466_v62 = vld [vmem:[%s3601_s26 + $0xc0] sm:$0xff] }
 0x221   : > { %v3006_v31 = vpop.eup %3005  ;;  %2818 = vmatmul.mubr.msk.bf16.vlgmr.msra.gmra.mxu1 %vm1339_vm2, %v1693_v9  ;;  %3019 = vrcp.f32 %v1570_v27  ;;  %v458_v9 = vld [vmem:[%s3601_s26 + $0x80] sm:$0xff] }
 0x222   : > { %v1665_v41 = vmul.f32 %v3006_v31, %v3553_v59  ;;  %2828 = vmatpush3.bf16.msra.mxu1 %v477_v14  ;;  %2829 = vmatprep.mubr.msk.bf16.mxu1 %vm3084_vm0, %v3083_v0  ;;  %v3008_v42 = vpop.eup %3007 }
 0x223   : > { %v1576_v25 = vpop.xlane.xlu0 %1575  ;;  %v1573_v26 = vpop.xlane.xlu1 %1572  ;;  %2839 = vmatprep.subr.bf16.mxu1 %v3083_v0  ;;  %v1666_v45 = vmul.f32 %v3008_v42, %v3551_v56  ;;  %v461_v42 = vld [vmem:[%s3601_s26 + $0x98] sm:$0xff] }
 0x224   : > { %v1694_v40 = vpack.c.bf16 %v1665_v41, %v1664_v21  ;;  %3021 = vrcp.f32 %v1573_v26 }
 0x225   : > { %v3010_v46 = vpop.eup %3009  ;;  %3023 = vrcp.f32 %v1576_v25  ;;  %v482_v25 = vpack.c.bf16 %v459_v38, %v458_v9  ;;  %v469_v9 = vld [vmem:[%s3601_s26 + $0xd8] sm:$0xff] }
 0x226   : > { %2824 = vmatmul.mubr.msk.bf16.vlgmr.msra.gmra.mxu0 %vm1339_vm2, %v1694_v40  ;;  %v1667_v44 = vmul.f32 %v3010_v46, %v3561_v10  ;;  %v3012_v55 = vpop.eup %3011 }
 0x227   : > { %v1582_v59 = vpop.xlane.xlu0 %1581  ;;  %v1579_v43 = vpop.xlane.xlu1 %1578  ;;  %2834 = vmatpush3.bf16.msra.mxu0 %v478_v37  ;;  %2835 = vmatprep.mubr.msk.bf16.mxu0 %vm3084_vm0, %v3083_v0  ;;  %v1668_v53 = vmul.f32 %v3012_v55, %v3563_v11  ;;  %v460_v37 = vld [vmem:[%s3601_s26 + $0x90] sm:$0xff] }
 0x228   : > { %2845 = vmatprep.subr.bf16.mxu0 %v3083_v0  ;;  %3025 = vrcp.f32 %v1579_v43  ;;  %v1695_v2 = vpack.c.bf16 %v1667_v44, %v1666_v45  ;;  %v462_v45 = vld [vmem:[%s3601_s26 + $0xa0] sm:$0xff]  ;;  %v463_v44 = vld [vmem:[%s3601_s26 + $0xa8] sm:$0xff] }
 0x229   : > { %v3014_v52 = vpop.eup %3013  ;;  %3027 = vrcp.f32 %v1582_v59  ;;  %v483_v59 = vpack.c.bf16 %v461_v42, %v460_v37  ;;  %v484_v13 = vpack.c.bf16 %v463_v44, %v462_v45 }
 0x22a   : > { %2830 = vmatmul.mubr.msk.bf16.vlgmr.msra.gmra.mxu1 %vm1339_vm2, %v1695_v2  ;;  %v1669_v4 = vmul.f32 %v3014_v52, %v3573_v23  ;;  %v3016_v20 = vpop.eup %3015 }
 0x22b   : > { %v1588_v56 = vpop.xlane.xlu0 %1587  ;;  %v1585_v10 = vpop.xlane.xlu1 %1584  ;;  %2840 = vmatpush3.bf16.msra.mxu1 %v479_v57  ;;  %2841 = vmatprep.mubr.msk.bf16.mxu1 %vm3084_vm0, %v3083_v0  ;;  %v1670_v18 = vmul.f32 %v3016_v20, %v3571_v19 }
 0x22c   : > { %3029 = vrcp.f32 %v1585_v10  ;;  %v1696_v15 = vpack.c.bf16 %v1669_v4, %v1668_v53  ;;  %2851 = vmatprep.subr.bf16.mxu1 %v3083_v0  ;;  %v465_v10 = vld [vmem:[%s3601_s26 + $0xb8] sm:$0xff] }
 0x22d   : > { %v3018_v1 = vpop.eup %3017  ;;  %3031 = vrcp.f32 %v1588_v56  ;;  %v464_v56 = vld [vmem:[%s3601_s26 + $0xb0] sm:$0xff] }
 0x22e   : > { %2836 = vmatmul.mubr.msk.bf16.vlgmr.msra.gmra.mxu0 %vm1339_vm2, %v1696_v15  ;;  %v1671_v39 = vmul.f32 %v3018_v1, %v3581_v30  ;;  %v3020_v27 = vpop.eup %3019  ;;  %v485_v15 = vpack.c.bf16 %v465_v10, %v464_v56  ;;  %v467_v1 = vld [vmem:[%s3601_s26 + $0xc8] sm:$0xff] }
 0x22f   : > { %v1594_v11 = vpop.xlane.xlu0 %1593  ;;  %v1591_v23 = vpop.xlane.xlu1 %1590  ;;  %2846 = vmatpush3.bf16.msra.mxu0 %v480_v63  ;;  %2847 = vmatprep.mubr.msk.bf16.mxu0 %vm3084_vm0, %v3083_v0  ;;  %v1672_v31 = vmul.f32 %v3020_v27, %v3583_v32  ;;  %v486_v27 = vpack.c.bf16 %v467_v1, %v466_v62 }
 0x230   : > { %3033 = vrcp.f32 %v1591_v23  ;;  %v1697_v14 = vpack.c.bf16 %v1671_v39, %v1670_v18  ;;  %2857 = vmatprep.subr.bf16.mxu0 %v3083_v0 }
 0x231   : > { %v3022_v17 = vpop.eup %3021  ;;  %3035 = vrcp.f32 %v1594_v11 }
 0x232   : > { %2842 = vmatmul.mubr.msk.bf16.vlgmr.msra.gmra.mxu1 %vm1339_vm2, %v1697_v14  ;;  %v1673_v21 = vmul.f32 %v3022_v17, %v3593_v49  ;;  %v3024_v41 = vpop.eup %3023  ;;  %v468_v14 = vld [vmem:[%s3601_s26 + $0xd0] sm:$0xff] }
 0x233   : > { %v1600_v19 = vpop.xlane.xlu0 %1599  ;;  %v1597_v30 = vpop.xlane.xlu1 %1596  ;;  %2852 = vmatpush3.bf16.msra.mxu1 %v481_v60  ;;  %2853 = vmatprep.mubr.msk.bf16.mxu1 %vm3084_vm0, %v3083_v0  ;;  %v1674_v54 = vmul.f32 %v3024_v41, %v3591_v48  ;;  %v471_v41 = vld [vmem:[%s3601_s26 + $0xe8] sm:$0xff] }
 0x234   : > { %3037 = vrcp.f32 %v1597_v30  ;;  %v1698_v26 = vpack.c.bf16 %v1673_v21, %v1672_v31  ;;  %2863 = vmatprep.subr.bf16.mxu1 %v3083_v0  ;;  %v487_v30 = vpack.c.bf16 %v469_v9, %v468_v14  ;;  %v470_v21 = vld [vmem:[%s3601_s26 + $0xe0] sm:$0xff] }
 0x235   : > { %v3026_v40 = vpop.eup %3025  ;;  %3039 = vrcp.f32 %v1600_v19  ;;  %v488_v37 = vpack.c.bf16 %v471_v41, %v470_v21 }
 0x236   : > { %2848 = vmatmul.mubr.msk.bf16.vlgmr.msra.gmra.mxu0 %vm1339_vm2, %v1698_v26  ;;  %v1675_v36 = vmul.f32 %v3026_v40, %v3611_v8  ;;  %v3028_v46 = vpop.eup %3027  ;;  %v472_v40 = vld [vmem:[%s3601_s26 + $0xf0] sm:$0xff] }
 0x237   : > { %v1606_v32 = vpop.xlane.xlu0 %1605  ;;  %v1603_v49 = vpop.xlane.xlu1 %1602  ;;  %2858 = vmatpush3.bf16.msra.mxu0 %v482_v25  ;;  %2859 = vmatprep.mubr.msk.bf16.mxu0 %vm3084_vm0, %v3083_v0  ;;  %v1676_v57 = vmul.f32 %v3028_v46, %v3613_v12 }
 0x238   : > { %3041 = vrcp.f32 %v1603_v49  ;;  %v1699_v43 = vpack.c.bf16 %v1675_v36, %v1674_v54  ;;  %2869 = vmatprep.subr.bf16.mxu0 %v3083_v0 }
 0x239   : > { %v3030_v55 = vpop.eup %3029  ;;  %3043 = vrcp.f32 %v1606_v32  ;;  %v473_v32 = vld [vmem:[%s3601_s26 + $0xf8] sm:$0xff] }
 0x23a   : > { %2854 = vmatmul.mubr.msk.bf16.vlgmr.msra.gmra.mxu1 %vm1339_vm2, %v1699_v43  ;;  %v1677_v2 = vmul.f32 %v3030_v55, %v3625_v24  ;;  %v3032_v3 = vpop.eup %3031 }
 0x23b   : > { %v1612_v48 = vpop.xlane.xlu0 %1611  ;;  %v1609_v8 = vpop.xlane.xlu1 %1608  ;;  %2864 = vmatpush3.bf16.msra.mxu1 %v483_v59  ;;  %2865 = vmatprep.mubr.msk.bf16.mxu1 %vm3084_vm0, %v3083_v0  ;;  %v1678_v4 = vmul.f32 %v3032_v3, %v3622_v34 }
 0x23c   : > { %3045 = vrcp.f32 %v1609_v8  ;;  %v1700_v52 = vpack.c.bf16 %v1677_v2, %v1676_v57  ;;  %2875 = vmatprep.subr.bf16.mxu1 %v3083_v0 }
 0x23d   : > { %v3034_v53 = vpop.eup %3033  ;;  %3047 = vrcp.f32 %v1612_v48 }
 0x23e   : > { %2860 = vmatmul.mubr.msk.bf16.vlgmr.msra.gmra.mxu0 %vm1339_vm2, %v1700_v52  ;;  %v1679_v20 = vmul.f32 %v3034_v53, %v3633_v50  ;;  %v3036_v63 = vpop.eup %3035 }
 0x23f   : > { %v1618_v12 = vpop.xlane.xlu0 %1617  ;;  %v1615_v24 = vpop.xlane.xlu1 %1614  ;;  %2870 = vmatpush3.bf16.msra.mxu0 %v484_v13  ;;  %2871 = vmatprep.mubr.msk.bf16.mxu0 %vm3084_vm0, %v3083_v0  ;;  %v1680_v23 = vmul.f32 %v3036_v63, %v3635_v35 }
 0x240   : > { %3049 = vrcp.f32 %v1615_v24  ;;  %v1701_v61 = vpack.c.bf16 %v1679_v20, %v1678_v4  ;;  %2881 = vmatprep.subr.bf16.mxu0 %v3083_v0 }
 0x241   : > { %v3038_v11 = vpop.eup %3037  ;;  %3051 = vrcp.f32 %v1618_v12 }
 0x242   : > { %2866 = vmatmul.mubr.msk.bf16.vlgmr.msra.gmra.mxu1 %vm1339_vm2, %v1701_v61  ;;  %v1681_v18 = vmul.f32 %v3038_v11, %v3645_v51  ;;  %v3040_v39 = vpop.eup %3039 }
 0x243   : > { %v1624_v34 = vpop.xlane.xlu0 %1623  ;;  %v1621_v50 = vpop.xlane.xlu1 %1620  ;;  %2876 = vmatpush3.bf16.msra.mxu1 %v485_v15  ;;  %2877 = vmatprep.mubr.msk.bf16.mxu1 %vm3084_vm0, %v3083_v0  ;;  %v1682_v51 = vmul.f32 %v3040_v39, %v3643_v47 }
 0x244   : > { %3053 = vrcp.f32 %v1621_v50  ;;  %v1702_v60 = vpack.c.bf16 %v1681_v18, %v1680_v23  ;;  %2887 = vmatprep.subr.bf16.mxu1 %v3083_v0 }
 0x245   : > { %v3042_v38 = vpop.eup %3041  ;;  %3055 = vrcp.f32 %v1624_v34 }
 0x246   : > { %2872 = vmatmul.mubr.msk.bf16.vlgmr.msra.gmra.mxu0 %vm1339_vm2, %v1702_v60  ;;  %v1683_v17 = vmul.f32 %v3042_v38, %v3652_v33  ;;  %v3044_v19 = vpop.eup %3043 }
 0x247   : > { %v1627_v35 = vpop.xlane.xlu1 %1626  ;;  %2882 = vmatpush3.bf16.msra.mxu0 %v486_v27  ;;  %2883 = vmatprep.mubr.msk.bf16.mxu0 %vm3084_vm0, %v3083_v0  ;;  %v1684_v47 = vmul.f32 %v3044_v19, %v3654_v5 }
 0x248   : > { %3057 = vrcp.f32 %v1627_v35  ;;  %v1703_v31 = vpack.c.bf16 %v1683_v17, %v1682_v51  ;;  %2893 = vmatprep.subr.bf16.mxu0 %v3083_v0 }
 0x249   : > { %v3046_v25 = vpop.eup %3045 }
 0x24a   : > { %2878 = vmatmul.mubr.msk.bf16.vlgmr.msra.gmra.mxu1 %vm1339_vm2, %v1703_v31  ;;  %v1685_v33 = vmul.f32 %v3046_v25, %v3662_v6  ;;  %v3048_v26 = vpop.eup %3047  ;;  %v489_v6 = vpack.c.bf16 %v473_v32, %v472_v40 }
 0x24b   : > { %2888 = vmatpush3.bf16.msra.mxu1 %v487_v30  ;;  %2889 = vmatprep.mubr.msk.bf16.mxu1 %vm3084_vm0, %v3083_v0  ;;  %v1686_v54 = vmul.f32 %v3048_v26, %v3660_v58 }
 0x24c   : > { %v1704_v42 = vpack.c.bf16 %v1685_v33, %v1684_v47  ;;  %2899 = vmatprep.subr.bf16.mxu1 %v3083_v0 }
 0x24d   : > { %v3050_v49 = vpop.eup %3049 }
 0x24e   : > { %2884 = vmatmul.mubr.msk.bf16.vlgmr.msra.gmra.mxu0 %vm1339_vm2, %v1704_v42  ;;  %v1687_v5 = vmul.f32 %v3050_v49, %v3668_v22  ;;  %v3052_v36 = vpop.eup %3051 }
 0x24f   : > { %2894 = vmatpush3.bf16.msra.mxu0 %v488_v37  ;;  %2895 = vmatprep.mubr.msk.bf16.mxu0 %vm3084_vm0, %v3083_v0  ;;  %v1688_v45 = vmul.f32 %v3052_v36, %v3670_v7 }
 0x250   : > { %v1705_v46 = vpack.c.bf16 %v1687_v5, %v1686_v54 }
 0x251   : > { %v3054_v59 = vpop.eup %3053 }
 0x252   : > { %v3056_v43 = vpop.eup %3055  ;;  %2890 = vmatmul.mubr.msk.bf16.vlgmr.msra.gmra.mxu1 %vm1339_vm2, %v1705_v46  ;;  %v1689_v44 = vmul.f32 %v3054_v59, %v3678_v29 }
 0x253   : > { %2900 = vmatpush3.bf16.msra.mxu1 %v489_v6  ;;  %2901 = vmatprep.mubr.msk.bf16.mxu1 %vm3084_vm0, %v3083_v0  ;;  %v1690_v55 = vmul.f32 %v3056_v43, %v3676_v16 }
 0x254   : > { %v1706_v22 = vpack.c.bf16 %v1689_v44, %v1688_v45 }
 0x255   : > { %v3058_v58 = vpop.eup %3057 }
 0x256   : > { %v1691_v48 = vmul.f32 %v3058_v58, %v3684_v28  ;;  %2896 = vmatmul.mubr.msk.bf16.vlgmr.msra.gmra.mxu0 %vm1339_vm2, %v1706_v22 }
 0x258   : > { %v1707_v8 = vpack.c.bf16 %v1691_v48, %v1690_v55 }
 0x25a   : > { %2902 = vmatmul.mubr.msk.bf16.vlgmr.msra.gmra.mxu1 %vm1339_vm2, %v1707_v8 }
 0x2dd   : > { %v1745_v0 = vpop.f32.mrf.mxu0 }
 0x2de   : > { %2412 = vst.msk [vmem:[%s3808_s29] sm:$0xff] %vm490_vm1, %v1745_v0 }
 0x2df   : > { %v2813_v7 = vpop.f32.mrf.mxu0 }
 0x2e1   : > { %v1748_v16 = vpop.f32.mrf.mxu0  ;;  %v1789_v29 = vpop.f32.mrf.mxu1 }
 0x2e2   : > { %2413 = vst.msk [vmem:[%s3808_s29 + $0x8] sm:$0xff] %vm490_vm1, %v1748_v16  ;;  %2414 = vst.msk [vmem:[%s3808_s29 + $0x10] sm:$0xff] %vm490_vm1, %v1789_v29 }
 0x2e3   : > { %v2814_v28 = vpop.f32.mrf.mxu0  ;;  %v2819_v57 = vpop.f32.mrf.mxu1 }
 0x2e5   : > { %v1792_v2 = vpop.f32.mrf.mxu1 }
 0x2e6   : > { %v1833_v3 = vpop.f32.mrf.mxu0  ;;  %2415 = vst.msk [vmem:[%s3808_s29 + $0x18] sm:$0xff] %vm490_vm1, %v1792_v2 }
 0x2e7   : > { %2416 = vst.msk [vmem:[%s3808_s29 + $0x20] sm:$0xff] %vm490_vm1, %v1833_v3  ;;  %v2820_v13 = vpop.f32.mrf.mxu1 }
 0x2e8   : > { %v2825_v52 = vpop.f32.mrf.mxu0 }
 0x2ea   : > { %v1836_v56 = vpop.f32.mrf.mxu0  ;;  %v1877_v10 = vpop.f32.mrf.mxu1 }
 0x2eb   : > { %2417 = vst.msk [vmem:[%s3808_s29 + $0x28] sm:$0xff] %vm490_vm1, %v1836_v56  ;;  %2418 = vst.msk [vmem:[%s3808_s29 + $0x30] sm:$0xff] %vm490_vm1, %v1877_v10 }
 0x2ec   : > { %v2826_v53 = vpop.f32.mrf.mxu0  ;;  %v2831_v12 = vpop.f32.mrf.mxu1 }
 0x2ee   : > { %v1880_v24 = vpop.f32.mrf.mxu1  ;;  %v1921_v4 = vpop.f32.mrf.mxu0 }
 0x2ef   : > { %2419 = vst.msk [vmem:[%s3808_s29 + $0x38] sm:$0xff] %vm490_vm1, %v1880_v24  ;;  %2420 = vst.msk [vmem:[%s3808_s29 + $0x40] sm:$0xff] %vm490_vm1, %v1921_v4 }
 0x2f0   : > { %v2832_v20 = vpop.f32.mrf.mxu1  ;;  %v2837_v63 = vpop.f32.mrf.mxu0 }
 0x2f2   : > { %v1924_v15 = vpop.f32.mrf.mxu0  ;;  %v1965_v61 = vpop.f32.mrf.mxu1 }
 0x2f3   : > { %2421 = vst.msk [vmem:[%s3808_s29 + $0x48] sm:$0xff] %vm490_vm1, %v1924_v15  ;;  %2422 = vst.msk [vmem:[%s3808_s29 + $0x50] sm:$0xff] %vm490_vm1, %v1965_v61 }
 0x2f4   : > { %v2838_v62 = vpop.f32.mrf.mxu0  ;;  %v2843_v1 = vpop.f32.mrf.mxu1 }
 0x2f6   : > { %v1968_v11 = vpop.f32.mrf.mxu1  ;;  %v2009_v34 = vpop.f32.mrf.mxu0 }
 0x2f7   : > { %2423 = vst.msk [vmem:[%s3808_s29 + $0x58] sm:$0xff] %vm490_vm1, %v1968_v11  ;;  %2424 = vst.msk [vmem:[%s3808_s29 + $0x60] sm:$0xff] %vm490_vm1, %v2009_v34 }
 0x2f8   : > { %v2844_v50 = vpop.f32.mrf.mxu1  ;;  %v2849_v23 = vpop.f32.mrf.mxu0 }
 0x2fa   : > { %v2012_v18 = vpop.f32.mrf.mxu0  ;;  %v2053_v39 = vpop.f32.mrf.mxu1 }
 0x2fb   : > { %2425 = vst.msk [vmem:[%s3808_s29 + $0x68] sm:$0xff] %vm490_vm1, %v2012_v18  ;;  %2426 = vst.msk [vmem:[%s3808_s29 + $0x70] sm:$0xff] %vm490_vm1, %v2053_v39 }
 0x2fc   : > { %v2850_v27 = vpop.f32.mrf.mxu0  ;;  %v2855_v60 = vpop.f32.mrf.mxu1 }
 0x2fe   : > { %v2056_v14 = vpop.f32.mrf.mxu1  ;;  %v2097_v9 = vpop.f32.mrf.mxu0 }
 0x2ff   : > { %2427 = vst.msk [vmem:[%s3808_s29 + $0x78] sm:$0xff] %vm490_vm1, %v2056_v14  ;;  %2428 = vst.msk [vmem:[%s3808_s29 + $0x80] sm:$0xff] %vm490_vm1, %v2097_v9 }
 0x300   : > { %v2856_v38 = vpop.f32.mrf.mxu1  ;;  %v2861_v35 = vpop.f32.mrf.mxu0 }
 0x302   : > { %v2100_v51 = vpop.f32.mrf.mxu0  ;;  %v2141_v17 = vpop.f32.mrf.mxu1 }
 0x303   : > { %2429 = vst.msk [vmem:[%s3808_s29 + $0x88] sm:$0xff] %vm490_vm1, %v2100_v51  ;;  %2430 = vst.msk [vmem:[%s3808_s29 + $0x90] sm:$0xff] %vm490_vm1, %v2141_v17 }
 0x304   : > { %v2862_v19 = vpop.f32.mrf.mxu0  ;;  %v2867_v30 = vpop.f32.mrf.mxu1 }
 0x306   : > { %v2144_v31 = vpop.f32.mrf.mxu1  ;;  %v2185_v21 = vpop.f32.mrf.mxu0 }
 0x307   : > { %2431 = vst.msk [vmem:[%s3808_s29 + $0x98] sm:$0xff] %vm490_vm1, %v2144_v31  ;;  %2432 = vst.msk [vmem:[%s3808_s29 + $0xa0] sm:$0xff] %vm490_vm1, %v2185_v21 }
 0x308   : > { %v2868_v41 = vpop.f32.mrf.mxu1  ;;  %v2873_v25 = vpop.f32.mrf.mxu0 }
 0x30a   : > { %v2188_v47 = vpop.f32.mrf.mxu0  ;;  %v2229_v33 = vpop.f32.mrf.mxu1 }
 0x30b   : > { %2433 = vst.msk [vmem:[%s3808_s29 + $0xa8] sm:$0xff] %vm490_vm1, %v2188_v47  ;;  %2434 = vst.msk [vmem:[%s3808_s29 + $0xb0] sm:$0xff] %vm490_vm1, %v2229_v33 }
 0x30c   : > { %v2874_v26 = vpop.f32.mrf.mxu0  ;;  %v2879_v37 = vpop.f32.mrf.mxu1 }
 0x30e   : > { %v2232_v42 = vpop.f32.mrf.mxu1  ;;  %v2273_v40 = vpop.f32.mrf.mxu0 }
 0x30f   : > { %2435 = vst.msk [vmem:[%s3808_s29 + $0xb8] sm:$0xff] %vm490_vm1, %v2232_v42  ;;  %2436 = vst.msk [vmem:[%s3808_s29 + $0xc0] sm:$0xff] %vm490_vm1, %v2273_v40 }
 0x310   : > { %v2880_v32 = vpop.f32.mrf.mxu1  ;;  %v2885_v49 = vpop.f32.mrf.mxu0 }
 0x312   : > { %v2276_v54 = vpop.f32.mrf.mxu0  ;;  %v2317_v5 = vpop.f32.mrf.mxu1 }
 0x313   : > { %2437 = vst.msk [vmem:[%s3808_s29 + $0xc8] sm:$0xff] %vm490_vm1, %v2276_v54  ;;  %2438 = vst.msk [vmem:[%s3808_s29 + $0xd0] sm:$0xff] %vm490_vm1, %v2317_v5 }
 0x314   : > { %v2886_v36 = vpop.f32.mrf.mxu0  ;;  %v2891_v6 = vpop.f32.mrf.mxu1 }
 0x316   : > { %v2320_v46 = vpop.f32.mrf.mxu1  ;;  %v2361_v59 = vpop.f32.mrf.mxu0 }
 0x317   : > { %2439 = vst.msk [vmem:[%s3808_s29 + $0xd8] sm:$0xff] %vm490_vm1, %v2320_v46  ;;  %2440 = vst.msk [vmem:[%s3808_s29 + $0xe0] sm:$0xff] %vm490_vm1, %v2361_v59 }
 0x318   : > { %v2892_v43 = vpop.f32.mrf.mxu1  ;;  %v2897_v45 = vpop.f32.mrf.mxu0 }
 0x31a   : > { %v2364_v44 = vpop.f32.mrf.mxu0  ;;  %v2405_v58 = vpop.f32.mrf.mxu1 }
 0x31b   : > { %2441 = vst.msk [vmem:[%s3808_s29 + $0xe8] sm:$0xff] %vm490_vm1, %v2364_v44  ;;  %2442 = vst.msk [vmem:[%s3808_s29 + $0xf0] sm:$0xff] %vm490_vm1, %v2405_v58 }
 0x31c   : > { %v2898_v22 = vpop.f32.mrf.mxu0  ;;  %v2903_v55 = vpop.f32.mrf.mxu1 }
 0x31e   : > { %v2408_v48 = vpop.f32.mrf.mxu1 }
 0x31f   : > { %2443 = vst.msk [vmem:[%s3808_s29 + $0xf8] sm:$0xff] %vm490_vm1, %v2408_v48 }
 0x320   : > { %v2904_v8 = vpop.f32.mrf.mxu1 }
 0x321 PF: > { %s14_s17 = sadd.s32 1, %s3081_s17   ;;  %s3888_s15 = smov %s3077_s16 }
 0x322   : > { %p11_p5 = scmp.ge.s32.totalorder %s14_s17, 4   ;;  %s3889_s16 = smov %s3891_s18 }
 0x324   :  { %13 = sbr.rel (!%p11_p5) target bundleno = 2 (0x2), region = 75 }

</bundles_post_ra>
